<compile_context>
chip_gen: v5e
topology: v5e:2x2
jax: 0.10.0
libtpu: 0.0.40
codegen_flags: <defaults>
</compile_context>

<pallas_src>
from functools import partial

import numpy as np
import jax
import jax.numpy as jnp
from jax.experimental import pallas as pl
from jax.experimental.pallas import tpu as pltpu


_SQRT1_2 = 0.7071067811865476
_SQRT_2_OVER_PI = 0.7978845608028654


def _gelu_tanh(x):
    # tanh-approximation GELU, evaluated in x.dtype (bf16 fast path on v6e/v7x).
    # Max |err| vs. exact erf-GELU ~3e-3 — well inside the test tolerance.
    u = _SQRT_2_OVER_PI * (x + 0.044715 * (x * x * x))
    return 0.5 * x * (1.0 + jnp.tanh(u))


# ----------------------------------------------------------------------------
# Fused Feed_Forward kernel: LayerNorm + Linear + GELU + Linear + residual
# ----------------------------------------------------------------------------
def ff_kernel(x_ref, w1_ref, b1_ref, w2_ref, b2_ref, o_ref, *, gelu_dtype):
    """
    x_ref  : (TM, C)  f32 token tile
    w1_ref : (C, 4C)  bf16  == LN-gamma-folded torch w1.weight.T
    b1_ref : (1, 4C)  f32   == torch b1 + LN-beta @ w1.weight.T
    w2_ref : (4C, C)  bf16  == torch w2.weight.T
    b2_ref : (1, C)   f32
    o_ref  : (TM, C)  f32
    """
    x = x_ref[...]                                            # (TM, C) f32

    # LayerNorm statistics in a single pass: var = E[x^2] - mu^2  (eps = 1e-5).
    mu = jnp.mean(x, axis=-1, keepdims=True)
    m2 = jnp.mean(x * x, axis=-1, keepdims=True)
    xn = (x - mu) * jax.lax.rsqrt(m2 - mu * mu + 1e-5)
    # (gamma / beta were folded into w1 / b1 on the host.)

    # Linear C -> 4C on the MXU (bf16 inputs, f32 accumulation), then cast the
    # (TM, 4C) intermediate to gelu_dtype ONCE: bias add + GELU run on the bf16
    # VALU/EUP path (v6e/v7x) and feed the second matmul directly.
    h = jnp.dot(xn.astype(jnp.bfloat16), w1_ref[...],
                preferred_element_type=jnp.float32)
    h = (h + b1_ref[...]).astype(gelu_dtype)
    h = _gelu_tanh(h)

    # Linear 4C -> C on the MXU (bf16 inputs, f32 accumulation); bias + residual f32.
    y = jnp.dot(h.astype(jnp.bfloat16), w2_ref[...],
                preferred_element_type=jnp.float32)
    o_ref[...] = (y + b2_ref[...] + x).astype(o_ref.dtype)


# ----------------------------------------------------------------------------
# Wrapper
# ----------------------------------------------------------------------------
def feed_forward(x, params, *, block_tokens=512, min_grid_steps=4,
                 gelu_dtype=jnp.bfloat16):
    """x: (B, N, C) f32 -> (B, N, C) f32.

    gelu_dtype: jnp.bfloat16 on v6e/v7x (bf16 VALU/EUP); use jnp.float32 on v5e.
    """
    B, N, C = x.shape
    H4 = params['w1'].shape[1]
    T = B * N

    # Token-tile size: as large as possible, but keep >= min_grid_steps grid steps
    # (>= 2 per TensorCore on v7x megacore) so DMA/compute actually overlap.
    tm = min(block_tokens, T)
    if T >= min_grid_steps * 8 and T // tm < min_grid_steps:
        tm = (T // min_grid_steps) // 8 * 8
    tm = max(8, (tm // 8) * 8)                 # multiple of 8 sublanes
    num_tiles = -(-T // tm)
    T_pad = num_tiles * tm

    xf = x.reshape(T, C).astype(jnp.float32)
    if T_pad != T:
        # zero rows are harmless through LN (eps keeps rsqrt finite); sliced off below
        xf = jnp.pad(xf, ((0, T_pad - T), (0, 0)))

    # Fold LN gamma/beta into the first linear (in f32, then cast to bf16):
    #   (xn*gamma + beta) @ w1 + b1  ==  xn @ (gamma[:,None]*w1) + (beta @ w1 + b1)
    g = params['ln_g'].astype(jnp.float32)                     # (1, C)
    bt = params['ln_b'].astype(jnp.float32)                    # (1, C)
    w1f = params['w1'].astype(jnp.float32)                     # (C, H4)
    w1_eff = (g.reshape(C, 1) * w1f).astype(jnp.bfloat16)      # (C, H4) bf16
    b1_eff = params['b1'].astype(jnp.float32) + bt @ w1f       # (1, H4) f32
    w2_bf = params['w2'].astype(jnp.bfloat16)                  # (H4, C) bf16
    b2 = params['b2'].astype(jnp.float32)                      # (1, C)  f32

    # VMEM working set (double-buffered x/out tiles + resident params + (TM,4C)
    # intermediates), with 4x headroom; never pin a full v7x core's 64 MiB.
    vmem_need = (2 * tm * C * 4 + 2 * tm * C * 4              # x / out tiles (x2 bufs)
                 + 2 * 2 * C * H4 * 2                         # bf16 w1+w2, double-buffered
                 + 2 * (H4 + C) * 4                           # biases
                 + tm * H4 * (4 + 2)                          # h: f32 acc + bf16 copy
                 + 3 * tm * C * 4)                            # xn / LN temporaries
    vmem_limit = int(min(96 * 2**20, max(16 * 2**20, 4 * vmem_need)))

    cost = pl.CostEstimate(
        flops=4 * T_pad * C * H4,                             # two matmuls
        transcendentals=T_pad * H4,                           # tanh in GELU
        bytes_accessed=2 * T_pad * C * 4 + 2 * C * H4 * 2 + (H4 + 2 * C) * 4,
    )

    const2 = lambda i: (0, 0)
    tile2 = lambda i: (i, 0)

    out = pl.pallas_call(
        partial(ff_kernel, gelu_dtype=gelu_dtype),
        out_shape=jax.ShapeDtypeStruct((T_pad, C), jnp.float32),
        grid=(num_tiles,),
        in_specs=[
            pl.BlockSpec((tm, C), tile2),      # x tile (pipelined over the grid)
            # Grid-constant params: VMEM-resident across all grid steps.
            # NOTE: for large C on v7x, single-buffer these (pipeline_mode=
            # pl.Buffered(1)) and/or add an H4-tiled accumulator grid axis;
            # at C=128 the resident bf16 weights are only ~0.25 MiB.
            pl.BlockSpec((C, H4), const2),     # w1 (gamma-folded, bf16)
            pl.BlockSpec((1, H4), const2),     # b1 (beta-folded, f32)
            pl.BlockSpec((H4, C), const2),     # w2 (bf16)
            pl.BlockSpec((1, C), const2),      # b2 (f32)
        ],
        out_specs=pl.BlockSpec((tm, C), tile2),
        compiler_params=pltpu.CompilerParams(
            dimension_semantics=("parallel",),         # megacore sharding on v7x
            vmem_limit_bytes=vmem_limit),
        cost_estimate=cost,
    )(xf, w1_eff, b1_eff, w2_bf, b2)

    return out[:T].reshape(B, N, C)


# ----------------------------------------------------------------------------
# Deterministic synthetic parameters (shapes from the torch __init__)
# ----------------------------------------------------------------------------
def init_params(key, emb_dim, dim_expan=4):
    C = emb_dim
    H4 = dim_expan * C
    ks = jax.random.split(key, 6)

    def nrm(k, shape, s):
        return jax.random.normal(k, shape, jnp.float32) * s

    return dict(
        ln_g=1.0 + nrm(ks[0], (1, C), 0.1),                      # LN weight
        ln_b=nrm(ks[1], (1, C), 0.1),                            # LN bias
        w1=nrm(ks[2], (C, H4), 0.1).astype(jnp.bfloat16),        # Linear(C,4C).weight.T
        b1=nrm(ks[3], (1, H4), 0.05),
        w2=nrm(ks[4], (H4, C), 0.1).astype(jnp.bfloat16),        # Linear(4C,C).weight.T
        b2=nrm(ks[5], (1, C), 0.05),
    )


# ----------------------------------------------------------------------------
# Pure-JAX f32 reference (mirrors the torch module) for correctness check
# ----------------------------------------------------------------------------
def ref_feed_forward(x, params):
    w1 = params['w1'].astype(jnp.float32)
    w2 = params['w2'].astype(jnp.float32)
    mu = jnp.mean(x, axis=-1, keepdims=True)
    var = jnp.mean((x - mu) ** 2, axis=-1, keepdims=True)
    xn = (x - mu) / jnp.sqrt(var + 1e-5)
    xn = xn * params['ln_g'][None] + params['ln_b'][None]
    h = xn @ w1 + params['b1'][None]
    h = 0.5 * h * (1.0 + jax.scipy.special.erf(h * _SQRT1_2))   # exact GELU
    y = h @ w2 + params['b2'][None]
    return y + x


if __name__ == "__main__":
    B, N, C = 2, 256, 128          # emb_dim=128 -> lane-dense (C is a 128 multiple)
    key = jax.random.PRNGKey(0)
    kx, kp = jax.random.split(key)
    x = jax.random.normal(kx, (B, N, C), jnp.float32)
    params = init_params(kp, C)

    out = feed_forward(x, params)
    out = jax.block_until_ready(out)

    ref = ref_feed_forward(x, params)
    # Stacked approximations vs. the exact f32 reference:
    #   bf16 MXU inputs (f32 accumulation) + tanh-GELU (|err| ~3e-3) evaluated
    #   in bf16 + LN affine folded into bf16 weights  ->  ~1e-2 level error.
    np.testing.assert_allclose(np.asarray(out), np.asarray(ref), rtol=3e-2, atol=3e-2)
    print("KERNEL_OK")
</pallas_src>

<mosaic_0001>
module attributes {stable_mosaic.version = 11 : i64} {
  func.func @ff_kernel(%arg0: i32, %arg1: memref<128x128xf32, #tpu.memory_space<vmem>>, %arg2: memref<128x512xbf16, #tpu.memory_space<vmem>>, %arg3: memref<1x512xf32, #tpu.memory_space<vmem>>, %arg4: memref<512x128xbf16, #tpu.memory_space<vmem>>, %arg5: memref<1x128xf32, #tpu.memory_space<vmem>>, %arg6: memref<128x128xf32, #tpu.memory_space<vmem>>) attributes {dimension_semantics = [#tpu.dimension_semantics<parallel>], iteration_bounds = array<i64: 4>, scalar_prefetch = 0 : i64, scratch_operands = 0 : i64, tpu.core_type = #tpu.core_type<tc>, window_params = [{transform_indices = @transform_0, window_bounds = array<i64: 128, 128>}, {pipeline_mode = #tpu.pipeline_mode<synchronous>, transform_indices = @transform_1, window_bounds = array<i64: 128, 512>}, {pipeline_mode = #tpu.pipeline_mode<synchronous>, transform_indices = @transform_2, window_bounds = array<i64: 1, 512>}, {pipeline_mode = #tpu.pipeline_mode<synchronous>, transform_indices = @transform_3, window_bounds = array<i64: 512, 128>}, {pipeline_mode = #tpu.pipeline_mode<synchronous>, transform_indices = @transform_4, window_bounds = array<i64: 1, 128>}, {transform_indices = @transform_5, window_bounds = array<i64: 128, 128>}]} {
    %c0 = arith.constant 0 : index
    %c0_0 = arith.constant 0 : index
    %0 = vector.load %arg1[%c0, %c0_0] : memref<128x128xf32, #tpu.memory_space<vmem>>, vector<128x128xf32>
    %cst = arith.constant dense<0.000000e+00> : vector<128xf32>
    %1 = vector.multi_reduction <add>, %0, %cst [1] : vector<128x128xf32> to vector<128xf32>
    %2 = vector.shape_cast %1 : vector<128xf32> to vector<128x1xf32>
    %cst_1 = arith.constant 1.280000e+02 : f32
    %3 = vector.broadcast %cst_1 : f32 to vector<128x1xf32>
    %4 = arith.divf %2, %3 : vector<128x1xf32>
    %5 = arith.mulf %0, %0 : vector<128x128xf32>
    %cst_2 = arith.constant dense<0.000000e+00> : vector<128xf32>
    %6 = vector.multi_reduction <add>, %5, %cst_2 [1] : vector<128x128xf32> to vector<128xf32>
    %7 = vector.shape_cast %6 : vector<128xf32> to vector<128x1xf32>
    %cst_3 = arith.constant 1.280000e+02 : f32
    %8 = vector.broadcast %cst_3 : f32 to vector<128x1xf32>
    %9 = arith.divf %7, %8 : vector<128x1xf32>
    %10 = vector.broadcast %4 : vector<128x1xf32> to vector<128x128xf32>
    %11 = arith.subf %0, %10 : vector<128x128xf32>
    %12 = arith.mulf %4, %4 : vector<128x1xf32>
    %13 = arith.subf %9, %12 : vector<128x1xf32>
    %cst_4 = arith.constant 9.99999974E-6 : f32
    %14 = vector.broadcast %cst_4 : f32 to vector<128x1xf32>
    %15 = arith.addf %13, %14 : vector<128x1xf32>
    %16 = math.rsqrt %15 : vector<128x1xf32>
    %17 = vector.broadcast %16 : vector<128x1xf32> to vector<128x128xf32>
    %18 = arith.mulf %11, %17 : vector<128x128xf32>
    %19 = arith.truncf %18 : vector<128x128xf32> to vector<128x128xbf16>
    %c0_5 = arith.constant 0 : index
    %c0_6 = arith.constant 0 : index
    %20 = vector.load %arg2[%c0_5, %c0_6] : memref<128x512xbf16, #tpu.memory_space<vmem>>, vector<128x512xbf16>
    %cst_7 = arith.constant dense<0.000000e+00> : vector<128x512xf32>
    %21 = tpu.matmul %19, %20, %cst_7 {dimension_numbers = #tpu.dot_dimension_numbers<[1], [0], [0], [1], [0, 0, 1, 1], [], []>} : vector<128x128xbf16>, vector<128x512xbf16>, vector<128x512xf32> -> vector<128x512xf32>
    %c0_8 = arith.constant 0 : index
    %c0_9 = arith.constant 0 : index
    %22 = vector.load %arg3[%c0_8, %c0_9] : memref<1x512xf32, #tpu.memory_space<vmem>>, vector<1x512xf32>
    %23 = vector.broadcast %22 : vector<1x512xf32> to vector<128x512xf32>
    %24 = arith.addf %21, %23 : vector<128x512xf32>
    %25 = arith.truncf %24 : vector<128x512xf32> to vector<128x512xbf16>
    %26 = arith.mulf %25, %25 : vector<128x512xbf16>
    %27 = arith.mulf %26, %25 : vector<128x512xbf16>
    %cst_10 = arith.constant 4.467770e-02 : bf16
    %28 = vector.broadcast %cst_10 : bf16 to vector<128x512xbf16>
    %29 = arith.mulf %28, %27 : vector<128x512xbf16>
    %30 = arith.addf %25, %29 : vector<128x512xbf16>
    %cst_11 = arith.constant 7.968750e-01 : bf16
    %31 = vector.broadcast %cst_11 : bf16 to vector<128x512xbf16>
    %32 = arith.mulf %31, %30 : vector<128x512xbf16>
    %cst_12 = arith.constant 5.000000e-01 : bf16
    %33 = vector.broadcast %cst_12 : bf16 to vector<128x512xbf16>
    %34 = arith.mulf %33, %25 : vector<128x512xbf16>
    %35 = math.tanh %32 : vector<128x512xbf16>
    %cst_13 = arith.constant 1.000000e+00 : bf16
    %36 = vector.broadcast %cst_13 : bf16 to vector<128x512xbf16>
    %37 = arith.addf %36, %35 : vector<128x512xbf16>
    %38 = arith.mulf %34, %37 : vector<128x512xbf16>
    %c0_14 = arith.constant 0 : index
    %c0_15 = arith.constant 0 : index
    %39 = vector.load %arg4[%c0_14, %c0_15] : memref<512x128xbf16, #tpu.memory_space<vmem>>, vector<512x128xbf16>
    %cst_16 = arith.constant dense<0.000000e+00> : vector<128x128xf32>
    %40 = tpu.matmul %38, %39, %cst_16 {dimension_numbers = #tpu.dot_dimension_numbers<[1], [0], [0], [1], [0, 0, 1, 1], [], []>} : vector<128x512xbf16>, vector<512x128xbf16>, vector<128x128xf32> -> vector<128x128xf32>
    %c0_17 = arith.constant 0 : index
    %c0_18 = arith.constant 0 : index
    %41 = vector.load %arg5[%c0_17, %c0_18] : memref<1x128xf32, #tpu.memory_space<vmem>>, vector<1x128xf32>
    %42 = vector.broadcast %41 : vector<1x128xf32> to vector<128x128xf32>
    %43 = arith.addf %40, %42 : vector<128x128xf32>
    %44 = arith.addf %43, %0 : vector<128x128xf32>
    %c0_19 = arith.constant 0 : index
    %c0_20 = arith.constant 0 : index
    %45 = vector.load %arg6[%c0_19, %c0_20] : memref<128x128xf32, #tpu.memory_space<vmem>>, vector<128x128xf32>
    tpu.vector_store %arg6[%c0_19, %c0_20], %44 {strides = array<i32>} : memref<128x128xf32, #tpu.memory_space<vmem>>, vector<128x128xf32>,
    return
  }
  func.func @transform_0(%arg0: i32) -> (i32, i32) {
    %c0_i32 = arith.constant 0 : i32
    %c0_i32_0 = arith.constant 0 : i32
    return %arg0, %c0_i32 : i32, i32
  }
  func.func @transform_1(%arg0: i32) -> (i32, i32) {
    %c0_i32 = arith.constant 0 : i32
    %c0_i32_0 = arith.constant 0 : i32
    %c0_i32_1 = arith.constant 0 : i32
    return %c0_i32, %c0_i32_0 : i32, i32
  }
  func.func @transform_2(%arg0: i32) -> (i32, i32) {
    %c0_i32 = arith.constant 0 : i32
    %c0_i32_0 = arith.constant 0 : i32
    %c0_i32_1 = arith.constant 0 : i32
    return %c0_i32, %c0_i32_0 : i32, i32
  }
  func.func @transform_3(%arg0: i32) -> (i32, i32) {
    %c0_i32 = arith.constant 0 : i32
    %c0_i32_0 = arith.constant 0 : i32
    %c0_i32_1 = arith.constant 0 : i32
    return %c0_i32, %c0_i32_0 : i32, i32
  }
  func.func @transform_4(%arg0: i32) -> (i32, i32) {
    %c0_i32 = arith.constant 0 : i32
    %c0_i32_0 = arith.constant 0 : i32
    %c0_i32_1 = arith.constant 0 : i32
    return %c0_i32, %c0_i32_0 : i32, i32
  }
  func.func @transform_5(%arg0: i32) -> (i32, i32) {
    %c0_i32 = arith.constant 0 : i32
    %c0_i32_0 = arith.constant 0 : i32
    return %arg0, %c0_i32 : i32, i32
  }
}

</mosaic_0001>

<bundles_post_ra>
// kernel: tpu_custom_call.1
= control target key start
LH: loop header
LB: loop body
LE: loop exit
PB: predicated region body
PF: predicated region fallthrough
CT: control target
= control target key end

     0   :  { %10 = vsyncpa [#allocation3], 0  ;;  %s5595_s0 = inlined_call_operand.hbm [shape: f32[512,128], index: 0, kind: input, shape index: {}]   ;;  %s5596_s1 = inlined_call_operand.hbm [shape: bf16[128,512], index: 1, kind: input, shape index: {}]   ;;  %s5597_s2 = inlined_call_operand.hbm [shape: f32[1,512], index: 2, kind: input, shape index: {}]   ;;  %s5598_s3 = inlined_call_operand.hbm [shape: bf16[512,128], index: 3, kind: input, shape index: {}]   ;;  %s5599_s4 = inlined_call_operand.vmem [shape: f32[1,128], index: 4, kind: input, shape index: {}]   ;;  %s5600_s5 = inlined_call_operand.hbm [shape: f32[512,128], index: 5, kind: output, shape index: {}]  }
   0x1   :  { %12 = vsyncpa [#allocation3 + $0x1], 0 }
   0x2   :  { %13 = vsyncpa [#allocation6], 0 }
   0x3   :  { %14 = vsyncpa [#allocation9], 0 }
   0x4   :  { %15 = vsyncpa [#allocation4], 0 }
   0x5   :  { %17 = vsyncpa [#allocation4 + $0x1], 0  ;;  %s4001_s18 = smov 0   ;;  %s4003_s19 = smov 0  }
   0x6   :  { %s4005_s20 = smov 0   ;;  %s4007_s21 = smov 0  }
   0x7 LB: > { %s4022_s22 = sadd.s32 4294967295, %s3957_s21   ;;  %s3154_s23 = sadd.s32 4294967294, %s3957_s21   ;;  %s3957_s21 = sphi %s4007_s21, %s5760_s21   ;;  %s3953_s20 = sphi %s4005_s20, %s5759_s20   ;;  %s3949_s19 = sphi %s4003_s19, %s5758_s19   ;;  %s3945_s18 = sphi %s4001_s18, %s5757_s18  }
   0x8   : > { %p43_p0 = scmp.ne.s32.totalorder %s3949_s19, %s3945_s18  ;;  %p44_p1 = scmp.eq.s32.totalorder %s4022_s22, 0 }
   0x9   : > { %p151_p2 = scmp.eq.s32.totalorder %s4022_s22, 3  ;;  %p157_p3 = scmp.eq.s32.totalorder %s3154_s23, 3 }
   0xa   : > { %p4031_p4 = por %p44_p1, %p43_p0  ;;  %p3155_p5 = scmp.ge.s32.totalorder %s3957_s21, 1 }
   0xb   : > { %p4036_p6 = por %p157_p3, %p43_p0  ;;  %p164_p7 = scmp.lt.s32.totalorder %s3957_s21, 5 }
   0xc   : > { %s175_s28 = sshll.u32 %s5596_s1, 4  ;;  %s3959_s30 = smov [#allocation5]   ;;  %s176_s28 = int_to_ptr.hbm [resolvable:$true] %s175_s28 }
   0xd   : > { %p4044_p8 = pnand %p3155_p5, %p164_p7  ;;  %s177_s6 = sshll.u32 %s3959_s30, 4  ;;  %s178_s6 = int_to_ptr.vmem [resolvable:$true] %s177_s6 }
   0xe   : > { %s190_s10 = sshll.u32 %s5597_s2, 4  ;;  %s3960_s11 = smov 256   ;;  %s191_s10 = int_to_ptr.hbm [resolvable:$true] %s190_s10 }
   0xf   : > { %p3512_p9 = pneg %p4044_p8  ;;  %s3961_s12 = smov 16  }
  0x10   : > { %s3962_s13 = smov [#allocation7]   ;;  %s201_s17 = sshll.u32 %s5598_s3, 4  ;;  %s202_s17 = int_to_ptr.hbm [resolvable:$true] %s201_s17 }
  0x11   : > { %p4052_p10 = pnand %p3512_p9, %p44_p1  ;;  %s192_s14 = sshll.u32 %s3962_s13, 4  ;;  %s193_s14 = int_to_ptr.vmem [resolvable:$true] %s192_s14 }
  0x12   : > { %s3963_s23 = smov [#allocation8]   ;;  %s3964_s27 = smov 64  }
  0x13   : > { %3515 = dma.hbm_to_vmem [thread:$0]  (!%p4052_p10), %s176_s28, 4096, %s178_s6, [#allocation6], %s3960_s11, %s3960_s11, %s3961_s12  }
  0x14   : > { %3518 = dma.hbm_to_vmem [thread:$0]  (!%p4052_p10), %s191_s10, 64, %s193_s14, [#allocation6]  }
  0x15   : > { %s203_s26 = sshll.u32 %s3963_s23, 4  ;;  %s3965_s28 = smov 4   ;;  %s204_s26 = int_to_ptr.vmem [resolvable:$true] %s203_s26 }
  0x16   : > { %3521 = dma.hbm_to_vmem [thread:$0]  (!%p4052_p10), %s202_s17, 4096, %s204_s26, [#allocation9], %s3964_s27, %s3964_s27, %s3965_s28  }
  0x17   : > { %s4069_s30 = sadd.s32 1, %s3957_s21   ;;  %s30_s8 = sadd.s32 1, %s3953_s20 }
  0x18   : > { %s27_s6 = ssub.s32 %s3957_s21, %s4069_s30  ;;  %p37_p12 = scmp.ne.s32.totalorder %s3953_s20, %s3949_s19 }
  0x19   : > { %p28_p11 = scmp.eq.s32.totalorder %s27_s6, 0  ;;  %p38_p13 = scmp.eq.s32.totalorder %s3957_s21, 0 }
  0x1a   : > { %p3533_p0 = scmp.lt.s32.totalorder %s3957_s21, 4  ;;  %p4083_p5 = por %p151_p2, %p37_p12 }
  0x1b   : > { %s4079_s9 = scalar_select %p28_p11, %s3953_s20, %s30_s8  }
  0x1c   : > { %p39_p3 = por %p38_p13, %p37_p12  ;;  %s220_s7 = sand.u32 1, %s3953_s20  }
  0x1d   : > { %s3430_s11 = sshll.u32 %s3957_s21, 7  ;;  %s3160_s12 = sshll.u32 %s220_s7, 7 }
  0x1e   : > { %s229_s15 = scalar_lea.hbm %s5595_s0, %s3430_s11  ;;  %s224_s17 = scalar_lea.vmem [#allocation2], %s3160_s12 }
  0x1f   : > { %s230_s16 = sshll.u32 %s229_s15, 4  ;;  %s232_s23 = sshll.u32 %s224_s17, 4  ;;  %s231_s16 = int_to_ptr.hbm [resolvable:$true] %s230_s16  ;;  %s233_s23 = int_to_ptr.vmem [resolvable:$true] %s232_s23 }
  0x20   : > { %p4094_p7 = pnand %p3533_p0, %p39_p3  ;;  %s221_s27 = scalar_lea.sflag [#allocation3], %s220_s7 }
  0x21   : > { %s3853_s28 = sshra.s32 %s231_s16, 4  ;;  %s3860_s12 = scalar_lea.hbm %s5595_s0, 512  ;;  %s3854_s28 = int_to_ptr.hbm [resolvable:$true] %s3853_s28 }
  0x22   : > { %s3855_s6 = scalar_lea.hbm %s3854_s28, 128  ;;  %p3857_p9 = pneg %p4094_p7 }
  0x23   : > { %p3856_p2 = scmp.ne.s32.totalorder %s3854_s28, %s3855_s6  ;;  %p3861_p12 = scmp.lt.s32.totalorder %s3854_s28, %s5595_s0 }
  0x24   : > { %p3862_p13 = scmp.lt.s32.totalorder %s3860_s12, %s3855_s6 }
  0x25   : > { %p3858_p10 = pnand %p3857_p9, %p3856_p2 }
  0x26   : > { %p3863_p0 = por %p3862_p13, %p3861_p12 }
  0x27   : > { %p3859_p11 = pneg %p3858_p10 }
  0x29   : > { %p3864_p3 = pnand %p3863_p0, %p3859_p11 }
  0x2b   : > { %3867 = shalt.err (!%p3864_p3)
}
  0x2c   : > { %s3966_s7 = smov 128   ;;  %s3967_s15 = smov 8  }
  0x2d   : > { %3525 = dma.hbm_to_vmem [thread:$0]  (!%p4094_p7), %s231_s16, 2048, %s233_s23, %s221_s27, %s3966_s7, %s3966_s7, %s3967_s15  }
  0x2e   : > { %244 = sbr.rel (%p4044_p8) target bundleno = 899 (0x383), region = 40 }
  0x33   : > { %s4111_s17 = sand.u32 1, %s3949_s19  }
  0x34   : > { %s3164_s28 = sshll.u32 %s4111_s17, 7  ;;  %s247_s6 = scalar_lea.sflag [#allocation3], %s4111_s17 }
  0x35   : > { %s4117_s8 = scalar_lea.vmem [#allocation2], %s3164_s28 }
  0x36   : > { %3928 = dma.done.wait (%p4031_p4), %s247_s6, 2048  }
  0x37   : > { %3930 = vsyncadd (%p4031_p4), %s247_s6, 4294965248 }
  0x38   : > { %3932 = dma.done.wait (%p44_p1), [#allocation6], 4160  }
  0x39   : > { %3934 = vsyncadd (%p44_p1), [#allocation6], 4294963136 }
  0x3a   : > { %3936 = dma.done.wait (%p44_p1), [#allocation9], 4096  }
  0x3b   : > { %3938 = vsyncadd (%p44_p1), [#allocation9], 4294963200  ;;  %v4132_v0 = vld [vmem:[%s4117_s8] sm:$0xff]  ;;  %v4135_v1 = vld [vmem:[%s4117_s8 + $0x10] sm:$0xff]  ;;  %v3968_v32 = vmov 128.0   ;;  %s5514_s16 = scalar_lea.vmem [#allocation10], %s3164_s28 }
  0x3c   : > { %311 = vadd.xlane.f32.xlu0 %v4132_v0  ;;  %315 = vadd.xlane.f32.xlu2 %v4135_v1  ;;  %v366_v2 = vmul.f32 %v4132_v0, %v4132_v0  ;;  %v4142_v3 = vld [vmem:[%s4117_s8 + $0x8] sm:$0xff]  ;;  %v4145_v4 = vld [vmem:[%s4117_s8 + $0x18] sm:$0xff]  ;;  %v368_v6 = vmul.f32 %v4135_v1, %v4135_v1  ;;  %v4154_v7 = vld [vmem:[%s4117_s8 + $0x20] sm:$0xff]  ;;  %3583 = vrcp.f32 %v3968_v32  ;;  %s3495_s23 = sshll.u32 %s4022_s22, 7  ;;  %s3049_s12 = sshll.u32 %s5514_s16, 4  ;;  %s3050_s12 = int_to_ptr.vmem [resolvable:$true] %s3049_s12 }
  0x3d   : > { %v367_v5 = vmul.f32 %v4142_v3, %v4142_v3  ;;  %v369_v8 = vmul.f32 %v4145_v4, %v4145_v4  ;;  %v4160_v9 = vld [vmem:[%s4117_s8 + $0x28] sm:$0xff]  ;;  %v370_v11 = vmul.f32 %v4154_v7, %v4154_v7  ;;  %v4168_v12 = vld [vmem:[%s4117_s8 + $0x30] sm:$0xff]  ;;  %v4173_v14 = vld [vmem:[%s4117_s8 + $0x38] sm:$0xff]  ;;  %s3048_s11 = scalar_lea.hbm %s5600_s5, %s3495_s23  ;;  %s3037_s22 = scalar_lea.sflag [#allocation4], %s4111_s17 }
  0x3e   : > { %382 = vadd.xlane.f32.xlu1 %v366_v2  ;;  %v371_v10 = vmul.f32 %v4160_v9, %v4160_v9  ;;  %v372_v13 = vmul.f32 %v4168_v12, %v4168_v12  ;;  %v373_v15 = vmul.f32 %v4173_v14, %v4173_v14  ;;  %v4180_v16 = vld [vmem:[%s4117_s8 + $0x48] sm:$0xff]  ;;  %v4183_v17 = vld [vmem:[%s4117_s8 + $0x40] sm:$0xff]  ;;  %v4190_v19 = vld [vmem:[%s4117_s8 + $0x50] sm:$0xff]  ;;  %s3051_s13 = sshll.u32 %s3048_s11, 4  ;;  %s3903_s6 = scalar_lea.hbm %s5600_s5, 512  ;;  %s3052_s13 = int_to_ptr.hbm [resolvable:$true] %s3051_s13 }
  0x3f   : > { %v374_v18 = vmul.f32 %v4183_v17, %v4183_v17  ;;  %v375_v20 = vmul.f32 %v4180_v16, %v4180_v16  ;;  %v4196_v21 = vld [vmem:[%s4117_s8 + $0x58] sm:$0xff]  ;;  %v376_v23 = vmul.f32 %v4190_v19, %v4190_v19  ;;  %v4204_v24 = vld [vmem:[%s4117_s8 + $0x60] sm:$0xff]  ;;  %v4209_v26 = vld [vmem:[%s4117_s8 + $0x68] sm:$0xff]  ;;  %s3897_s14 = sshra.s32 %s3052_s13, 4  ;;  %s3898_s14 = int_to_ptr.hbm [resolvable:$true] %s3897_s14 }
  0x40   : > { %v377_v22 = vmul.f32 %v4196_v21, %v4196_v21  ;;  %v378_v25 = vmul.f32 %v4204_v24, %v4204_v24  ;;  %v379_v27 = vmul.f32 %v4209_v26, %v4209_v26  ;;  %v310_v28 = vld [vmem:[%s4117_s8 + $0x78] sm:$0xff]  ;;  %v309_v29 = vld [vmem:[%s4117_s8 + $0x70] sm:$0xff]  ;;  %v3283_v33 = vld [vmem:[#allocation5 + $0xe0] sm:$0xf]  ;;  %s3899_s7 = scalar_lea.hbm %s3898_s14, 128  ;;  %p3904_p7 = scmp.lt.s32.totalorder %s3898_s14, %s5600_s5 }
  0x41   : > { %v380_v30 = vmul.f32 %v309_v29, %v309_v29  ;;  %v381_v31 = vmul.f32 %v310_v28, %v310_v28  ;;  %v3461_v34 = vld [vmem:[#allocation5 + $0xec] sm:$0xf0]  ;;  %v3459_v35 = vld [vmem:[#allocation5 + $0xe4] sm:$0xf]  ;;  %v3285_v37 = vld [vmem:[#allocation5 + $0xf0] sm:$0xf0]  ;;  %p3900_p1 = scmp.ne.s32.totalorder %s3898_s14, %s3899_s7  ;;  %p3905_p2 = scmp.lt.s32.totalorder %s3903_s6, %s3899_s7 }
  0x42   : > { %v3284_v36 = vor.u32 %v3461_v34, %v3283_v33  ;;  %v3291_v38 = vld [vmem:[#allocation5 + $0xe8] sm:$0xf]  ;;  %v3462_v39 = vld [vmem:[#allocation5 + $0xf4] sm:$0xf0]  ;;  %v3288_v40 = vor.u32 %v3459_v35, %v3285_v37  ;;  %v3460_v42 = vld [vmem:[#allocation5 + $0xec] sm:$0xf]  ;;  %v4217_v45 = vpop.eup %3583 }
  0x43   : > { %v3292_v41 = vor.u32 %v3462_v39, %v3291_v38  ;;  %v3293_v43 = vld [vmem:[#allocation5 + $0xf8] sm:$0xf0]  ;;  %v3267_v46 = vld [vmem:[#allocation5 + $0xc0] sm:$0xf]  ;;  %v3457_v47 = vld [vmem:[#allocation5 + $0xcc] sm:$0xf0]  ;;  %vm348_vm0 = vweird.f32 %v4217_v45  ;;  %p3901_p4 = pnand %p3900_p1, %p4083_p5  ;;  %p3906_p9 = por %p3905_p2, %p3904_p7 }
  0x44   : > { %313 = vadd.xlane.f32.xlu0 %v4142_v3  ;;  %317 = vadd.xlane.f32.xlu2 %v4145_v4  ;;  %v3296_v44 = vor.u32 %v3460_v42, %v3293_v43  ;;  %v3455_v48 = vld [vmem:[#allocation5 + $0xc4] sm:$0xf]  ;;  %v3268_v49 = vor.u32 %v3457_v47, %v3267_v46  ;;  %v3269_v50 = vld [vmem:[#allocation5 + $0xd0] sm:$0xf0]  ;;  %v3275_v51 = vld [vmem:[#allocation5 + $0xc8] sm:$0xf] }
  0x45   : > { %880 = vmatpush.bf16.msra.mxu0 %v3284_v36  ;;  %929 = vmatpush.bf16.msra.mxu1 %v3288_v40  ;;  %v3458_v52 = vld [vmem:[#allocation5 + $0xd4] sm:$0xf0]  ;;  %v3272_v53 = vor.u32 %v3455_v48, %v3269_v50  ;;  %v3456_v55 = vld [vmem:[#allocation5 + $0xcc] sm:$0xf]  ;;  %v3277_v56 = vld [vmem:[#allocation5 + $0xd8] sm:$0xf0]  ;;  %p3902_p8 = pneg %p3901_p4 }
  0x46   : > { %384 = vadd.xlane.f32.xlu1 %v367_v5  ;;  %978 = vmatpush.bf16.msra.mxu2 %v3292_v41  ;;  %v3276_v54 = vor.u32 %v3458_v52, %v3275_v51  ;;  %v344_v57 = vmul.f32 128.0, %v4217_v45  ;;  %v3280_v58 = vor.u32 %v3456_v55, %v3277_v56  ;;  %v3251_v59 = vld [vmem:[#allocation5 + $0xa0] sm:$0xf]  ;;  %v3453_v60 = vld [vmem:[#allocation5 + $0xac] sm:$0xf0] }
  0x47   : > { %1027 = vmatpush.bf16.msra.mxu3 %v3296_v44  ;;  %v3451_v61 = vld [vmem:[#allocation5 + $0xa4] sm:$0xf]  ;;  %v3252_v62 = vor.u32 %v3453_v60, %v3251_v59  ;;  %v3253_v63 = vld [vmem:[#allocation5 + $0xb0] sm:$0xf0]  ;;  %v3259_v2 = vld [vmem:[#allocation5 + $0xa8] sm:$0xf]  ;;  %p3907_p10 = pnand %p3906_p9, %p3902_p8 }
  0x48   : > { %v3454_v5 = vld [vmem:[#allocation5 + $0xb4] sm:$0xf0]  ;;  %v3245_v32 = vld [vmem:[#allocation5 + $0x98] sm:$0xf0]  ;;  %v3219_v35 = vld [vmem:[#allocation5 + $0x60] sm:$0xf] }
  0x49   : > { %881 = vmatpush.bf16.msra.mxu0 %v3268_v49  ;;  %930 = vmatpush.bf16.msra.mxu1 %v3272_v53  ;;  %v3445_v36 = vld [vmem:[#allocation5 + $0x6c] sm:$0xf0]  ;;  %v3443_v37 = vld [vmem:[#allocation5 + $0x64] sm:$0xf]  ;;  %v3221_v39 = vld [vmem:[#allocation5 + $0x70] sm:$0xf0] }
  0x4a   : > { %979 = vmatpush.bf16.msra.mxu2 %v3276_v54  ;;  %v3220_v38 = vor.u32 %v3445_v36, %v3219_v35  ;;  %v3227_v40 = vld [vmem:[#allocation5 + $0x68] sm:$0xf]  ;;  %v3446_v41 = vld [vmem:[#allocation5 + $0x74] sm:$0xf0]  ;;  %v3224_v42 = vor.u32 %v3443_v37, %v3221_v39  ;;  %v3444_v44 = vld [vmem:[#allocation5 + $0x6c] sm:$0xf] }
  0x4b   : > { %1028 = vmatpush.bf16.msra.mxu3 %v3280_v58  ;;  %v3228_v43 = vor.u32 %v3446_v41, %v3227_v40  ;;  %v3229_v46 = vld [vmem:[#allocation5 + $0x78] sm:$0xf0]  ;;  %v3203_v49 = vld [vmem:[#allocation5 + $0x40] sm:$0xf]  ;;  %v3441_v50 = vld [vmem:[#allocation5 + $0x4c] sm:$0xf0] }
  0x4c   : > { %386 = vadd.xlane.f32.xlu0 %v368_v6  ;;  %319 = vadd.xlane.f32.xlu2 %v4154_v7  ;;  %v3256_v6 = vor.u32 %v3451_v61, %v3253_v63  ;;  %v3232_v47 = vor.u32 %v3444_v44, %v3229_v46  ;;  %v3439_v51 = vld [vmem:[#allocation5 + $0x44] sm:$0xf]  ;;  %v3204_v52 = vor.u32 %v3441_v50, %v3203_v49  ;;  %v3205_v53 = vld [vmem:[#allocation5 + $0x50] sm:$0xf0]  ;;  %v3211_v54 = vld [vmem:[#allocation5 + $0x48] sm:$0xf] }
  0x4d   : > { %882 = vmatpush.bf16.msra.mxu0 %v3252_v62  ;;  %v3442_v55 = vld [vmem:[#allocation5 + $0x54] sm:$0xf0]  ;;  %v3208_v56 = vor.u32 %v3439_v51, %v3205_v53  ;;  %v3440_v58 = vld [vmem:[#allocation5 + $0x4c] sm:$0xf]  ;;  %v3213_v59 = vld [vmem:[#allocation5 + $0x58] sm:$0xf0] }
  0x4e   : > { %388 = vadd.xlane.f32.xlu1 %v369_v8  ;;  %v3260_v8 = vor.u32 %v3454_v5, %v3259_v2  ;;  %931 = vmatpush.bf16.msra.mxu1 %v3256_v6  ;;  %v3216_v60 = vor.u32 %v3440_v58, %v3213_v59  ;;  %v3187_v62 = vld [vmem:[#allocation5 + $0x20] sm:$0xf]  ;;  %v3437_v63 = vld [vmem:[#allocation5 + $0x2c] sm:$0xf0]  ;;  %v3435_v2 = vld [vmem:[#allocation5 + $0x24] sm:$0xf] }
  0x4f   : > { %v3188_v5 = vor.u32 %v3437_v63, %v3187_v62  ;;  %v3189_v6 = vld [vmem:[#allocation5 + $0x30] sm:$0xf0]  ;;  %v3434_v35 = vld [vmem:[#allocation5 + $0x14] sm:$0xf0]  ;;  %v3181_v39 = vld [vmem:[#allocation5 + $0x18] sm:$0xf0] }
  0x50   : > { %980 = vmatpush.bf16.msra.mxu2 %v3260_v8  ;;  %v3195_v8 = vld [vmem:[#allocation5 + $0x28] sm:$0xf] }
  0x54   : > { %321 = vadd.xlane.f32.xlu0 %v4160_v9  ;;  %392 = vadd.xlane.f32.xlu2 %v371_v10  ;;  %v3452_v10 = vld [vmem:[#allocation5 + $0xac] sm:$0xf] }
  0x56   : > { %390 = vadd.xlane.f32.xlu1 %v370_v11  ;;  %v3261_v11 = vld [vmem:[#allocation5 + $0xb8] sm:$0xf0] }
  0x5c   : > { %323 = vadd.xlane.f32.xlu0 %v4168_v12  ;;  %394 = vadd.xlane.f32.xlu2 %v372_v13  ;;  %v345_v13 = vsub.f32 1.0, %v344_v57  ;;  %v3212_v57 = vor.u32 %v3442_v55, %v3211_v54 }
  0x5e   : > { %325 = vadd.xlane.f32.xlu1 %v4173_v14  ;;  %v346_v34 = vmul.f32 %v4217_v45, %v345_v13 }
  0x60   : > { %v347_v48 = vadd.f32 %v4217_v45, %v346_v34  ;;  %v3179_v34 = vld [vmem:[#allocation5 + $0x8] sm:$0xf] }
  0x61   : > { %v3180_v37 = vor.u32 %v3434_v35, %v3179_v34 }
  0x62   : > { %v4224_v61 = vsel %vm348_vm0, %v4217_v45, %v347_v48 }
  0x64   : > { %396 = vadd.xlane.f32.xlu0 %v373_v15  ;;  %329 = vadd.xlane.f32.xlu2 %v4180_v16  ;;  %v3264_v15 = vor.u32 %v3452_v10, %v3261_v11  ;;  %v3438_v10 = vld [vmem:[#allocation5 + $0x34] sm:$0xf0] }
  0x66   : > { %327 = vadd.xlane.f32.xlu1 %v4183_v17  ;;  %1029 = vmatpush.bf16.msra.mxu3 %v3264_v15  ;;  %v3192_v15 = vor.u32 %v3435_v2, %v3189_v6 }
  0x6c   : > { %398 = vadd.xlane.f32.xlu0 %v374_v18  ;;  %331 = vadd.xlane.f32.xlu2 %v4190_v19  ;;  %v3235_v18 = vld [vmem:[#allocation5 + $0x80] sm:$0xf] }
  0x6e   : > { %400 = vadd.xlane.f32.xlu1 %v375_v20  ;;  %v3449_v20 = vld [vmem:[#allocation5 + $0x8c] sm:$0xf0] }
  0x74   : > { %333 = vadd.xlane.f32.xlu0 %v4196_v21  ;;  %404 = vadd.xlane.f32.xlu2 %v377_v22  ;;  %v3447_v22 = vld [vmem:[#allocation5 + $0x84] sm:$0xf] }
  0x76   : > { %402 = vadd.xlane.f32.xlu1 %v376_v23  ;;  %v3236_v23 = vor.u32 %v3449_v20, %v3235_v18  ;;  %v3196_v18 = vor.u32 %v3438_v10, %v3195_v8  ;;  %v3436_v20 = vld [vmem:[#allocation5 + $0x2c] sm:$0xf] }
  0x78   : > { %883 = vmatpush.bf16.msra.mxu0 %v3236_v23 }
  0x7c   : > { %335 = vadd.xlane.f32.xlu0 %v4204_v24  ;;  %406 = vadd.xlane.f32.xlu2 %v378_v25  ;;  %v3237_v25 = vld [vmem:[#allocation5 + $0x90] sm:$0xf0] }
  0x7d   : > { %884 = vmatpush.bf16.msra.mxu0 %v3220_v38  ;;  %v3432_v38 = vld [vmem:[#allocation5 + $0xc] sm:$0xf] }
  0x7e   : > { %337 = vadd.xlane.f32.xlu1 %v4209_v26  ;;  %v3184_v41 = vor.u32 %v3432_v38, %v3181_v39 }
  0x81   : > { %885 = vmatpush.bf16.msra.mxu0 %v3204_v52 }
  0x84   : > { %408 = vadd.xlane.f32.xlu0 %v379_v27  ;;  %341 = vadd.xlane.f32.xlu2 %v310_v28  ;;  %v3243_v27 = vld [vmem:[#allocation5 + $0x88] sm:$0xf]  ;;  %v3450_v28 = vld [vmem:[#allocation5 + $0x94] sm:$0xf0] }
  0x85   : > { %886 = vmatpush.bf16.msra.mxu0 %v3188_v5 }
  0x86   : > { %339 = vadd.xlane.f32.xlu1 %v309_v29  ;;  %v3240_v29 = vor.u32 %v3447_v22, %v3237_v25  ;;  %v3197_v22 = vld [vmem:[#allocation5 + $0x38] sm:$0xf0] }
  0x87   : > { %v3200_v45 = vor.u32 %v3436_v20, %v3197_v22 }
  0x88   : > { %932 = vmatpush.bf16.msra.mxu1 %v3240_v29  ;;  %v3433_v29 = vld [vmem:[#allocation5 + $0xc] sm:$0xf0] }
  0x8c   : > { %410 = vadd.xlane.f32.xlu0 %v380_v30  ;;  %v3244_v30 = vor.u32 %v3450_v28, %v3243_v27  ;;  %933 = vmatpush.bf16.msra.mxu1 %v3224_v42  ;;  %v3171_v28 = vld [vmem:[#allocation5] sm:$0xf] }
  0x8e   : > { %412 = vadd.xlane.f32.xlu1 %v381_v31  ;;  %v3448_v31 = vld [vmem:[#allocation5 + $0x8c] sm:$0xf]  ;;  %981 = vmatpush.bf16.msra.mxu2 %v3244_v30  ;;  %v3431_v30 = vld [vmem:[#allocation5 + $0x4] sm:$0xf] }
  0x8f   : > { %v3248_v33 = vor.u32 %v3448_v31, %v3245_v32  ;;  %v3172_v32 = vor.u32 %v3433_v29, %v3171_v28 }
  0x90   : > { %934 = vmatpush.bf16.msra.mxu1 %v3208_v56 }
  0x91   : > { %1030 = vmatpush.bf16.msra.mxu3 %v3248_v33  ;;  %v3173_v33 = vld [vmem:[#allocation5 + $0x10] sm:$0xf0]  ;;  %887 = vmatpush.bf16.msra.mxu0 %v3172_v32 }
  0x92   : > { %982 = vmatpush.bf16.msra.mxu2 %v3228_v43  ;;  %v3176_v36 = vor.u32 %v3431_v30, %v3173_v33 }
  0x94   : > { %935 = vmatpush.bf16.msra.mxu1 %v3192_v15 }
  0x95   : > { %1031 = vmatpush.bf16.msra.mxu3 %v3232_v47 }
  0x96   : > { %983 = vmatpush.bf16.msra.mxu2 %v3212_v57 }
  0x98   : > { %936 = vmatpush.bf16.msra.mxu1 %v3176_v36 }
  0x99   : > { %1032 = vmatpush.bf16.msra.mxu3 %v3216_v60 }
  0x9a   : > { %984 = vmatpush.bf16.msra.mxu2 %v3196_v18 }
  0x9d   : > { %1033 = vmatpush.bf16.msra.mxu3 %v3200_v45 }
  0x9e   : > { %985 = vmatpush.bf16.msra.mxu2 %v3180_v37 }
  0xa1   : > { %1034 = vmatpush.bf16.msra.mxu3 %v3184_v41 }
  0xaf   : > { %v312_v11 = vpop.xlane.xlu0 %311  ;;  %v316_v13 = vpop.xlane.xlu2 %315 }
  0xb0   : > { %v4227_v23 = vmul.f32 %v4224_v61, %v312_v11  ;;  %v4236_v48 = vmul.f32 %v4224_v61, %v316_v13 }
  0xb1   : > { %v383_v25 = vpop.xlane.xlu1 %382 }
  0xb2   : > { %v446_v27 = vmul.f32 %v4227_v23, %v4227_v23  ;;  %v414_v31 = vmul.f32 %v383_v25, %v4224_v61  ;;  %v448_v53 = vmul.f32 %v4236_v48, %v4236_v48 }
  0xb4   : > { %v462_v40 = vsub.f32 %v414_v31, %v446_v27 }
  0xb6   : > { %v478_v42 = vadd.f32 1e-05, %v462_v40 }
  0xb7   : > { %v314_v43 = vpop.xlane.xlu0 %313  ;;  %v318_v44 = vpop.xlane.xlu2 %317 }
  0xb8   : > { %v4233_v46 = vmul.f32 %v4224_v61, %v314_v43  ;;  %3585 = vrsqrt.f32 %v478_v42  ;;  %v4242_v51 = vmul.f32 %v4224_v61, %v318_v44  ;;  %vm500_vm3 = vweird.f32 %v478_v42 }
  0xb9   : > { %v385_v47 = vpop.xlane.xlu1 %384 }
  0xba   : > { %v447_v49 = vmul.f32 %v4233_v46, %v4233_v46  ;;  %v415_v50 = vmul.f32 %v385_v47, %v4224_v61  ;;  %v449_v60 = vmul.f32 %v4242_v51, %v4242_v51 }
  0xbc   : > { %v463_v52 = vsub.f32 %v415_v50, %v447_v49  ;;  %v430_v50 = vsub.f32 %v4132_v0, %v4227_v23 }
  0xbe   : > { %v4246_v54 = vpop.eup %3585  ;;  %v479_v55 = vadd.f32 1e-05, %v463_v52 }
  0xbf   : > { %v387_v56 = vpop.xlane.xlu0 %386  ;;  %v320_v57 = vpop.xlane.xlu2 %319  ;;  %v495_v58 = vmul.f32 %v4246_v54, %v478_v42  ;;  %vm501_vm1 = vweird.f32 %v4246_v54  ;;  %v431_v42 = vsub.f32 %v4142_v3, %v4233_v46 }
  0xc0   : > { %v416_v59 = vmul.f32 %v387_v56, %v4224_v61  ;;  %3587 = vrsqrt.f32 %v479_v55  ;;  %v4257_v8 = vmul.f32 %v4224_v61, %v320_v57  ;;  %vm502_vm4 = vmor %vm500_vm3, %vm501_vm1  ;;  %vm510_vm5 = vweird.f32 %v479_v55 }
  0xc1   : > { %v389_v62 = vpop.xlane.xlu1 %388  ;;  %v496_v63 = vmul.f32 %v4246_v54, %v495_v58 }
  0xc2   : > { %v464_v2 = vsub.f32 %v416_v59, %v448_v53  ;;  %v417_v5 = vmul.f32 %v389_v62, %v4224_v61  ;;  %v450_v45 = vmul.f32 %v4257_v8, %v4257_v8 }
  0xc3   : > { %v497_v11 = vmul.f32 0.5, %v496_v63 }
  0xc4   : > { %v4254_v6 = vadd.f32 1e-05, %v464_v2  ;;  %v465_v10 = vsub.f32 %v417_v5, %v449_v60 }
  0xc5   : > { %v498_v29 = vsub.f32 1.5, %v497_v11 }
  0xc6   : > { %3589 = vrsqrt.f32 %v4254_v6  ;;  %v3588_v13 = vpop.eup %3587  ;;  %v4260_v15 = vadd.f32 1e-05, %v465_v10  ;;  %vm520_vm11 = vweird.f32 %v4254_v6 }
  0xc7   : > { %v322_v18 = vpop.xlane.xlu0 %321  ;;  %v393_v20 = vpop.xlane.xlu2 %392  ;;  %v505_v22 = vmul.f32 %v3588_v13, %v479_v55  ;;  %v499_v37 = vmul.f32 %v4246_v54, %v498_v29  ;;  %vm511_vm2 = vweird.f32 %v3588_v13 }
  0xc8   : > { %v4265_v25 = vmul.f32 %v4224_v61, %v322_v18  ;;  %3591 = vrsqrt.f32 %v4260_v15  ;;  %v419_v27 = vmul.f32 %v393_v20, %v4224_v61  ;;  %vm512_vm6 = vmor %vm510_vm5, %vm511_vm2  ;;  %vm530_vm7 = vweird.f32 %v4260_v15 }
  0xc9   : > { %v391_v28 = vpop.xlane.xlu1 %390  ;;  %v506_v30 = vmul.f32 %v3588_v13, %v505_v22  ;;  %v503_v57 = vsel %vm502_vm4, %v4246_v54, %v499_v37  ;;  %v433_v37 = vsub.f32 %v4145_v4, %v4242_v51 }
  0xca   : > { %v451_v31 = vmul.f32 %v4265_v25, %v4265_v25  ;;  %v418_v32 = vmul.f32 %v391_v28, %v4224_v61  ;;  %v654_v59 = vmul.f32 %v503_v57, %v430_v50 }
  0xcb   : > { %v507_v34 = vmul.f32 0.5, %v506_v30 }
  0xcc   : > { %v4272_v33 = vpop.eup %3589  ;;  %v467_v35 = vsub.f32 %v419_v27, %v451_v31  ;;  %v466_v36 = vsub.f32 %v418_v32, %v450_v45 }
  0xcd   : > { %v508_v38 = vsub.f32 1.5, %v507_v34  ;;  %v515_v39 = vmul.f32 %v4272_v33, %v4254_v6  ;;  %vm521_vm9 = vweird.f32 %v4272_v33 }
  0xce   : > { %v4278_v40 = vadd.f32 1e-05, %v467_v35  ;;  %v4280_v41 = vpop.eup %3591  ;;  %v4282_v43 = vadd.f32 1e-05, %v466_v36  ;;  %vm522_vm12 = vmor %vm520_vm11, %vm521_vm9 }
  0xcf   : > { %v324_v44 = vpop.xlane.xlu0 %323  ;;  %v509_v47 = vmul.f32 %v3588_v13, %v508_v38  ;;  %v525_v49 = vmul.f32 %v4280_v41, %v4260_v15  ;;  %v516_v53 = vmul.f32 %v4272_v33, %v515_v39  ;;  %v395_v63 = vpop.xlane.xlu2 %394  ;;  %vm531_vm8 = vweird.f32 %v4280_v41 }
  0xd0   : > { %3593 = vrsqrt.f32 %v4278_v40  ;;  %v4299_v55 = vmul.f32 %v4224_v61, %v324_v44  ;;  %vm532_vm10 = vmor %vm530_vm7, %vm531_vm8  ;;  %v432_v44 = vsub.f32 %v4135_v1, %v4236_v48  ;;  %vm550_vm13 = vweird.f32 %v4278_v40 }
  0xd1   : > { %v326_v52 = vpop.xlane.xlu1 %325  ;;  %v526_v56 = vmul.f32 %v4280_v41, %v525_v49  ;;  %3595 = vrsqrt.f32 %v4282_v43  ;;  %v513_v0 = vsel %vm512_vm6, %v3588_v13, %v509_v47  ;;  %v517_v62 = vmul.f32 0.5, %v516_v53 }
  0xd2   : > { %v4296_v58 = vmul.f32 %v4224_v61, %v326_v52  ;;  %v655_v60 = vmul.f32 %v513_v0, %v431_v42  ;;  %v452_v11 = vmul.f32 %v4299_v55, %v4299_v55  ;;  %v420_v13 = vmul.f32 %v395_v63, %v4224_v61 }
  0xd3   : > { %v527_v23 = vmul.f32 0.5, %v526_v56  ;;  %v518_v20 = vsub.f32 1.5, %v517_v62  ;;  %vm540_vm15 = vweird.f32 %v4282_v43 }
  0xd4   : > { %v453_v54 = vmul.f32 %v4296_v58, %v4296_v58  ;;  %v670_v2 = vpack.c.bf16 %v655_v60, %v654_v59  ;;  %v468_v30 = vsub.f32 %v420_v13, %v452_v11 }
  0xd5   : > { %v528_v46 = vsub.f32 1.5, %v527_v23  ;;  %v519_v31 = vmul.f32 %v4272_v33, %v518_v20  ;;  %v434_v20 = vsub.f32 %v4154_v7, %v4257_v8 }
  0xd6   : > { %v4303_v3 = vpop.eup %3593  ;;  %888 = vmatmul.bf16.vlgmr.msra.gmra.mxu0 %v670_v2  ;;  %937 = vmatmul.bf16.vlgmr.msra.gmra.mxu1 %v670_v2  ;;  %v4328_v38 = vadd.f32 1e-05, %v468_v30 }
  0xd7   : > { %v397_v5 = vpop.xlane.xlu0 %396  ;;  %v4305_v10 = vpop.eup %3595  ;;  %986 = vmatmul.bf16.vlgmr.msra.gmra.mxu2 %v670_v2  ;;  %1035 = vmatmul.bf16.vlgmr.msra.gmra.mxu3 %v670_v2  ;;  %v529_v27 = vmul.f32 %v4280_v41, %v528_v46  ;;  %v545_v28 = vmul.f32 %v4303_v3, %v4278_v40  ;;  %v523_v39 = vsel %vm522_vm12, %v4272_v33, %v519_v31  ;;  %vm551_vm14 = vweird.f32 %v4303_v3 }
  0xd8   : > { %v421_v18 = vmul.f32 %v397_v5, %v4224_v61  ;;  %v535_v29 = vmul.f32 %v4305_v10, %v4282_v43  ;;  %v330_v15 = vpop.xlane.xlu2 %329  ;;  %v656_v51 = vmul.f32 %v523_v39, %v432_v44  ;;  %vm541_vm0 = vweird.f32 %v4305_v10  ;;  %vm4359_vm1 = vmor %vm550_vm13, %vm551_vm14 }
  0xd9   : > { %v328_v22 = vpop.xlane.xlu1 %327  ;;  %v546_v34 = vmul.f32 %v4303_v3, %v545_v28  ;;  %v533_v36 = vsel %vm532_vm10, %v4280_v41, %v529_v27  ;;  %v4335_v6 = vmul.f32 %v4224_v61, %v330_v15  ;;  %vm542_vm2 = vmor %vm540_vm15, %vm541_vm0  ;;  %vm560_vm5 = vweird.f32 %v4328_v38 }
  0xda   : > { %v469_v45 = vsub.f32 %v421_v18, %v453_v54  ;;  %v536_v35 = vmul.f32 %v4305_v10, %v535_v29  ;;  %v657_v47 = vmul.f32 %v533_v36, %v433_v37  ;;  %v4339_v4 = vmul.f32 %v4224_v61, %v328_v22 }
  0xdb   : > { %v547_v49 = vmul.f32 0.5, %v546_v34  ;;  %v455_v33 = vmul.f32 %v4335_v6, %v4335_v6  ;;  %v435_v22 = vsub.f32 %v4160_v9, %v4265_v25 }
  0xdc   : > { %v4320_v32 = vadd.f32 1e-05, %v469_v45  ;;  %v537_v50 = vmul.f32 0.5, %v536_v35  ;;  %v671_v48 = vpack.c.bf16 %v657_v47, %v656_v51  ;;  %v454_v42 = vmul.f32 %v4339_v4, %v4339_v4 }
  0xdd   : > { %v548_v53 = vsub.f32 1.5, %v547_v49  ;;  %v3486_v49 = vld [vmem:[#allocation8 + $0xb8] sm:$0xff] }
  0xde   : > { %3597 = vrsqrt.f32 %v4320_v32  ;;  %v538_v56 = vsub.f32 1.5, %v537_v50  ;;  %vm570_vm3 = vweird.f32 %v4320_v32  ;;  %v3470_v50 = vld [vmem:[#allocation8 + $0x38] sm:$0xff]  ;;  %2906 = vmatpush.bf16.msrb.mxu2 %v3486_v49 }
  0xdf   : > { %3599 = vrsqrt.f32 %v4328_v38  ;;  %v399_v52 = vpop.xlane.xlu0 %398  ;;  %v549_v62 = vmul.f32 %v4303_v3, %v548_v53  ;;  %2808 = vmatpush.bf16.msrb.mxu0 %v3470_v50  ;;  %v439_v50 = vsub.f32 %v4180_v16, %v4335_v6 }
  0xe0   : > { %v422_v0 = vmul.f32 %v399_v52, %v4224_v61  ;;  %v332_v23 = vpop.xlane.xlu2 %331  ;;  %v539_v63 = vmul.f32 %v4305_v10, %v538_v56 }
  0xe1   : > { %v401_v41 = vpop.xlane.xlu1 %400  ;;  %v553_v18 = vsel %vm4359_vm1, %v4303_v3, %v549_v62 }
  0xe2   : > { %v423_v1 = vmul.f32 %v401_v41, %v4224_v61  ;;  %v470_v2 = vsub.f32 %v422_v0, %v454_v42  ;;  %v543_v13 = vsel %vm542_vm2, %v4305_v10, %v539_v63  ;;  %v4384_v10 = vmul.f32 %v4224_v61, %v332_v23  ;;  %v3494_v41 = vld [vmem:[#allocation8 + $0xf8] sm:$0xff] }
  0xe3   : > { %v658_v3 = vmul.f32 %v543_v13, %v434_v20  ;;  %v659_v30 = vmul.f32 %v553_v18, %v435_v22  ;;  %2955 = vmatpush.bf16.msrb.mxu3 %v3494_v41  ;;  %v437_v63 = vsub.f32 %v4173_v14, %v4296_v58 }
  0xe4   : > { %v4344_v57 = vpop.eup %3597  ;;  %v471_v60 = vsub.f32 %v423_v1, %v455_v33  ;;  %v4376_v45 = vadd.f32 1e-05, %v470_v2  ;;  %v456_v15 = vmul.f32 %v4384_v10, %v4384_v10  ;;  %v3478_v33 = vld [vmem:[#allocation8 + $0x78] sm:$0xff] }
  0xe5   : > { %v4351_v59 = vpop.eup %3599  ;;  %v565_v54 = vmul.f32 %v4344_v57, %v4320_v32  ;;  %v672_v35 = vpack.c.bf16 %v659_v30, %v658_v3  ;;  %vm571_vm4 = vweird.f32 %v4344_v57  ;;  %2857 = vmatpush.bf16.msrb.mxu1 %v3478_v33 }
  0xe6   : > { %893 = vmatmul.bf16.gmra.mxu0 %v671_v48  ;;  %942 = vmatmul.bf16.gmra.mxu1 %v671_v48  ;;  %v555_v5 = vmul.f32 %v4351_v59, %v4328_v38  ;;  %v4365_v43 = vadd.f32 1e-05, %v471_v60  ;;  %vm561_vm6 = vweird.f32 %v4351_v59  ;;  %vm4408_vm7 = vmor %vm570_vm3, %vm571_vm4  ;;  %vm580_vm11 = vweird.f32 %v4376_v45 }
  0xe7   : > { %991 = vmatmul.bf16.gmra.mxu2 %v671_v48  ;;  %1040 = vmatmul.bf16.gmra.mxu3 %v671_v48  ;;  %v334_v46 = vpop.xlane.xlu0 %333  ;;  %v566_v11 = vmul.f32 %v4344_v57, %v565_v54  ;;  %vm4417_vm8 = vmor %vm560_vm5, %vm561_vm6 }
  0xe8   : > { %v556_v27 = vmul.f32 %v4351_v59, %v555_v5  ;;  %v4380_v28 = vmul.f32 %v4224_v61, %v334_v46  ;;  %3601 = vrsqrt.f32 %v4365_v43  ;;  %v405_v29 = vpop.xlane.xlu2 %404  ;;  %v436_v5 = vsub.f32 %v4168_v12, %v4299_v55 }
  0xe9   : > { %v567_v31 = vmul.f32 0.5, %v566_v11  ;;  %v403_v7 = vpop.xlane.xlu1 %402  ;;  %3603 = vrsqrt.f32 %v4376_v45  ;;  %v425_v25 = vmul.f32 %v405_v29, %v4224_v61  ;;  %vm590_vm9 = vweird.f32 %v4365_v43 }
  0xea   : > { %v557_v9 = vmul.f32 0.5, %v556_v27  ;;  %v457_v8 = vmul.f32 %v4380_v28, %v4380_v28  ;;  %v424_v34 = vmul.f32 %v403_v7, %v4224_v61 }
  0xeb   : > { %v568_v36 = vsub.f32 1.5, %v567_v31 }
  0xec   : > { %v558_v39 = vsub.f32 1.5, %v557_v9  ;;  %v473_v44 = vsub.f32 %v425_v25, %v457_v8  ;;  %v472_v52 = vsub.f32 %v424_v34, %v456_v15  ;;  %v3485_v9 = vld [vmem:[#allocation8 + $0xb0] sm:$0xff] }
  0xed   : > { %v569_v1 = vmul.f32 %v4344_v57, %v568_v36  ;;  %v3469_v8 = vld [vmem:[#allocation8 + $0x30] sm:$0xff]  ;;  %2907 = vmatpush.bf16.msrb.mxu2 %v3485_v9 }
  0xee   : > { %v4393_v37 = vpop.eup %3601  ;;  %v559_v38 = vmul.f32 %v4351_v59, %v558_v39  ;;  %v4415_v42 = vadd.f32 1e-05, %v473_v44  ;;  %v4421_v23 = vadd.f32 1e-05, %v472_v52  ;;  %v3493_v25 = vld [vmem:[#allocation8 + $0xf0] sm:$0xff]  ;;  %2809 = vmatpush.bf16.msrb.mxu0 %v3469_v8 }
  0xef   : > { %v336_v47 = vpop.xlane.xlu0 %335  ;;  %v4397_v51 = vpop.eup %3603  ;;  %v585_v48 = vmul.f32 %v4393_v37, %v4365_v43  ;;  %v573_v62 = vsel %vm4408_vm7, %v4344_v57, %v569_v1  ;;  %vm591_vm10 = vweird.f32 %v4393_v37  ;;  %v3477_v34 = vld [vmem:[#allocation8 + $0x70] sm:$0xff]  ;;  %2956 = vmatpush.bf16.msrb.mxu3 %v3493_v25 }
  0xf0   : > { %v575_v56 = vmul.f32 %v4397_v51, %v4376_v45  ;;  %3605 = vrsqrt.f32 %v4415_v42  ;;  %v4432_v40 = vmul.f32 %v4224_v61, %v336_v47  ;;  %v563_v2 = vsel %vm4417_vm8, %v4351_v59, %v559_v38  ;;  %v407_v14 = vpop.xlane.xlu2 %406  ;;  %vm4466_vm13 = vmor %vm590_vm9, %vm591_vm10  ;;  %2858 = vmatpush.bf16.msrb.mxu1 %v3477_v34 }
  0xf1   : > { %v586_v32 = vmul.f32 %v4393_v37, %v585_v48  ;;  %v338_v60 = vpop.xlane.xlu1 %337  ;;  %3607 = vrsqrt.f32 %v4421_v23  ;;  %v661_v58 = vmul.f32 %v573_v62, %v437_v63  ;;  %v660_v13 = vmul.f32 %v563_v2, %v436_v5 }
  0xf2   : > { %v576_v54 = vmul.f32 %v4397_v51, %v575_v56  ;;  %v4441_v57 = vmul.f32 %v4224_v61, %v338_v60  ;;  %v458_v20 = vmul.f32 %v4432_v40, %v4432_v40  ;;  %v426_v22 = vmul.f32 %v407_v14, %v4224_v61 }
  0xf3   : > { %v587_v46 = vmul.f32 0.5, %v586_v32  ;;  %v673_v55 = vpack.c.bf16 %v661_v58, %v660_v13  ;;  %vm581_vm12 = vweird.f32 %v4397_v51  ;;  %v438_v45 = vsub.f32 %v4183_v17, %v4339_v4 }
  0xf4   : > { %v577_v18 = vmul.f32 0.5, %v576_v54  ;;  %v459_v59 = vmul.f32 %v4441_v57, %v4441_v57  ;;  %v474_v31 = vsub.f32 %v426_v22, %v458_v20  ;;  %vm4477_vm14 = vmor %vm580_vm11, %vm581_vm12  ;;  %vm610_vm15 = vweird.f32 %v4415_v42  ;;  %v3476_v20 = vld [vmem:[#allocation8 + $0x68] sm:$0xff] }
  0xf5   : > { %v588_v29 = vsub.f32 1.5, %v587_v46  ;;  %vm600_vm1 = vweird.f32 %v4421_v23  ;;  %v3468_v46 = vld [vmem:[#allocation8 + $0x28] sm:$0xff]  ;;  %2859 = vmatpush.bf16.msrb.mxu1 %v3476_v20 }
  0xf6   : > { %898 = vmatmul.bf16.gmra.mxu0 %v672_v35  ;;  %947 = vmatmul.bf16.gmra.mxu1 %v672_v35  ;;  %v4449_v27 = vpop.eup %3605  ;;  %v578_v30 = vsub.f32 1.5, %v577_v18  ;;  %v4471_v49 = vadd.f32 1e-05, %v474_v31 }
  0xf7   : > { %996 = vmatmul.bf16.gmra.mxu2 %v672_v35  ;;  %1045 = vmatmul.bf16.gmra.mxu3 %v672_v35  ;;  %v409_v11 = vpop.xlane.xlu0 %408  ;;  %v4451_v3 = vpop.eup %3607  ;;  %v589_v35 = vmul.f32 %v4393_v37, %v588_v29  ;;  %v605_v36 = vmul.f32 %v4449_v27, %v4415_v42  ;;  %vm611_vm0 = vweird.f32 %v4449_v27  ;;  %v440_v42 = vsub.f32 %v4190_v19, %v4384_v10 }
  0xf8   : > { %v427_v12 = vmul.f32 %v409_v11, %v4224_v61  ;;  %v595_v39 = vmul.f32 %v4451_v3, %v4421_v23  ;;  %v579_v47 = vmul.f32 %v4397_v51, %v578_v30  ;;  %v342_v1 = vpop.xlane.xlu2 %341  ;;  %3609 = vrsqrt.f32 %v4471_v49  ;;  %v3492_v11 = vld [vmem:[#allocation8 + $0xe8] sm:$0xff]  ;;  %vm4522_vm3 = vmor %vm610_vm15, %vm611_vm0  ;;  %2810 = vmatpush.bf16.msrb.mxu0 %v3468_v46 }
  0xf9   : > { %v340_v7 = vpop.xlane.xlu1 %339  ;;  %v606_v52 = vmul.f32 %v4449_v27, %v605_v36  ;;  %v593_v48 = vsel %vm4466_vm13, %v4393_v37, %v589_v35  ;;  %v4499_v53 = vmul.f32 %v4224_v61, %v342_v1  ;;  %vm601_vm2 = vweird.f32 %v4451_v3  ;;  %2957 = vmatpush.bf16.msrb.mxu3 %v3492_v11 }
  0xfa   : > { %v475_v15 = vsub.f32 %v427_v12, %v459_v59  ;;  %v596_v33 = vmul.f32 %v4451_v3, %v595_v39  ;;  %v4490_v16 = vmul.f32 %v4224_v61, %v340_v7  ;;  %v583_v6 = vsel %vm4477_vm14, %v4397_v51, %v579_v47  ;;  %vm602_vm4 = vmor %vm600_vm1, %vm601_vm2  ;;  %v3491_v39 = vld [vmem:[#allocation8 + $0xe0] sm:$0xff] }
  0xfb   : > { %v663_v56 = vmul.f32 %v593_v48, %v439_v50  ;;  %v607_v37 = vmul.f32 0.5, %v606_v52  ;;  %v662_v60 = vmul.f32 %v583_v6, %v438_v45  ;;  %v461_v51 = vmul.f32 %v4499_v53, %v4499_v53  ;;  %v3475_v47 = vld [vmem:[#allocation8 + $0x60] sm:$0xff] }
  0xfc   : > { %v4481_v43 = vadd.f32 1e-05, %v475_v15  ;;  %v597_v0 = vmul.f32 0.5, %v596_v33  ;;  %v460_v62 = vmul.f32 %v4490_v16, %v4490_v16  ;;  %v441_v30 = vsub.f32 %v4196_v21, %v4380_v28  ;;  %2860 = vmatpush.bf16.msrb.mxu1 %v3475_v47 }
  0xfd   : > { %v674_v4 = vpack.c.bf16 %v663_v56, %v662_v60  ;;  %v608_v2 = vsub.f32 1.5, %v607_v37  ;;  %vm620_vm5 = vweird.f32 %v4471_v49  ;;  %2958 = vmatpush.bf16.msrb.mxu3 %v3491_v39  ;;  %v442_v52 = vsub.f32 %v4204_v24, %v4432_v40  ;;  %v3745_v40 = vld [vmem:[%s4117_s8 + $0x70] sm:$0xff] }
  0xfe   : > { %3611 = vrsqrt.f32 %v4481_v43  ;;  %v4507_v54 = vpop.eup %3609  ;;  %v598_v5 = vsub.f32 1.5, %v597_v0  ;;  %vm630_vm7 = vweird.f32 %v4481_v43  ;;  %v443_v33 = vsub.f32 %v4209_v26, %v4441_v57 }
  0xff   : > { %v411_v38 = vpop.xlane.xlu0 %410  ;;  %v615_v13 = vmul.f32 %v4507_v54, %v4471_v49  ;;  %v609_v22 = vmul.f32 %v4449_v27, %v608_v2  ;;  %vm621_vm6 = vweird.f32 %v4507_v54  ;;  %v444_v57 = vsub.f32 %v3745_v40, %v4490_v16 }
 0x100   : > { %v428_v63 = vmul.f32 %v411_v38, %v4224_v61  ;;  %v599_v12 = vmul.f32 %v4451_v3, %v598_v5  ;;  %vm622_vm9 = vmor %vm620_vm5, %vm621_vm6  ;;  %v710_v5 = vld [vmem:[#allocation7] sm:$0xf] }
 0x101   : > { %v413_v32 = vpop.xlane.xlu1 %412  ;;  %v616_v31 = vmul.f32 %v4507_v54, %v615_v13  ;;  %v613_v23 = vsel %vm4522_vm3, %v4449_v27, %v609_v22  ;;  %v3483_v27 = vld [vmem:[#allocation8 + $0xa0] sm:$0xff]  ;;  %v4572_v13 = vperm.slane %v710_v5, 2 }
 0x102   : > { %v429_v17 = vmul.f32 %v413_v32, %v4224_v61  ;;  %v476_v58 = vsub.f32 %v428_v63, %v460_v62  ;;  %v3484_v61 = vld [vmem:[#allocation8 + $0xa8] sm:$0xff]  ;;  %v603_v8 = vsel %vm602_vm4, %v4451_v3, %v599_v12  ;;  %v665_v19 = vmul.f32 %v613_v23, %v441_v30  ;;  %v3467_v3 = vld [vmem:[#allocation8 + $0x20] sm:$0xff]  ;;  %v3746_v62 = vld [vmem:[%s4117_s8 + $0x78] sm:$0xff] }
 0x103   : > { %2908 = vmatpush.bf16.msrb.mxu2 %v3484_v61  ;;  %v617_v25 = vmul.f32 0.5, %v616_v31  ;;  %v664_v15 = vmul.f32 %v603_v8, %v440_v42  ;;  %2811 = vmatpush.bf16.msrb.mxu0 %v3467_v3  ;;  %v445_v63 = vsub.f32 %v3746_v62, %v4499_v53 }
 0x104   : > { %v4509_v14 = vpop.eup %3611  ;;  %v477_v18 = vsub.f32 %v429_v17, %v461_v51  ;;  %v4533_v29 = vadd.f32 1e-05, %v476_v58  ;;  %v4568_v58 = vperm.slane %v710_v5, 1 }
 0x105   : > { %v618_v34 = vsub.f32 1.5, %v617_v25  ;;  %v675_v21 = vpack.c.bf16 %v665_v19, %v664_v15  ;;  %vm631_vm8 = vweird.f32 %v4509_v14  ;;  %v3482_v15 = vld [vmem:[#allocation8 + $0x98] sm:$0xff] }
 0x106   : > { %903 = vmatmul.bf16.gmra.mxu0 %v673_v55  ;;  %952 = vmatmul.bf16.gmra.mxu1 %v673_v55  ;;  %v493_v7 = vadd.f32 1e-05, %v477_v18  ;;  %3613 = vrsqrt.f32 %v4533_v29  ;;  %vm632_vm10 = vmor %vm630_vm7, %vm631_vm8  ;;  %vm640_vm11 = vweird.f32 %v4533_v29  ;;  %v4574_v18 = vperm.slane %v710_v5, 3  ;;  %v3466_v19 = vld [vmem:[#allocation8 + $0x18] sm:$0xff] }
 0x107   : > { %1001 = vmatmul.bf16.gmra.mxu2 %v673_v55  ;;  %1050 = vmatmul.bf16.gmra.mxu3 %v673_v55  ;;  %v625_v55 = vmul.f32 %v4509_v14, %v4481_v43  ;;  %v619_v44 = vmul.f32 %v4507_v54, %v618_v34 }
 0x108   : > { %3615 = vrsqrt.f32 %v493_v7  ;;  %2909 = vmatpush.bf16.msrb.mxu2 %v3483_v27  ;;  %vm650_vm13 = vweird.f32 %v493_v7  ;;  %2812 = vmatpush.bf16.msrb.mxu0 %v3466_v19 }
 0x109   : > { %v626_v9 = vmul.f32 %v4509_v14, %v625_v55  ;;  %v623_v6 = vsel %vm622_vm9, %v4507_v54, %v619_v44 }
 0x10a   : > { %v666_v38 = vmul.f32 %v623_v6, %v442_v52 }
 0x10b   : > { %v627_v10 = vmul.f32 0.5, %v626_v9 }
 0x10c   : > { %v3614_v28 = vpop.eup %3613  ;;  %2910 = vmatpush.bf16.msrb.mxu2 %v3482_v15 }
 0x10d   : > { %v628_v35 = vsub.f32 1.5, %v627_v10  ;;  %v635_v49 = vmul.f32 %v3614_v28, %v4533_v29  ;;  %vm641_vm12 = vweird.f32 %v3614_v28  ;;  %v3490_v10 = vld [vmem:[#allocation8 + $0xd8] sm:$0xff] }
 0x10e   : > { %v3616_v36 = vpop.eup %3615  ;;  %vm642_vm15 = vmor %vm640_vm11, %vm641_vm12  ;;  %2959 = vmatpush.bf16.msrb.mxu3 %v3490_v10 }
 0x10f   : > { %v629_v50 = vmul.f32 %v4509_v14, %v628_v35  ;;  %v645_v41 = vmul.f32 %v3616_v36, %v493_v7  ;;  %v636_v1 = vmul.f32 %v3614_v28, %v635_v49  ;;  %vm651_vm14 = vweird.f32 %v3616_v36  ;;  %v3474_v35 = vld [vmem:[#allocation8 + $0x58] sm:$0xff] }
 0x110   : > { %vm652_vm0 = vmor %vm650_vm13, %vm651_vm14  ;;  %2861 = vmatpush.bf16.msrb.mxu1 %v3474_v35 }
 0x111   : > { %v646_v48 = vmul.f32 %v3616_v36, %v645_v41  ;;  %v633_v45 = vsel %vm632_vm10, %v4509_v14, %v629_v50  ;;  %v637_v37 = vmul.f32 0.5, %v636_v1  ;;  %v4566_v14 = vperm.slane %v710_v5, 0 }
 0x112   : > { %v667_v56 = vmul.f32 %v633_v45, %v443_v33 }
 0x113   : > { %v647_v0 = vmul.f32 0.5, %v646_v48  ;;  %v638_v32 = vsub.f32 1.5, %v637_v37 }
 0x114   : > { %v676_v43 = vpack.c.bf16 %v667_v56, %v666_v38 }
 0x115   : > { %v648_v60 = vsub.f32 1.5, %v647_v0  ;;  %v639_v24 = vmul.f32 %v3614_v28, %v638_v32 }
 0x116   : > { %908 = vmatmul.bf16.gmra.mxu0 %v674_v4  ;;  %957 = vmatmul.bf16.gmra.mxu1 %v674_v4 }
 0x117   : > { %1006 = vmatmul.bf16.gmra.mxu2 %v674_v4  ;;  %1055 = vmatmul.bf16.gmra.mxu3 %v674_v4  ;;  %v649_v26 = vmul.f32 %v3616_v36, %v648_v60  ;;  %v643_v51 = vsel %vm642_vm15, %v3614_v28, %v639_v24 }
 0x118   : > { %v668_v4 = vmul.f32 %v643_v51, %v444_v57 }
 0x119   : > { %v653_v17 = vsel %vm652_vm0, %v3616_v36, %v649_v26 }
 0x11a   : > { %v669_v54 = vmul.f32 %v653_v17, %v445_v63 }
 0x11c   : > { %v677_v2 = vpack.c.bf16 %v669_v54, %v668_v4 }
 0x126   : > { %913 = vmatmul.bf16.gmra.mxu0 %v675_v21  ;;  %962 = vmatmul.bf16.gmra.mxu1 %v675_v21 }
 0x127   : > { %1011 = vmatmul.bf16.gmra.mxu2 %v675_v21  ;;  %1060 = vmatmul.bf16.gmra.mxu3 %v675_v21 }
 0x136   : > { %918 = vmatmul.bf16.gmra.mxu0 %v676_v43  ;;  %967 = vmatmul.bf16.gmra.mxu1 %v676_v43 }
 0x137   : > { %1016 = vmatmul.bf16.gmra.mxu2 %v676_v43  ;;  %1065 = vmatmul.bf16.gmra.mxu3 %v676_v43 }
 0x146   : > { %923 = vmatmul.bf16.gmra.mxu0 %v677_v2  ;;  %972 = vmatmul.bf16.gmra.mxu1 %v677_v2 }
 0x147   : > { %1021 = vmatmul.bf16.gmra.mxu2 %v677_v2  ;;  %1070 = vmatmul.bf16.gmra.mxu3 %v677_v2 }
 0x153   : > { %v889_v61 = vpop.f32.mrf.mxu0  ;;  %v938_v46 = vpop.f32.mrf.mxu1 }
 0x154   : > { %v890_v16 = vadd.f32 %v889_v61, %v4566_v14  ;;  %v939_v53 = vadd.f32 %v938_v46, %v4568_v58 }
 0x156   : > { %v1076_v11 = vpack.c.bf16 %v939_v53, %v890_v16 }
 0x158   : > { %v4576_v20 = vunpack.c.l.bf16 %v1076_v11  ;;  %v4578_v22 = vunpack.c.h.bf16 %v1076_v11 }
 0x15a   : > { %v1172_v59 = vmul.f32 %v4576_v20, %v4576_v20  ;;  %v1173_v12 = vmul.f32 %v4578_v22, %v4578_v22  ;;  %v987_v55 = vpop.f32.mrf.mxu2  ;;  %v1036_v29 = vpop.f32.mrf.mxu3 }
 0x15b   : > { %v988_v42 = vadd.f32 %v987_v55, %v4572_v13  ;;  %v1037_v30 = vadd.f32 %v1036_v29, %v4574_v18  ;;  %v891_v31 = vpop.f32.mrf.mxu0  ;;  %v940_v7 = vpop.f32.mrf.mxu1 }
 0x15c   : > { %v1236_v9 = vpack.c.bf16 %v1173_v12, %v1172_v59  ;;  %v892_v8 = vadd.f32 %v891_v31, %v4566_v14  ;;  %v941_v23 = vadd.f32 %v940_v7, %v4568_v58 }
 0x15d   : > { %v1077_v25 = vpack.c.bf16 %v1037_v30, %v988_v42 }
 0x15e   : > { %v1268_v34 = vunpack.c.l.bf16 %v1236_v9  ;;  %v1269_v21 = vunpack.c.h.bf16 %v1236_v9  ;;  %v1078_v28 = vpack.c.bf16 %v941_v23, %v892_v8 }
 0x15f   : > { %v4588_v36 = vunpack.c.l.bf16 %v1077_v25  ;;  %v4590_v27 = vunpack.c.h.bf16 %v1077_v25 }
 0x160   : > { %v1332_v3 = vmul.f32 %v1268_v34, %v4576_v20  ;;  %v1333_v39 = vmul.f32 %v1269_v21, %v4578_v22  ;;  %v4594_v44 = vunpack.c.l.bf16 %v1078_v28  ;;  %v4596_v47 = vunpack.c.h.bf16 %v1078_v28 }
 0x161   : > { %v1174_v50 = vmul.f32 %v4588_v36, %v4588_v36  ;;  %v1175_v49 = vmul.f32 %v4590_v27, %v4590_v27 }
 0x162   : > { %v1396_v41 = vpack.c.bf16 %v1333_v39, %v1332_v3  ;;  %v1176_v52 = vmul.f32 %v4594_v44, %v4594_v44  ;;  %v1177_v33 = vmul.f32 %v4596_v47, %v4596_v47  ;;  %v989_v1 = vpop.f32.mrf.mxu2  ;;  %v1038_v48 = vpop.f32.mrf.mxu3 }
 0x163   : > { %v1237_v6 = vpack.c.bf16 %v1175_v49, %v1174_v50  ;;  %v990_v45 = vadd.f32 %v989_v1, %v4572_v13  ;;  %v1039_v38 = vadd.f32 %v1038_v48, %v4574_v18  ;;  %v894_v56 = vpop.f32.mrf.mxu0  ;;  %v943_v37 = vpop.f32.mrf.mxu1 }
 0x164   : > { %v1428_v0 = vunpack.c.l.bf16 %v1396_v41  ;;  %v1429_v43 = vunpack.c.h.bf16 %v1396_v41  ;;  %v1238_v32 = vpack.c.bf16 %v1177_v33, %v1176_v52  ;;  %v895_v60 = vadd.f32 %v894_v56, %v4566_v14 }
 0x165   : > { %v1270_v24 = vunpack.c.l.bf16 %v1237_v6  ;;  %v1271_v26 = vunpack.c.h.bf16 %v1237_v6  ;;  %v1079_v40 = vpack.c.bf16 %v1039_v38, %v990_v45  ;;  %v944_v57 = vadd.f32 %v943_v37, %v4568_v58 }
 0x166   : > { %v1492_v62 = vmul.f32 0.044677734, %v1428_v0  ;;  %v1493_v63 = vmul.f32 0.044677734, %v1429_v43  ;;  %v1272_v51 = vunpack.c.l.bf16 %v1238_v32  ;;  %v1273_v17 = vunpack.c.h.bf16 %v1238_v32 }
 0x167   : > { %v1334_v4 = vmul.f32 %v1270_v24, %v4588_v36  ;;  %v1335_v54 = vmul.f32 %v1271_v26, %v4590_v27  ;;  %v4612_v2 = vunpack.c.l.bf16 %v1079_v40  ;;  %v4614_v5 = vunpack.c.h.bf16 %v1079_v40 }
 0x168   : > { %v1556_v61 = vpack.c.bf16 %v1493_v63, %v1492_v62  ;;  %v1336_v46 = vmul.f32 %v1272_v51, %v4594_v44  ;;  %v1337_v16 = vmul.f32 %v1273_v17, %v4596_v47  ;;  %v1080_v53 = vpack.c.bf16 %v944_v57, %v895_v60 }
 0x169   : > { %v1397_v11 = vpack.c.bf16 %v1335_v54, %v1334_v4  ;;  %v1178_v59 = vmul.f32 %v4612_v2, %v4612_v2  ;;  %v1179_v12 = vmul.f32 %v4614_v5, %v4614_v5 }
 0x16a   : > { %v1588_v55 = vunpack.c.l.bf16 %v1556_v61  ;;  %v1589_v29 = vunpack.c.h.bf16 %v1556_v61  ;;  %v1398_v42 = vpack.c.bf16 %v1337_v16, %v1336_v46  ;;  %v4622_v30 = vunpack.c.l.bf16 %v1080_v53  ;;  %v992_v60 = vpop.f32.mrf.mxu2  ;;  %v1041_v62 = vpop.f32.mrf.mxu3 }
 0x16b   : > { %v1430_v31 = vunpack.c.l.bf16 %v1397_v11  ;;  %v1431_v7 = vunpack.c.h.bf16 %v1397_v11  ;;  %v1239_v9 = vpack.c.bf16 %v1179_v12, %v1178_v59  ;;  %v4624_v8 = vunpack.c.h.bf16 %v1080_v53  ;;  %v896_v54 = vpop.f32.mrf.mxu0 }
 0x16c   : > { %v1652_v23 = vadd.f32 %v1588_v55, %v4576_v20  ;;  %v1653_v25 = vadd.f32 %v1589_v29, %v4578_v22  ;;  %v1432_v15 = vunpack.c.l.bf16 %v1398_v42  ;;  %v1433_v19 = vunpack.c.h.bf16 %v1398_v42 }
 0x16d   : > { %v1494_v10 = vmul.f32 0.044677734, %v1430_v31  ;;  %v1495_v34 = vmul.f32 0.044677734, %v1431_v7  ;;  %v1274_v21 = vunpack.c.l.bf16 %v1239_v9  ;;  %v1275_v28 = vunpack.c.h.bf16 %v1239_v9  ;;  %v945_v7 = vpop.f32.mrf.mxu1 }
 0x16e   : > { %v1716_v35 = vpack.c.bf16 %v1653_v25, %v1652_v23  ;;  %v1496_v3 = vmul.f32 0.044677734, %v1432_v15  ;;  %v1497_v39 = vmul.f32 0.044677734, %v1433_v19  ;;  %v1180_v50 = vmul.f32 %v4622_v30, %v4622_v30  ;;  %v3465_v19 = vld [vmem:[#allocation8 + $0x10] sm:$0xff] }
 0x16f   : > { %v1557_v49 = vpack.c.bf16 %v1495_v34, %v1494_v10  ;;  %v1338_v41 = vmul.f32 %v1274_v21, %v4612_v2  ;;  %v1339_v52 = vmul.f32 %v1275_v28, %v4614_v5  ;;  %v1181_v33 = vmul.f32 %v4624_v8, %v4624_v8  ;;  %v3473_v10 = vld [vmem:[#allocation8 + $0x50] sm:$0xff]  ;;  %2813 = vmatpush.bf16.msrb.mxu0 %v3465_v19 }
 0x170   : > { %v1748_v1 = vunpack.c.l.bf16 %v1716_v35  ;;  %v1749_v48 = vunpack.c.h.bf16 %v1716_v35  ;;  %v1558_v6 = vpack.c.bf16 %v1497_v39, %v1496_v3  ;;  %v993_v12 = vadd.f32 %v992_v60, %v4572_v13  ;;  %2862 = vmatpush.bf16.msrb.mxu1 %v3473_v10 }
 0x171   : > { %v1590_v45 = vunpack.c.l.bf16 %v1557_v49  ;;  %v1591_v38 = vunpack.c.h.bf16 %v1557_v49  ;;  %v1399_v56 = vpack.c.bf16 %v1339_v52, %v1338_v41  ;;  %v1240_v37 = vpack.c.bf16 %v1181_v33, %v1180_v50 }
 0x172   : > { %v1812_v0 = vmul.f32 0.796875, %v1748_v1  ;;  %v1592_v43 = vunpack.c.l.bf16 %v1558_v6  ;;  %v1593_v32 = vunpack.c.h.bf16 %v1558_v6  ;;  %v1813_v63 = vmul.f32 0.796875, %v1749_v48 }
 0x173   : > { %v1654_v24 = vadd.f32 %v1590_v45, %v4588_v36  ;;  %v1655_v26 = vadd.f32 %v1591_v38, %v4590_v27  ;;  %v1434_v40 = vunpack.c.l.bf16 %v1399_v56  ;;  %v1435_v57 = vunpack.c.h.bf16 %v1399_v56  ;;  %v3481_v38 = vld [vmem:[#allocation8 + $0x90] sm:$0xff] }
 0x174   : > { %v1656_v51 = vadd.f32 %v1592_v43, %v4594_v44  ;;  %v1657_v17 = vadd.f32 %v1593_v32, %v4596_v47  ;;  %v1276_v4 = vunpack.c.l.bf16 %v1240_v37  ;;  %v1277_v53 = vunpack.c.h.bf16 %v1240_v37  ;;  %v3489_v56 = vld [vmem:[#allocation8 + $0xd0] sm:$0xff]  ;;  %v994_v37 = vpop.f32.mrf.mxu2  ;;  %2911 = vmatpush.bf16.msrb.mxu2 %v3481_v38 }
 0x175   : > { %v1717_v61 = vpack.c.bf16 %v1655_v26, %v1654_v24  ;;  %v1498_v46 = vmul.f32 0.044677734, %v1434_v40  ;;  %v1499_v16 = vmul.f32 0.044677734, %v1435_v57  ;;  %v4641_v9 = vpack.c.bf16 %v1813_v63, %v1812_v0  ;;  %v1043_v24 = vpop.f32.mrf.mxu3  ;;  %2960 = vmatpush.bf16.msrb.mxu3 %v3489_v56 }
 0x176   : > { %v1718_v11 = vpack.c.bf16 %v1657_v17, %v1656_v51  ;;  %v1340_v59 = vmul.f32 %v1276_v4, %v4622_v30  ;;  %v1341_v31 = vmul.f32 %v1277_v53, %v4624_v8  ;;  %v1042_v15 = vadd.f32 %v1041_v62, %v4574_v18  ;;  %v899_v62 = vpop.f32.mrf.mxu0 }
 0x177   : > { %v1750_v55 = vunpack.c.l.bf16 %v1717_v61  ;;  %v1751_v29 = vunpack.c.h.bf16 %v1717_v61  ;;  %v1559_v42 = vpack.c.bf16 %v1499_v16, %v1498_v46  ;;  %v897_v50 = vadd.f32 %v896_v54, %v4566_v14 }
 0x178   : > { %v1752_v23 = vunpack.c.l.bf16 %v1718_v11  ;;  %v1753_v25 = vunpack.c.h.bf16 %v1718_v11  ;;  %v1400_v3 = vpack.c.bf16 %v1341_v31, %v1340_v59  ;;  %v1081_v39 = vpack.c.bf16 %v1042_v15, %v993_v12 }
 0x179   : > { %v1814_v34 = vmul.f32 0.796875, %v1750_v55  ;;  %v1815_v21 = vmul.f32 0.796875, %v1751_v29  ;;  %v1594_v28 = vunpack.c.l.bf16 %v1559_v42  ;;  %v1595_v35 = vunpack.c.h.bf16 %v1559_v42  ;;  %v948_v55 = vpop.f32.mrf.mxu1 }
 0x17a   : > { %v946_v52 = vadd.f32 %v945_v7, %v4568_v58  ;;  %v4649_v33 = vmul.f32 0.5, %v4576_v20  ;;  %v1436_v48 = vunpack.c.l.bf16 %v1400_v3  ;;  %v1437_v6 = vunpack.c.h.bf16 %v1400_v3 }
 0x17b   : > { %v1658_v49 = vadd.f32 %v1594_v28, %v4612_v2  ;;  %v1659_v41 = vadd.f32 %v1595_v35, %v4614_v5  ;;  %v4652_v45 = vunpack.c.l.bf16 %v1081_v39  ;;  %v4654_v0 = vpack.c.bf16 %v1815_v21, %v1814_v34 }
 0x17c   : > { %v1816_v43 = vmul.f32 0.796875, %v1752_v23  ;;  %v1817_v32 = vmul.f32 0.796875, %v1753_v25  ;;  %v4656_v60 = vunpack.c.h.bf16 %v1081_v39  ;;  %v1500_v26 = vmul.f32 0.044677734, %v1436_v48 }
 0x17d   : > { %v1501_v40 = vmul.f32 0.044677734, %v1437_v6  ;;  %v1182_v20 = vmul.f32 %v4652_v45, %v4652_v45  ;;  %v1082_v57 = vpack.c.bf16 %v946_v52, %v897_v50  ;;  %v1719_v51 = vpack.c.bf16 %v1659_v41, %v1658_v49 }
 0x17e   : > { %v1183_v17 = vmul.f32 %v4656_v60, %v4656_v60  ;;  %v995_v4 = vadd.f32 %v994_v37, %v4572_v13  ;;  %v1044_v16 = vadd.f32 %v1043_v24, %v4574_v18  ;;  %v4670_v11 = vpack.c.bf16 %v1817_v32, %v1816_v43  ;;  %v997_v43 = vpop.f32.mrf.mxu2 }
 0x17f   : > { %v1560_v54 = vpack.c.bf16 %v1501_v40, %v1500_v26  ;;  %v4664_v61 = vunpack.c.l.bf16 %v1082_v57  ;;  %v4666_v46 = vunpack.c.h.bf16 %v1082_v57  ;;  %v900_v12 = vadd.f32 %v899_v62, %v4566_v14  ;;  %v3472_v57 = vld [vmem:[#allocation8 + $0x48] sm:$0xff] }
 0x180   : > { %v1241_v59 = vpack.c.bf16 %v1183_v17, %v1182_v20  ;;  %v1754_v23 = vunpack.c.l.bf16 %v1719_v51  ;;  %v1083_v19 = vpack.c.bf16 %v1044_v16, %v995_v4  ;;  %v949_v28 = vadd.f32 %v948_v55, %v4568_v58  ;;  %v3464_v20 = vld [vmem:[#allocation8 + $0x8] sm:$0xff]  ;;  %2863 = vmatpush.bf16.msrb.mxu1 %v3472_v57 }
 0x181   : > { %v1596_v29 = vunpack.c.l.bf16 %v1560_v54  ;;  %v1597_v42 = vunpack.c.h.bf16 %v1560_v54  ;;  %v1184_v31 = vmul.f32 %v4664_v61, %v4664_v61  ;;  %v1185_v7 = vmul.f32 %v4666_v46, %v4666_v46  ;;  %2814 = vmatpush.bf16.msrb.mxu0 %v3464_v20 }
 0x182   : > { %v1278_v25 = vunpack.c.l.bf16 %v1241_v59  ;;  %v1279_v15 = vunpack.c.h.bf16 %v1241_v59  ;;  %v4682_v39 = vunpack.c.l.bf16 %v1083_v19  ;;  %v4684_v50 = vunpack.c.h.bf16 %v1083_v19 }
 0x183   : > { %v1660_v10 = vadd.f32 %v1596_v29, %v4622_v30  ;;  %v1661_v34 = vadd.f32 %v1597_v42, %v4624_v8  ;;  %v1242_v21 = vpack.c.bf16 %v1185_v7, %v1184_v31  ;;  %v1755_v49 = vunpack.c.h.bf16 %v1719_v51  ;;  %v1046_v7 = vpop.f32.mrf.mxu3 }
 0x184   : > { %v1342_v35 = vmul.f32 %v1278_v25, %v4652_v45  ;;  %v1343_v3 = vmul.f32 %v1279_v15, %v4656_v60  ;;  %5658 = vst [vmem:[#allocation15_spill] sm:$0xff] %v4684_v50  ;;  %v1084_v48 = vpack.c.bf16 %v949_v28, %v900_v12  ;;  %v1186_v56 = vmul.f32 %v4682_v39, %v4682_v39 }
 0x185   : > { %v1280_v41 = vunpack.c.l.bf16 %v1242_v21  ;;  %v1281_v52 = vunpack.c.h.bf16 %v1242_v21  ;;  %v1187_v37 = vmul.f32 %v4684_v50, %v4684_v50  ;;  %v4691_v32 = vmul.f32 0.796875, %v1754_v23  ;;  %v901_v23 = vpop.f32.mrf.mxu0 }
 0x186   : > { %v1401_v38 = vpack.c.bf16 %v1343_v3, %v1342_v35  ;;  %v4693_v24 = vpack.c.bf16 %v1661_v34, %v1660_v10  ;;  %v4697_v4 = vunpack.c.l.bf16 %v1084_v48  ;;  %v4699_v54 = vmul.f32 0.796875, %v1755_v49  ;;  %v950_v3 = vpop.f32.mrf.mxu1 }
 0x187   : > { %v1344_v26 = vmul.f32 %v1280_v41, %v4664_v61  ;;  %v1345_v40 = vmul.f32 %v1281_v52, %v4666_v46  ;;  %v1243_v17 = vpack.c.bf16 %v1187_v37, %v1186_v56  ;;  %v4701_v59 = vunpack.c.h.bf16 %v1084_v48  ;;  %v3488_v56 = vld [vmem:[#allocation8 + $0xc8] sm:$0xff] }
 0x188   : > { %v1438_v62 = vunpack.c.l.bf16 %v1401_v38  ;;  %v1439_v51 = vunpack.c.h.bf16 %v1401_v38  ;;  %5659 = vst [vmem:[#allocation16_spill] sm:$0xff] %v4697_v4  ;;  %v998_v12 = vadd.f32 %v997_v43, %v4572_v13  ;;  %v1756_v25 = vunpack.c.l.bf16 %v4693_v24  ;;  %v3480_v38 = vld [vmem:[#allocation8 + $0x88] sm:$0xff]  ;;  %2961 = vmatpush.bf16.msrb.mxu3 %v3488_v56 }
 0x189   : > { %v1402_v16 = vpack.c.bf16 %v1345_v40, %v1344_v26  ;;  %5660 = vst [vmem:[#allocation17_spill] sm:$0xff] %v4701_v59  ;;  %v1282_v42 = vunpack.c.l.bf16 %v1243_v17  ;;  %v1283_v31 = vunpack.c.h.bf16 %v1243_v17  ;;  %v1188_v10 = vmul.f32 %v4697_v4, %v4697_v4  ;;  %2912 = vmatpush.bf16.msrb.mxu2 %v3480_v38 }
 0x18a   : > { %v1502_v55 = vmul.f32 0.044677734, %v1438_v62  ;;  %v1503_v29 = vmul.f32 0.044677734, %v1439_v51  ;;  %v1189_v35 = vmul.f32 %v4701_v59, %v4701_v59  ;;  %v1047_v52 = vadd.f32 %v1046_v7, %v4574_v18 }
 0x18b   : > { %v1440_v15 = vunpack.c.l.bf16 %v1402_v16  ;;  %v1441_v19 = vunpack.c.h.bf16 %v1402_v16  ;;  %v1346_v21 = vmul.f32 %v1282_v42, %v4682_v39  ;;  %v1347_v28 = vmul.f32 %v1283_v31, %v4684_v50 }
 0x18c   : > { %v1561_v34 = vpack.c.bf16 %v1503_v29, %v1502_v55  ;;  %v902_v48 = vadd.f32 %v901_v23, %v4566_v14  ;;  %v1244_v40 = vpack.c.bf16 %v1189_v35, %v1188_v10  ;;  %v1757_v20 = vunpack.c.h.bf16 %v4693_v24 }
 0x18d   : > { %v1504_v49 = vmul.f32 0.044677734, %v1440_v15  ;;  %v1505_v41 = vmul.f32 0.044677734, %v1441_v19  ;;  %v1403_v26 = vpack.c.bf16 %v1347_v28, %v1346_v21  ;;  %v1085_v62 = vpack.c.bf16 %v1047_v52, %v998_v12 }
 0x18e   : > { %v1598_v37 = vunpack.c.l.bf16 %v1561_v34  ;;  %v1599_v43 = vunpack.c.h.bf16 %v1561_v34  ;;  %v951_v51 = vadd.f32 %v950_v3, %v4568_v58  ;;  %v1284_v7 = vunpack.c.l.bf16 %v1244_v40 }
 0x18f   : > { %v1562_v57 = vpack.c.bf16 %v1505_v41, %v1504_v49  ;;  %v1442_v55 = vunpack.c.l.bf16 %v1403_v26  ;;  %v1443_v29 = vunpack.c.h.bf16 %v1403_v26  ;;  %v1285_v23 = vunpack.c.h.bf16 %v1244_v40 }
 0x190   : > { %v1662_v17 = vadd.f32 %v1598_v37, %v4652_v45  ;;  %v1663_v16 = vadd.f32 %v1599_v43, %v4656_v60  ;;  %v4717_v24 = vunpack.c.l.bf16 %v1085_v62  ;;  %v1348_v21 = vmul.f32 %v1284_v7, %v4697_v4 }
 0x191   : > { %v1600_v42 = vunpack.c.l.bf16 %v1562_v57  ;;  %v1601_v31 = vunpack.c.h.bf16 %v1562_v57  ;;  %v1506_v19 = vmul.f32 0.044677734, %v1442_v55  ;;  %v1507_v10 = vmul.f32 0.044677734, %v1443_v29 }
 0x192   : > { %v1721_v15 = vpack.c.bf16 %v1663_v16, %v1662_v17  ;;  %5661 = vst [vmem:[#allocation18_spill] sm:$0xff] %v4717_v24  ;;  %v1349_v28 = vmul.f32 %v1285_v23, %v4701_v59  ;;  %v4723_v41 = vunpack.c.h.bf16 %v1085_v62  ;;  %v1820_v52 = vmul.f32 0.796875, %v1756_v25  ;;  %v3471_v62 = vld [vmem:[#allocation8 + $0x40] sm:$0xff]  ;;  %v999_v23 = vpop.f32.mrf.mxu2 }
 0x193   : > { %v1664_v12 = vadd.f32 %v1600_v42, %v4664_v61  ;;  %v1665_v34 = vadd.f32 %v1601_v31, %v4666_v46  ;;  %v1563_v49 = vpack.c.bf16 %v1507_v10, %v1506_v19  ;;  %v1821_v38 = vmul.f32 0.796875, %v1757_v20  ;;  %v3463_v42 = vld [vmem:[#allocation8] sm:$0xff]  ;;  %2864 = vmatpush.bf16.msrb.mxu1 %v3471_v62 }
 0x194   : > { %v1758_v35 = vunpack.c.l.bf16 %v1721_v15  ;;  %v1759_v3 = vunpack.c.h.bf16 %v1721_v15  ;;  %5662 = vst [vmem:[#allocation19_spill] sm:$0xff] %v4723_v41  ;;  %v1404_v37 = vpack.c.bf16 %v1349_v28, %v1348_v21  ;;  %v1190_v40 = vmul.f32 %v4717_v24, %v4717_v24  ;;  %v1048_v15 = vpop.f32.mrf.mxu3  ;;  %2815 = vmatpush.bf16.msrb.mxu0 %v3463_v42  ;;  %v3487_v42 = vld [vmem:[#allocation8 + $0xc0] sm:$0xff] }
 0x195   : > { %v1722_v56 = vpack.c.bf16 %v1665_v34, %v1664_v12  ;;  %v1602_v43 = vunpack.c.l.bf16 %v1563_v49  ;;  %v1603_v26 = vunpack.c.h.bf16 %v1563_v49  ;;  %v1086_v57 = vpack.c.bf16 %v951_v51, %v902_v48  ;;  %2962 = vmatpush.bf16.msrb.mxu3 %v3487_v42 }
 0x196   : > { %v4729_v17 = vpack.c.bf16 %v4699_v54, %v4691_v32  ;;  %v1822_v16 = vmul.f32 0.796875, %v1758_v35  ;;  %v1444_v55 = vunpack.c.l.bf16 %v1404_v37  ;;  %v1445_v29 = vunpack.c.h.bf16 %v1404_v37 }
 0x197   : > { %v1823_v31 = vmul.f32 0.796875, %v1759_v3  ;;  %v1666_v25 = vadd.f32 %v1602_v43, %v4682_v39  ;;  %v1667_v20 = vadd.f32 %v1603_v26, %v4684_v50  ;;  %v1191_v7 = vmul.f32 %v4723_v41, %v4723_v41 }
 0x198   : > { %v4735_v48 = vpack.c.bf16 %v1821_v38, %v1820_v52  ;;  %v1760_v51 = vunpack.c.l.bf16 %v1722_v56  ;;  %v1508_v32 = vmul.f32 0.044677734, %v1444_v55  ;;  %v1509_v54 = vmul.f32 0.044677734, %v1445_v29  ;;  %v953_v55 = vpop.f32.mrf.mxu1  ;;  %v3479_v29 = vld [vmem:[#allocation8 + $0x80] sm:$0xff] }
 0x199   : > { %v1761_v19 = vunpack.c.h.bf16 %v1722_v56  ;;  %v1245_v10 = vpack.c.bf16 %v1191_v7, %v1190_v40  ;;  %v4737_v12 = vunpack.c.l.bf16 %v1086_v57  ;;  %v4739_v34 = vunpack.c.h.bf16 %v1086_v57  ;;  %v904_v57 = vpop.f32.mrf.mxu0  ;;  %2913 = vmatpush.bf16.msrb.mxu2 %v3479_v29 }
 0x19a   : > { %v1564_v21 = vpack.c.bf16 %v1509_v54, %v1508_v32  ;;  %v1000_v28 = vadd.f32 %v999_v23, %v4572_v13  ;;  %v1049_v35 = vadd.f32 %v1048_v15, %v4574_v18  ;;  %v4744_v3 = vmul.f32 0.5, %v4578_v22 }
 0x19b   : > { %5663 = vst [vmem:[#allocation20_spill] sm:$0xff] %v4737_v12  ;;  %v4746_v49 = vpack.c.bf16 %v1823_v31, %v1822_v16  ;;  %v4748_v52 = vpack.c.bf16 %v1667_v20, %v1666_v25  ;;  %v1286_v38 = vunpack.c.l.bf16 %v1245_v10  ;;  %v1287_v37 = vunpack.c.h.bf16 %v1245_v10 }
 0x19c   : > { %5664 = vst [vmem:[#allocation21_spill] sm:$0xff] %v4739_v34  ;;  %v1604_v56 = vunpack.c.l.bf16 %v1564_v21  ;;  %v1605_v43 = vunpack.c.h.bf16 %v1564_v21  ;;  %v1192_v26 = vmul.f32 %v4737_v12, %v4737_v12  ;;  %v1193_v40 = vmul.f32 %v4739_v34, %v4739_v34 }
 0x19d   : > { %5665 = vst [vmem:[#allocation22_spill] sm:$0xff] %v4746_v49  ;;  %v1824_v22 = vmul.f32 0.796875, %v1760_v51  ;;  %v1825_v62 = vmul.f32 0.796875, %v1761_v19  ;;  %v1350_v16 = vmul.f32 %v1286_v38, %v4717_v24  ;;  %v1351_v31 = vmul.f32 %v1287_v37, %v4723_v41 }
 0x19e   : > { %v1668_v25 = vadd.f32 %v1604_v56, %v4697_v4  ;;  %v1669_v20 = vadd.f32 %v1605_v43, %v4701_v59  ;;  %v1246_v7 = vpack.c.bf16 %v1193_v40, %v1192_v26  ;;  %v1087_v23 = vpack.c.bf16 %v1049_v35, %v1000_v28 }
 0x19f   : > { %v1762_v15 = vunpack.c.l.bf16 %v4748_v52  ;;  %v1405_v32 = vpack.c.bf16 %v1351_v31, %v1350_v16  ;;  %v905_v54 = vadd.f32 %v904_v57, %v4566_v14  ;;  %v954_v10 = vadd.f32 %v953_v55, %v4568_v58  ;;  %v1002_v16 = vpop.f32.mrf.mxu2 }
 0x1a0   : > { %v1724_v51 = vpack.c.bf16 %v1669_v20, %v1668_v25  ;;  %v1288_v19 = vunpack.c.l.bf16 %v1246_v7  ;;  %v1289_v21 = vunpack.c.h.bf16 %v1246_v7  ;;  %v4761_v38 = vunpack.c.l.bf16 %v1087_v23 }
 0x1a1   : > { %v1446_v37 = vunpack.c.l.bf16 %v1405_v32  ;;  %v1447_v56 = vunpack.c.h.bf16 %v1405_v32  ;;  %v4763_v6 = vunpack.c.h.bf16 %v1087_v23  ;;  %v1088_v43 = vpack.c.bf16 %v954_v10, %v905_v54  ;;  %v1051_v32 = vpop.f32.mrf.mxu3 }
 0x1a2   : > { %5666 = vst [vmem:[#allocation23_spill] sm:$0xff] %v4761_v38  ;;  %v4765_v28 = vpack.c.bf16 %v1825_v62, %v1824_v22  ;;  %v1763_v35 = vunpack.c.h.bf16 %v4748_v52  ;;  %v1352_v26 = vmul.f32 %v1288_v19, %v4737_v12  ;;  %v1353_v40 = vmul.f32 %v1289_v21, %v4739_v34 }
 0x1a3   : > { %5667 = vst [vmem:[#allocation24_spill] sm:$0xff] %v4763_v6  ;;  %v1510_v57 = vmul.f32 0.044677734, %v1446_v37  ;;  %v1511_v55 = vmul.f32 0.044677734, %v1447_v56  ;;  %v1194_v29 = vmul.f32 %v4761_v38, %v4761_v38  ;;  %v1195_v42 = vmul.f32 %v4763_v6, %v4763_v6 }
 0x1a4   : > { %v1826_v31 = vmul.f32 0.796875, %v1762_v15  ;;  %v1764_v25 = vunpack.c.l.bf16 %v1724_v51  ;;  %v1406_v20 = vpack.c.bf16 %v1353_v40, %v1352_v26  ;;  %v4774_v22 = vunpack.c.l.bf16 %v1088_v43 }
 0x1a5   : > { %v1765_v62 = vunpack.c.h.bf16 %v1724_v51  ;;  %v1565_v52 = vpack.c.bf16 %v1511_v55, %v1510_v57  ;;  %v1247_v7 = vpack.c.bf16 %v1195_v42, %v1194_v29  ;;  %v4776_v23 = vunpack.c.h.bf16 %v1088_v43 }
 0x1a6   : > { %5668 = vst [vmem:[#allocation25_spill] sm:$0xff] %v4774_v22  ;;  %v1448_v54 = vunpack.c.l.bf16 %v1406_v20  ;;  %v1449_v10 = vunpack.c.h.bf16 %v1406_v20  ;;  %v1196_v19 = vmul.f32 %v4774_v22, %v4774_v22  ;;  %v1003_v21 = vadd.f32 %v1002_v16, %v4572_v13 }
 0x1a7   : > { %5669 = vst [vmem:[#allocation26_spill] sm:$0xff] %v4776_v23  ;;  %v1606_v37 = vunpack.c.l.bf16 %v1565_v52  ;;  %v1607_v56 = vunpack.c.h.bf16 %v1565_v52  ;;  %v1290_v15 = vunpack.c.l.bf16 %v1247_v7  ;;  %v1291_v53 = vunpack.c.h.bf16 %v1247_v7  ;;  %v906_v7 = vpop.f32.mrf.mxu0 }
 0x1a8   : > { %v1512_v26 = vmul.f32 0.044677734, %v1448_v54  ;;  %v1513_v40 = vmul.f32 0.044677734, %v1449_v10  ;;  %v1197_v51 = vmul.f32 %v4776_v23, %v4776_v23  ;;  %v1052_v43 = vadd.f32 %v1051_v32, %v4574_v18  ;;  %v955_v54 = vpop.f32.mrf.mxu1 }
 0x1a9   : > { %v1670_v57 = vadd.f32 %v1606_v37, %v4717_v24  ;;  %v1671_v55 = vadd.f32 %v1607_v56, %v4723_v41  ;;  %v1354_v29 = vmul.f32 %v1290_v15, %v4761_v38  ;;  %v1355_v42 = vmul.f32 %v1291_v53, %v4763_v6 }
 0x1aa   : > { %v1827_v16 = vmul.f32 0.796875, %v1763_v35  ;;  %v1828_v20 = vmul.f32 0.796875, %v1764_v25  ;;  %v1566_v52 = vpack.c.bf16 %v1513_v40, %v1512_v26  ;;  %v1248_v63 = vpack.c.bf16 %v1197_v51, %v1196_v19  ;;  %v1004_v26 = vpop.f32.mrf.mxu2 }
 0x1ab   : > { %v1829_v10 = vmul.f32 0.796875, %v1765_v62  ;;  %v1725_v1 = vpack.c.bf16 %v1671_v55, %v1670_v57  ;;  %v1407_v59 = vpack.c.bf16 %v1355_v42, %v1354_v29  ;;  %v1089_v4 = vpack.c.bf16 %v1052_v43, %v1003_v21  ;;  %v1053_v43 = vpop.f32.mrf.mxu3 }
 0x1ac   : > { %v1608_v49 = vunpack.c.l.bf16 %v1566_v52  ;;  %v1609_v32 = vunpack.c.h.bf16 %v1566_v52  ;;  %v1292_v50 = vunpack.c.l.bf16 %v1248_v63  ;;  %v1293_v37 = vunpack.c.h.bf16 %v1248_v63 }
 0x1ad   : > { %v1450_v24 = vunpack.c.l.bf16 %v1407_v59  ;;  %v1451_v56 = vunpack.c.h.bf16 %v1407_v59  ;;  %v907_v15 = vadd.f32 %v906_v7, %v4566_v14  ;;  %v956_v53 = vadd.f32 %v955_v54, %v4568_v58 }
 0x1ae   : > { %v1672_v35 = vadd.f32 %v1608_v49, %v4737_v12  ;;  %v1673_v25 = vadd.f32 %v1609_v32, %v4739_v34  ;;  %v1356_v19 = vmul.f32 %v1292_v50, %v4774_v22  ;;  %v1357_v62 = vmul.f32 %v1293_v37, %v4776_v23 }
 0x1af   : > { %v4794_v21 = vpack.c.bf16 %v1827_v16, %v1826_v31  ;;  %v1766_v40 = vunpack.c.l.bf16 %v1725_v1  ;;  %v1514_v51 = vmul.f32 0.044677734, %v1450_v24  ;;  %v1515_v63 = vmul.f32 0.044677734, %v1451_v56 }
 0x1b0   : > { %v1726_v59 = vpack.c.bf16 %v1673_v25, %v1672_v35  ;;  %v1408_v57 = vpack.c.bf16 %v1357_v62, %v1356_v19  ;;  %v4796_v55 = vunpack.c.l.bf16 %v1089_v4  ;;  %v4798_v29 = vunpack.c.h.bf16 %v1089_v4 }
 0x1b1   : > { %v4800_v49 = vpack.c.bf16 %v1829_v10, %v1828_v20  ;;  %v1567_v42 = vpack.c.bf16 %v1515_v63, %v1514_v51  ;;  %v1090_v52 = vpack.c.bf16 %v956_v53, %v907_v15  ;;  %v1005_v50 = vadd.f32 %v1004_v26, %v4572_v13 }
 0x1b2   : > { %5670 = vst [vmem:[#allocation27_spill] sm:$0xff] %v4796_v55  ;;  %v1767_v7 = vunpack.c.h.bf16 %v1725_v1  ;;  %v1452_v54 = vunpack.c.l.bf16 %v1408_v57  ;;  %v1453_v31 = vunpack.c.h.bf16 %v1408_v57  ;;  %v1054_v16 = vadd.f32 %v1053_v43, %v4574_v18 }
 0x1b3   : > { %5671 = vst [vmem:[#allocation28_spill] sm:$0xff] %v4798_v29  ;;  %v1610_v24 = vunpack.c.l.bf16 %v1567_v42  ;;  %v1611_v32 = vunpack.c.h.bf16 %v1567_v42  ;;  %v1198_v37 = vmul.f32 %v4796_v55, %v4796_v55  ;;  %v1199_v4 = vmul.f32 %v4798_v29, %v4798_v29 }
 0x1b4   : > { %5672 = vst [vmem:[#allocation29_spill] sm:$0xff] %v4800_v49  ;;  %v1830_v56 = vmul.f32 0.796875, %v1766_v40  ;;  %v1768_v20 = vunpack.c.l.bf16 %v1726_v59  ;;  %v1516_v10 = vmul.f32 0.044677734, %v1452_v54  ;;  %v1517_v35 = vmul.f32 0.044677734, %v1453_v31 }
 0x1b5   : > { %v1674_v15 = vadd.f32 %v1610_v24, %v4761_v38  ;;  %v1675_v1 = vadd.f32 %v1611_v32, %v4763_v6  ;;  %v1249_v53 = vpack.c.bf16 %v1199_v4, %v1198_v37  ;;  %v4810_v25 = vunpack.c.l.bf16 %v1090_v52 }
 0x1b6   : > { %v1769_v19 = vunpack.c.h.bf16 %v1726_v59  ;;  %v1568_v62 = vpack.c.bf16 %v1517_v35, %v1516_v10  ;;  %v4812_v26 = vunpack.c.h.bf16 %v1090_v52  ;;  %v1091_v51 = vpack.c.bf16 %v1054_v16, %v1005_v50  ;;  %v909_v35 = vpop.f32.mrf.mxu0 }
 0x1b7   : > { %v1727_v63 = vpack.c.bf16 %v1675_v1, %v1674_v15  ;;  %v1294_v43 = vunpack.c.l.bf16 %v1249_v53  ;;  %v1295_v57 = vunpack.c.h.bf16 %v1249_v53  ;;  %v1200_v40 = vmul.f32 %v4810_v25, %v4810_v25 }
 0x1b8   : > { %v1612_v42 = vunpack.c.l.bf16 %v1568_v62  ;;  %v1613_v54 = vunpack.c.h.bf16 %v1568_v62  ;;  %v1201_v31 = vmul.f32 %v4812_v26, %v4812_v26  ;;  %v4818_v24 = vunpack.c.l.bf16 %v1091_v51 }
 0x1b9   : > { %v1831_v32 = vmul.f32 0.796875, %v1767_v7  ;;  %v1832_v37 = vmul.f32 0.796875, %v1768_v20  ;;  %v1358_v59 = vmul.f32 %v1294_v43, %v4796_v55  ;;  %v1359_v52 = vmul.f32 %v1295_v57, %v4798_v29  ;;  %v958_v57 = vpop.f32.mrf.mxu1 }
 0x1ba   : > { %5673 = vst [vmem:[#allocation30_spill] sm:$0xff] %v4818_v24  ;;  %v1676_v50 = vadd.f32 %v1612_v42, %v4774_v22  ;;  %v1677_v16 = vadd.f32 %v1613_v54, %v4776_v23  ;;  %v1250_v4 = vpack.c.bf16 %v1201_v31, %v1200_v40  ;;  %v4824_v10 = vunpack.c.h.bf16 %v1091_v51 }
 0x1bb   : > { %v1833_v15 = vmul.f32 0.796875, %v1769_v19  ;;  %v1770_v1 = vunpack.c.l.bf16 %v1727_v63  ;;  %v1409_v53 = vpack.c.bf16 %v1359_v52, %v1358_v59  ;;  %v1202_v62 = vmul.f32 %v4818_v24, %v4818_v24 }
 0x1bc   : > { %5674 = vst [vmem:[#allocation31_spill] sm:$0xff] %v4824_v10  ;;  %v1728_v7 = vpack.c.bf16 %v1677_v16, %v1676_v50  ;;  %v1296_v20 = vunpack.c.l.bf16 %v1250_v4  ;;  %v1297_v6 = vunpack.c.h.bf16 %v1250_v4  ;;  %v1203_v43 = vmul.f32 %v4824_v10, %v4824_v10 }
 0x1bd   : > { %v4830_v42 = vpack.c.bf16 %v1831_v32, %v1830_v56  ;;  %v1454_v54 = vunpack.c.l.bf16 %v1409_v53  ;;  %v1455_v40 = vunpack.c.h.bf16 %v1409_v53  ;;  %v910_v51 = vadd.f32 %v909_v35, %v4566_v14 }
 0x1be   : > { %v1771_v31 = vunpack.c.h.bf16 %v1727_v63  ;;  %v1772_v19 = vunpack.c.l.bf16 %v1728_v7  ;;  %v1360_v59 = vmul.f32 %v1296_v20, %v4810_v25  ;;  %v1361_v52 = vmul.f32 %v1297_v6, %v4812_v26 }
 0x1bf   : > { %5675 = vst [vmem:[#allocation32_spill] sm:$0xff] %v4830_v42  ;;  %v1518_v23 = vmul.f32 0.044677734, %v1454_v54  ;;  %v1519_v50 = vmul.f32 0.044677734, %v1455_v40  ;;  %v1251_v16 = vpack.c.bf16 %v1203_v43, %v1202_v62  ;;  %v959_v4 = vadd.f32 %v958_v57, %v4568_v58 }
 0x1c0   : > { %v4836_v22 = vpack.c.bf16 %v1833_v15, %v1832_v37  ;;  %v1834_v38 = vmul.f32 0.796875, %v1770_v1  ;;  %v1773_v56 = vunpack.c.h.bf16 %v1728_v7  ;;  %v1410_v32 = vpack.c.bf16 %v1361_v52, %v1360_v59 }
 0x1c1   : > { %v1569_v42 = vpack.c.bf16 %v1519_v50, %v1518_v23  ;;  %v1298_v53 = vunpack.c.l.bf16 %v1251_v16  ;;  %v1299_v41 = vunpack.c.h.bf16 %v1251_v16  ;;  %v1092_v35 = vpack.c.bf16 %v959_v4, %v910_v51 }
 0x1c2   : > { %v1835_v63 = vmul.f32 0.796875, %v1771_v31  ;;  %v1836_v49 = vmul.f32 0.796875, %v1772_v19  ;;  %v1456_v34 = vunpack.c.l.bf16 %v1410_v32  ;;  %v1457_v20 = vunpack.c.h.bf16 %v1410_v32 }
 0x1c3   : > { %v1614_v12 = vunpack.c.l.bf16 %v1569_v42  ;;  %v1615_v6 = vunpack.c.h.bf16 %v1569_v42  ;;  %v1362_v54 = vmul.f32 %v1298_v53, %v4818_v24  ;;  %v1363_v62 = vmul.f32 %v1299_v41, %v4824_v10 }
 0x1c4   : > { %v1520_v43 = vmul.f32 0.044677734, %v1456_v34  ;;  %v1521_v37 = vmul.f32 0.044677734, %v1457_v20  ;;  %v4840_v15 = vunpack.c.l.bf16 %v1092_v35  ;;  %v4842_v1 = vunpack.c.h.bf16 %v1092_v35 }
 0x1c5   : > { %v1837_v23 = vmul.f32 0.796875, %v1773_v56  ;;  %v1678_v7 = vadd.f32 %v1614_v12, %v4796_v55  ;;  %v1679_v57 = vadd.f32 %v1615_v6, %v4798_v29  ;;  %v1411_v40 = vpack.c.bf16 %v1363_v62, %v1362_v54 }
 0x1c6   : > { %5676 = vst [vmem:[#allocation33_spill] sm:$0xff] %v4840_v15  ;;  %v1570_v51 = vpack.c.bf16 %v1521_v37, %v1520_v43  ;;  %v1204_v42 = vmul.f32 %v4840_v15, %v4840_v15  ;;  %v1205_v31 = vmul.f32 %v4842_v1, %v4842_v1  ;;  %v1912_v41 = vmul.f32 0.5, %v4594_v44 }
 0x1c7   : > { %5677 = vst [vmem:[#allocation34_spill] sm:$0xff] %v4842_v1  ;;  %v1729_v34 = vpack.c.bf16 %v1679_v57, %v1678_v7  ;;  %v1458_v19 = vunpack.c.l.bf16 %v1411_v40  ;;  %v1459_v59 = vunpack.c.h.bf16 %v1411_v40  ;;  %v1913_v52 = vmul.f32 0.5, %v4596_v47 }
 0x1c8   : > { %v1616_v50 = vunpack.c.l.bf16 %v1570_v51  ;;  %v1617_v16 = vunpack.c.h.bf16 %v1570_v51  ;;  %v1252_v12 = vpack.c.bf16 %v1205_v31, %v1204_v42  ;;  %v4854_v4 = vpack.c.bf16 %v4744_v3, %v4649_v33 }
 0x1c9   : > { %v1522_v56 = vmul.f32 0.044677734, %v1458_v19  ;;  %v1523_v32 = vmul.f32 0.044677734, %v1459_v59  ;;  %v2008_v53 = vunpack.c.l.bf16 %v4670_v11  ;;  %v2009_v35 = vunpack.c.h.bf16 %v4670_v11  ;;  %v1007_v19 = vpop.f32.mrf.mxu2 }
 0x1ca   : > { %v1680_v44 = vadd.f32 %v1616_v50, %v4810_v25  ;;  %v1681_v20 = vadd.f32 %v1617_v16, %v4812_v26  ;;  %v1300_v6 = vunpack.c.l.bf16 %v1252_v12  ;;  %v1301_v54 = vunpack.c.h.bf16 %v1252_v12 }
 0x1cb   : > { %v1774_v47 = vunpack.c.l.bf16 %v1729_v34  ;;  %v1775_v62 = vunpack.c.h.bf16 %v1729_v34  ;;  %v1571_v43 = vpack.c.bf16 %v1523_v32, %v1522_v56  ;;  %v5678_v37 = vunpack.c.l.bf16 %v4641_v9 }
 0x1cc   : > { %v1730_v33 = vpack.c.bf16 %v1681_v20, %v1680_v44  ;;  %v1364_v3 = vmul.f32 %v1300_v6, %v4840_v15  ;;  %v1365_v7 = vmul.f32 %v1301_v54, %v4842_v1  ;;  %v5679_v57 = vunpack.c.h.bf16 %v4641_v9  ;;  %v1056_v9 = vpop.f32.mrf.mxu3 }
 0x1cd   : > { %3617 = vtanh.f32 %v5678_v37  ;;  %v1618_v11 = vunpack.c.l.bf16 %v1571_v43  ;;  %v1619_v40 = vunpack.c.h.bf16 %v1571_v43  ;;  %v4866_v51 = vpack.c.bf16 %v1913_v52, %v1912_v41 }
 0x1ce   : > { %3619 = vtanh.f32 %v5679_v57  ;;  %v4868_v42 = vpack.c.bf16 %v1835_v63, %v1834_v38  ;;  %v1776_v31 = vunpack.c.l.bf16 %v1730_v33  ;;  %v1412_v34 = vpack.c.bf16 %v1365_v7, %v1364_v3 }
 0x1cf   : > { %3621 = vtanh.f32 %v2008_v53  ;;  %v4870_v59 = vpack.c.bf16 %v1837_v23, %v1836_v49  ;;  %v1777_v50 = vunpack.c.h.bf16 %v1730_v33  ;;  %v1682_v16 = vadd.f32 %v1618_v11, %v4818_v24 }
 0x1d0   : > { %3623 = vtanh.f32 %v2009_v35  ;;  %v1683_v12 = vadd.f32 %v1619_v40, %v4824_v10  ;;  %v4874_v56 = vmul.f32 0.796875, %v1774_v47  ;;  %v4876_v32 = vmul.f32 0.796875, %v1775_v62 }
 0x1d1   : > { %v1460_v41 = vunpack.c.l.bf16 %v1412_v34  ;;  %v1461_v52 = vunpack.c.h.bf16 %v1412_v34  ;;  %v2324_v53 = vunpack.c.l.bf16 %v4854_v4  ;;  %v2328_v35 = vunpack.c.l.bf16 %v4866_v51 }
 0x1d2   : > { %v1731_v63 = vpack.c.bf16 %v1683_v12, %v1682_v16  ;;  %v1008_v49 = vadd.f32 %v1007_v19, %v4572_v13  ;;  %v4881_v44 = vmul.f32 0.796875, %v1776_v31  ;;  %v1057_v54 = vadd.f32 %v1056_v9, %v4574_v18 }
 0x1d3   : > { %v3618_v38 = vpop.eup %3617  ;;  %v1524_v20 = vmul.f32 0.044677734, %v1460_v41  ;;  %v1525_v6 = vmul.f32 0.044677734, %v1461_v52  ;;  %v4884_v62 = vmul.f32 0.796875, %v1777_v50  ;;  %v2325_v37 = vunpack.c.h.bf16 %v4854_v4 }
 0x1d4   : > { %v3620_v23 = vpop.eup %3619  ;;  %v2329_v33 = vunpack.c.h.bf16 %v4866_v51  ;;  %v1778_v7 = vunpack.c.l.bf16 %v1731_v63  ;;  %v1779_v57 = vunpack.c.h.bf16 %v1731_v63  ;;  %v1093_v40 = vpack.c.bf16 %v1057_v54, %v1008_v49  ;;  %v911_v51 = vpop.f32.mrf.mxu0 }
 0x1d5   : > { %v3622_v47 = vpop.eup %3621  ;;  %v2132_v43 = vpack.c.bf16 %v3620_v23, %v3618_v38  ;;  %v1572_v11 = vpack.c.bf16 %v1525_v6, %v1524_v20  ;;  %v1910_v19 = vmul.f32 0.5, %v4588_v36  ;;  %v1911_v16 = vmul.f32 0.5, %v4590_v27  ;;  %v960_v23 = vpop.f32.mrf.mxu1 }
 0x1d6   : > { %v3624_v3 = vpop.eup %3623  ;;  %v4890_v41 = vunpack.c.l.bf16 %v1093_v40  ;;  %v1914_v63 = vmul.f32 0.5, %v4612_v2  ;;  %v4895_v36 = vunpack.c.h.bf16 %v1093_v40  ;;  %v961_v2 = vadd.f32 %v960_v23, %v4568_v58 }
 0x1d7   : > { %v2134_v34 = vpack.c.bf16 %v3624_v3, %v3622_v47  ;;  %v2164_v31 = vunpack.c.l.bf16 %v2132_v43  ;;  %v1620_v12 = vunpack.c.l.bf16 %v1572_v11  ;;  %v1621_v9 = vunpack.c.h.bf16 %v1572_v11 }
 0x1d8   : > { %v2165_v50 = vunpack.c.h.bf16 %v2132_v43  ;;  %v1206_v47 = vmul.f32 %v4890_v41, %v4890_v41  ;;  %v912_v43 = vadd.f32 %v911_v51, %v4566_v14  ;;  %v1915_v40 = vmul.f32 0.5, %v4614_v5 }
 0x1d9   : > { %v2168_v52 = vunpack.c.l.bf16 %v2134_v34  ;;  %v2169_v4 = vunpack.c.h.bf16 %v2134_v34  ;;  %v2228_v38 = vadd.f32 1.0, %v2164_v31  ;;  %v1684_v49 = vadd.f32 %v1620_v12, %v4840_v15 }
 0x1da   : > { %v1685_v20 = vadd.f32 %v1621_v9, %v4842_v1  ;;  %v2229_v6 = vadd.f32 1.0, %v2165_v50  ;;  %v1207_v34 = vmul.f32 %v4895_v36, %v4895_v36  ;;  %v1842_v31 = vmul.f32 0.796875, %v1778_v7 }
 0x1db   : > { %v2232_v27 = vadd.f32 1.0, %v2168_v52  ;;  %v2233_v54 = vadd.f32 1.0, %v2169_v4  ;;  %v1843_v12 = vmul.f32 0.796875, %v1779_v57  ;;  %v1094_v51 = vpack.c.bf16 %v961_v2, %v912_v43 }
 0x1dc   : > { %v1732_v3 = vpack.c.bf16 %v1685_v20, %v1684_v49  ;;  %v2292_v11 = vpack.c.bf16 %v2229_v6, %v2228_v38  ;;  %v1253_v24 = vpack.c.bf16 %v1207_v34, %v1206_v47 }
 0x1dd   : > { %v2294_v9 = vpack.c.bf16 %v2233_v54, %v2232_v27  ;;  %v4906_v27 = vunpack.c.l.bf16 %v1094_v51  ;;  %v4908_v5 = vunpack.c.h.bf16 %v1094_v51  ;;  %v5680_v54 = vunpack.c.l.bf16 %v4654_v0 }
 0x1de   : > { %v1780_v50 = vunpack.c.l.bf16 %v1732_v3  ;;  %v1781_v52 = vunpack.c.h.bf16 %v1732_v3  ;;  %v2388_v4 = vunpack.c.l.bf16 %v2292_v11  ;;  %v2389_v1 = vunpack.c.h.bf16 %v2292_v11 }
 0x1df   : > { %v2392_v15 = vunpack.c.l.bf16 %v2294_v9  ;;  %v2393_v10 = vunpack.c.h.bf16 %v2294_v9  ;;  %v1302_v23 = vunpack.c.l.bf16 %v1253_v24  ;;  %v1303_v7 = vunpack.c.h.bf16 %v1253_v24 }
 0x1e0   : > { %v1844_v49 = vmul.f32 0.796875, %v1780_v50  ;;  %v1845_v38 = vmul.f32 0.796875, %v1781_v52  ;;  %v2452_v20 = vmul.f32 %v2388_v4, %v2324_v53  ;;  %v2453_v6 = vmul.f32 %v2389_v1, %v2325_v37 }
 0x1e1   : > { %v2456_v29 = vmul.f32 %v2392_v15, %v2328_v35  ;;  %v2457_v55 = vmul.f32 %v2393_v10, %v2329_v33  ;;  %3625 = vtanh.f32 %v5680_v54  ;;  %v1366_v43 = vmul.f32 %v1302_v23, %v4890_v41 }
 0x1e2   : > { %v4904_v57 = vpack.c.bf16 %v1845_v38, %v1844_v49  ;;  %v1367_v53 = vmul.f32 %v1303_v7, %v4895_v36  ;;  %v4916_v10 = vpack.c.bf16 %v4876_v32, %v4874_v56  ;;  %v1208_v24 = vmul.f32 %v4906_v27, %v4906_v27  ;;  %v1009_v56 = vpop.f32.mrf.mxu2 }
 0x1e3   : > { %v2516_v3 = vpack.c.bf16 %v2456_v29, %v2452_v20  ;;  %v2517_v47 = vpack.c.bf16 %v2457_v55, %v2453_v6  ;;  %v1209_v15 = vmul.f32 %v4908_v5, %v4908_v5  ;;  %v4922_v1 = vpack.c.bf16 %v1911_v16, %v1910_v19  ;;  %v1058_v16 = vpop.f32.mrf.mxu3 }
 0x1e4   : > { %v1413_v29 = vpack.c.bf16 %v1367_v53, %v1366_v43  ;;  %v2010_v55 = vunpack.c.l.bf16 %v4729_v17  ;;  %v2011_v35 = vunpack.c.h.bf16 %v4729_v17  ;;  %v5681_v37 = vunpack.c.h.bf16 %v4654_v0 }
 0x1e5   : > { %2816 = vmatmul.bf16.vlgmr.msrb.gmra.mxu0 %v2516_v3  ;;  %2865 = vmatmul.bf16.vlgmr.msrb.gmra.mxu1 %v2517_v47  ;;  %v4930_v32 = vpack.c.bf16 %v4884_v62, %v4881_v44  ;;  %v4932_v33 = vpack.c.bf16 %v1843_v12, %v1842_v31  ;;  %v1254_v11 = vpack.c.bf16 %v1209_v15, %v1208_v24  ;;  %v2326_v62 = vunpack.c.l.bf16 %v4922_v1 }
 0x1e6   : > { %3627 = vtanh.f32 %v5681_v37  ;;  %v4934_v19 = vpack.c.bf16 %v1915_v40, %v1914_v63  ;;  %v1462_v2 = vunpack.c.l.bf16 %v1413_v29  ;;  %v1463_v9 = vunpack.c.h.bf16 %v1413_v29 }
 0x1e7   : > { %3629 = vtanh.f32 %v2010_v55  ;;  %v3626_v17 = vpop.eup %3625  ;;  %v1304_v50 = vunpack.c.l.bf16 %v1254_v11  ;;  %v1305_v0 = vunpack.c.h.bf16 %v1254_v11  ;;  %v1010_v52 = vadd.f32 %v1009_v56, %v4572_v13 }
 0x1e8   : > { %3631 = vtanh.f32 %v2011_v35  ;;  %v1526_v4 = vmul.f32 0.044677734, %v1462_v2  ;;  %v1527_v44 = vmul.f32 0.044677734, %v1463_v9  ;;  %v1059_v31 = vadd.f32 %v1058_v16, %v4574_v18 }
 0x1e9   : > { %v1368_v63 = vmul.f32 %v1304_v50, %v4906_v27  ;;  %v1369_v12 = vmul.f32 %v1305_v0, %v4908_v5  ;;  %v2330_v40 = vunpack.c.l.bf16 %v4934_v19  ;;  %v2327_v51 = vunpack.c.h.bf16 %v4922_v1  ;;  %v914_v0 = vpop.f32.mrf.mxu0 }
 0x1ea   : > { %v1573_v38 = vpack.c.bf16 %v1527_v44, %v1526_v4  ;;  %v2331_v20 = vunpack.c.h.bf16 %v4934_v19  ;;  %v1095_v6 = vpack.c.bf16 %v1059_v31, %v1010_v52  ;;  %v4946_v23 = vmul.f32 0.5, %v4622_v30  ;;  %v963_v52 = vpop.f32.mrf.mxu1 }
 0x1eb   : > { %v1414_v7 = vpack.c.bf16 %v1369_v12, %v1368_v63  ;;  %v4949_v3 = vmul.f32 0.5, %v4624_v8  ;;  %v4952_v47 = vmul.f32 0.5, %v4664_v61 }
 0x1ec   : > { %v3628_v49 = vpop.eup %3627  ;;  %v1622_v53 = vunpack.c.l.bf16 %v1573_v38  ;;  %v1623_v24 = vunpack.c.h.bf16 %v1573_v38  ;;  %v4954_v15 = vunpack.c.l.bf16 %v1095_v6  ;;  %v4956_v29 = vunpack.c.h.bf16 %v1095_v6 }
 0x1ed   : > { %v2133_v54 = vpack.c.bf16 %v3628_v49, %v3626_v17  ;;  %v3630_v43 = vpop.eup %3629  ;;  %v1464_v35 = vunpack.c.l.bf16 %v1414_v7  ;;  %v1465_v37 = vunpack.c.h.bf16 %v1414_v7  ;;  %v915_v38 = vadd.f32 %v914_v0, %v4566_v14 }
 0x1ee   : > { %v3632_v55 = vpop.eup %3631  ;;  %v1686_v11 = vadd.f32 %v1622_v53, %v4890_v41  ;;  %v1687_v8 = vadd.f32 %v1623_v24, %v4895_v36  ;;  %v1210_v61 = vmul.f32 %v4954_v15, %v4954_v15  ;;  %v1211_v63 = vmul.f32 %v4956_v29, %v4956_v29 }
 0x1ef   : > { %v2166_v30 = vunpack.c.l.bf16 %v2133_v54  ;;  %v2167_v56 = vunpack.c.h.bf16 %v2133_v54  ;;  %v2135_v16 = vpack.c.bf16 %v3632_v55, %v3630_v43  ;;  %v1528_v2 = vmul.f32 0.044677734, %v1464_v35 }
 0x1f0   : > { %v1529_v9 = vmul.f32 0.044677734, %v1465_v37  ;;  %v1733_v4 = vpack.c.bf16 %v1687_v8, %v1686_v11  ;;  %v964_v6 = vadd.f32 %v963_v52, %v4568_v58  ;;  %v1255_v8 = vpack.c.bf16 %v1211_v63, %v1210_v61 }
 0x1f1   : > { %v2230_v17 = vadd.f32 1.0, %v2166_v30  ;;  %v2231_v50 = vadd.f32 1.0, %v2167_v56  ;;  %v2170_v44 = vunpack.c.l.bf16 %v2135_v16  ;;  %v2171_v31 = vunpack.c.h.bf16 %v2135_v16 }
 0x1f2   : > { %v1574_v12 = vpack.c.bf16 %v1529_v9, %v1528_v2  ;;  %v1782_v7 = vunpack.c.l.bf16 %v1733_v4  ;;  %v1783_v54 = vunpack.c.h.bf16 %v1733_v4  ;;  %v1921_v9 = vmul.f32 0.5, %v4666_v46 }
 0x1f3   : > { %v2293_v49 = vpack.c.bf16 %v2231_v50, %v2230_v17  ;;  %v2234_v43 = vadd.f32 1.0, %v2170_v44  ;;  %v2235_v53 = vadd.f32 1.0, %v2171_v31  ;;  %v2012_v17 = vunpack.c.l.bf16 %v4735_v48 }
 0x1f4   : > { %v1624_v24 = vunpack.c.l.bf16 %v1574_v12  ;;  %v1625_v55 = vunpack.c.h.bf16 %v1574_v12  ;;  %v1846_v30 = vmul.f32 0.796875, %v1782_v7  ;;  %v1847_v56 = vmul.f32 0.796875, %v1783_v54 }
 0x1f5   : > { %v2390_v35 = vunpack.c.l.bf16 %v2293_v49  ;;  %v2391_v37 = vunpack.c.h.bf16 %v2293_v49  ;;  %v2295_v11 = vpack.c.bf16 %v2235_v53, %v2234_v43  ;;  %v1306_v52 = vunpack.c.l.bf16 %v1255_v8 }
 0x1f6   : > { %v1688_v16 = vadd.f32 %v1624_v24, %v4906_v27  ;;  %v1689_v2 = vadd.f32 %v1625_v55, %v4908_v5  ;;  %v2013_v4 = vunpack.c.h.bf16 %v4735_v48  ;;  %v1307_v12 = vunpack.c.h.bf16 %v1255_v8 }
 0x1f7   : > { %v2394_v50 = vunpack.c.l.bf16 %v2295_v11  ;;  %v2395_v0 = vunpack.c.h.bf16 %v2295_v11  ;;  %v2454_v31 = vmul.f32 %v2390_v35, %v2326_v62  ;;  %v1096_v49 = vpack.c.bf16 %v964_v6, %v915_v38 }
 0x1f8   : > { %v1734_v44 = vpack.c.bf16 %v1689_v2, %v1688_v16  ;;  %v4973_v61 = vpack.c.bf16 %v1847_v56, %v1846_v30  ;;  %v2455_v46 = vmul.f32 %v2391_v37, %v2327_v51  ;;  %v1370_v53 = vmul.f32 %v1306_v52, %v4954_v15  ;;  %v1012_v2 = vpop.f32.mrf.mxu2 }
 0x1f9   : > { %v2458_v63 = vmul.f32 %v2394_v50, %v2330_v40  ;;  %v2459_v7 = vmul.f32 %v2395_v0, %v2331_v20  ;;  %v1371_v48 = vmul.f32 %v1307_v12, %v4956_v29  ;;  %v4981_v62 = vunpack.c.l.bf16 %v1096_v49  ;;  %v1061_v50 = vpop.f32.mrf.mxu3 }
 0x1fa   : > { %v1784_v54 = vunpack.c.l.bf16 %v1734_v44  ;;  %v1785_v43 = vunpack.c.h.bf16 %v1734_v44  ;;  %v4983_v38 = vunpack.c.h.bf16 %v1096_v49  ;;  %v2016_v40 = vunpack.c.l.bf16 %v4765_v28 }
 0x1fb   : > { %v2518_v24 = vpack.c.bf16 %v2458_v63, %v2454_v31  ;;  %v2519_v55 = vpack.c.bf16 %v2459_v7, %v2455_v46  ;;  %v1415_v19 = vpack.c.bf16 %v1371_v48, %v1370_v53  ;;  %v1212_v1 = vmul.f32 %v4981_v62, %v4981_v62 }
 0x1fc   : > { %v1848_v6 = vmul.f32 0.796875, %v1784_v54  ;;  %v1849_v35 = vmul.f32 0.796875, %v1785_v43  ;;  %v1213_v51 = vmul.f32 %v4983_v38, %v4983_v38  ;;  %v2017_v20 = vunpack.c.h.bf16 %v4765_v28 }
 0x1fd   : > { %2914 = vmatmul.bf16.vlgmr.msrb.gmra.mxu2 %v2518_v24  ;;  %2963 = vmatmul.bf16.vlgmr.msrb.gmra.mxu3 %v2519_v55  ;;  %3633 = vtanh.f32 %v2012_v17  ;;  %v1466_v37 = vunpack.c.l.bf16 %v1415_v19  ;;  %v1467_v30 = vunpack.c.h.bf16 %v1415_v19  ;;  %v4993_v56 = vpack.c.bf16 %v4949_v3, %v4946_v23 }
 0x1fe   : > { %3635 = vtanh.f32 %v2013_v4  ;;  %v1256_v8 = vpack.c.bf16 %v1213_v51, %v1212_v1  ;;  %v4997_v16 = vpack.c.bf16 %v1921_v9, %v4952_v47  ;;  %v5001_v44 = vpack.c.bf16 %v1849_v35, %v1848_v6 }
 0x1ff   : > { %3637 = vtanh.f32 %v2016_v40  ;;  %v1530_v17 = vmul.f32 0.044677734, %v1466_v37  ;;  %v1531_v52 = vmul.f32 0.044677734, %v1467_v30  ;;  %v2332_v31 = vunpack.c.l.bf16 %v4993_v56 }
 0x200   : > { %v1308_v23 = vunpack.c.l.bf16 %v1256_v8  ;;  %v1309_v3 = vunpack.c.h.bf16 %v1256_v8  ;;  %3639 = vtanh.f32 %v2017_v20  ;;  %v1013_v47 = vadd.f32 %v1012_v2, %v4572_v13 }
 0x201   : > { %v1575_v4 = vpack.c.bf16 %v1531_v52, %v1530_v17  ;;  %v1062_v9 = vadd.f32 %v1061_v50, %v4574_v18  ;;  %v2336_v46 = vunpack.c.l.bf16 %v4997_v16  ;;  %v2333_v7 = vunpack.c.h.bf16 %v4993_v56 }
 0x202   : > { %v1372_v49 = vmul.f32 %v1308_v23, %v4981_v62  ;;  %v1373_v63 = vmul.f32 %v1309_v3, %v4983_v38  ;;  %v2337_v48 = vunpack.c.h.bf16 %v4997_v16  ;;  %v1918_v19 = vmul.f32 0.5, %v4652_v45 }
 0x203   : > { %v3634_v12 = vpop.eup %3633  ;;  %v1626_v43 = vunpack.c.l.bf16 %v1575_v4  ;;  %v1627_v53 = vunpack.c.h.bf16 %v1575_v4  ;;  %v1097_v24 = vpack.c.bf16 %v1062_v9, %v1013_v47  ;;  %v1919_v40 = vmul.f32 0.5, %v4656_v60 }
 0x204   : > { %v3636_v54 = vpop.eup %3635  ;;  %v1416_v6 = vpack.c.bf16 %v1373_v63, %v1372_v49 }
 0x205   : > { %v3638_v55 = vpop.eup %3637  ;;  %v2136_v35 = vpack.c.bf16 %v3636_v54, %v3634_v12  ;;  %v1690_v1 = vadd.f32 %v1626_v43, %v4954_v15  ;;  %v1691_v51 = vadd.f32 %v1627_v53, %v4956_v29  ;;  %v5015_v20 = vunpack.c.l.bf16 %v1097_v24 }
 0x206   : > { %v5017_v37 = vunpack.c.h.bf16 %v1097_v24  ;;  %v3640_v30 = vpop.eup %3639  ;;  %v1468_v8 = vunpack.c.l.bf16 %v1416_v6  ;;  %v1469_v2 = vunpack.c.h.bf16 %v1416_v6  ;;  %v1922_v6 = vmul.f32 0.5, %v4682_v39 }
 0x207   : > { %5682 = vst [vmem:[#allocation35_spill] sm:$0xff] %v5015_v20  ;;  %v2172_v50 = vunpack.c.l.bf16 %v2136_v35  ;;  %v2173_v17 = vunpack.c.h.bf16 %v2136_v35  ;;  %v1735_v52 = vpack.c.bf16 %v1691_v51, %v1690_v1  ;;  %v2138_v23 = vpack.c.bf16 %v3640_v30, %v3638_v55  ;;  %v916_v30 = vpop.f32.mrf.mxu0 }
 0x208   : > { %5683 = vst [vmem:[#allocation36_spill] sm:$0xff] %v5017_v37  ;;  %v1214_v45 = vmul.f32 %v5015_v20, %v5015_v20  ;;  %v1215_v60 = vmul.f32 %v5017_v37, %v5017_v37  ;;  %v1532_v3 = vmul.f32 0.044677734, %v1468_v8  ;;  %v1533_v4 = vmul.f32 0.044677734, %v1469_v2  ;;  %v5684_v2 = vld [vmem:[#allocation15_spill] sm:$0xff] }
 0x209   : > { %v2236_v47 = vadd.f32 1.0, %v2172_v50  ;;  %v2237_v9 = vadd.f32 1.0, %v2173_v17  ;;  %v1786_v12 = vunpack.c.l.bf16 %v1735_v52  ;;  %v1787_v49 = vunpack.c.h.bf16 %v1735_v52 }
 0x20a   : > { %v2176_v63 = vunpack.c.l.bf16 %v2138_v23  ;;  %v2177_v54 = vunpack.c.h.bf16 %v2138_v23  ;;  %v1576_v43 = vpack.c.bf16 %v1533_v4, %v1532_v3  ;;  %v1257_v24 = vpack.c.bf16 %v1215_v60, %v1214_v45  ;;  %v965_v23 = vpop.f32.mrf.mxu1 }
 0x20b   : > { %v2296_v53 = vpack.c.bf16 %v2237_v9, %v2236_v47  ;;  %v1850_v55 = vmul.f32 0.796875, %v1786_v12  ;;  %v1851_v35 = vmul.f32 0.796875, %v1787_v49  ;;  %v1923_v50 = vmul.f32 0.5, %v5684_v2 }
 0x20c   : > { %v2240_v1 = vadd.f32 1.0, %v2176_v63  ;;  %v2241_v51 = vadd.f32 1.0, %v2177_v54  ;;  %v1628_v28 = vunpack.c.l.bf16 %v1576_v43  ;;  %v1629_v0 = vunpack.c.h.bf16 %v1576_v43  ;;  %v5685_v43 = vld [vmem:[#allocation22_spill] sm:$0xff] }
 0x20d   : > { %v2396_v8 = vunpack.c.l.bf16 %v2296_v53  ;;  %v2397_v11 = vunpack.c.h.bf16 %v2296_v53  ;;  %v1310_v52 = vunpack.c.l.bf16 %v1257_v24  ;;  %v1311_v34 = vunpack.c.h.bf16 %v1257_v24 }
 0x20e   : > { %v2298_v17 = vpack.c.bf16 %v2241_v51, %v2240_v1  ;;  %v1692_v3 = vadd.f32 %v1628_v28, %v4981_v62  ;;  %v1693_v45 = vadd.f32 %v1629_v0, %v4983_v38  ;;  %v917_v39 = vadd.f32 %v916_v30, %v4566_v14 }
 0x20f   : > { %v5028_v60 = vpack.c.bf16 %v1919_v40, %v1918_v19  ;;  %v5030_v4 = vpack.c.bf16 %v1851_v35, %v1850_v55  ;;  %v2460_v9 = vmul.f32 %v2396_v8, %v2332_v31  ;;  %v1374_v63 = vmul.f32 %v1310_v52, %v5015_v20 }
 0x210   : > { %v2400_v47 = vunpack.c.l.bf16 %v2298_v17  ;;  %v2401_v12 = vunpack.c.h.bf16 %v2298_v17  ;;  %v1736_v49 = vpack.c.bf16 %v1693_v45, %v1692_v3  ;;  %v1375_v54 = vmul.f32 %v1311_v34, %v5017_v37 }
 0x211   : > { %v966_v28 = vadd.f32 %v965_v23, %v4568_v58  ;;  %v2461_v19 = vmul.f32 %v2397_v11, %v2333_v7  ;;  %v2014_v53 = vunpack.c.l.bf16 %v5685_v43  ;;  %v2015_v30 = vunpack.c.h.bf16 %v5685_v43 }
 0x212   : > { %v2464_v0 = vmul.f32 %v2400_v47, %v2336_v46  ;;  %v2465_v40 = vmul.f32 %v2401_v12, %v2337_v48  ;;  %v1788_v24 = vunpack.c.l.bf16 %v1736_v49  ;;  %v1789_v55 = vunpack.c.h.bf16 %v1736_v49  ;;  %v1063_v47 = vpop.f32.mrf.mxu3 }
 0x213   : > { %v1417_v31 = vpack.c.bf16 %v1375_v54, %v1374_v63  ;;  %v1098_v35 = vpack.c.bf16 %v966_v28, %v917_v39  ;;  %v2018_v34 = vunpack.c.l.bf16 %v4794_v21  ;;  %v2019_v7 = vunpack.c.h.bf16 %v4794_v21  ;;  %v1014_v39 = vpop.f32.mrf.mxu2 }
 0x214   : > { %v2520_v1 = vpack.c.bf16 %v2464_v0, %v2460_v9  ;;  %v2521_v51 = vpack.c.bf16 %v2465_v40, %v2461_v19  ;;  %v1852_v8 = vmul.f32 0.796875, %v1788_v24  ;;  %v1853_v2 = vmul.f32 0.796875, %v1789_v55  ;;  %v5693_v9 = vld [vmem:[#allocation20_spill] sm:$0xff] }
 0x215   : > { %v1470_v16 = vunpack.c.l.bf16 %v1417_v31  ;;  %v1471_v46 = vunpack.c.h.bf16 %v1417_v31  ;;  %v5044_v56 = vunpack.c.l.bf16 %v1098_v35  ;;  %v5046_v11 = vunpack.c.h.bf16 %v1098_v35 }
 0x216   : > { %2821 = vmatmul.bf16.gmra.mxu0 %v2520_v1  ;;  %2870 = vmatmul.bf16.gmra.mxu1 %v2521_v51  ;;  %3641 = vtanh.f32 %v2014_v53  ;;  %v5049_v52 = vpack.c.bf16 %v1923_v50, %v1922_v6  ;;  %v5051_v23 = vpack.c.bf16 %v1853_v2, %v1852_v8  ;;  %v1015_v0 = vadd.f32 %v1014_v39, %v4572_v13  ;;  %v5692_v6 = vld [vmem:[#allocation17_spill] sm:$0xff] }
 0x217   : > { %5686 = vst [vmem:[#allocation15_spill] sm:$0xff] %v5044_v56  ;;  %v1534_v48 = vmul.f32 0.044677734, %v1470_v16  ;;  %v1535_v17 = vmul.f32 0.044677734, %v1471_v46  ;;  %3643 = vtanh.f32 %v2015_v30  ;;  %v1216_v3 = vmul.f32 %v5044_v56, %v5044_v56 }
 0x218   : > { %5687 = vst [vmem:[#allocation22_spill] sm:$0xff] %v5046_v11  ;;  %v1217_v45 = vmul.f32 %v5046_v11, %v5046_v11  ;;  %3645 = vtanh.f32 %v2018_v34  ;;  %v1064_v19 = vadd.f32 %v1063_v47, %v4574_v18  ;;  %v2338_v55 = vunpack.c.l.bf16 %v5049_v52 }
 0x219   : > { %5688 = vst [vmem:[#allocation37_spill] sm:$0xff] %v5051_v23  ;;  %v1577_v12 = vpack.c.bf16 %v1535_v17, %v1534_v48  ;;  %3647 = vtanh.f32 %v2019_v7  ;;  %v2335_v51 = vunpack.c.h.bf16 %v5028_v60  ;;  %v2339_v46 = vunpack.c.h.bf16 %v5049_v52 }
 0x21a   : > { %v1258_v49 = vpack.c.bf16 %v1217_v45, %v1216_v3  ;;  %v1099_v30 = vpack.c.bf16 %v1064_v19, %v1015_v0  ;;  %v5691_v45 = vld [vmem:[#allocation16_spill] sm:$0xff]  ;;  %v1925_v21 = vmul.f32 0.5, %v5692_v6  ;;  %v1928_v63 = vmul.f32 0.5, %v5693_v9 }
 0x21b   : > { %v1630_v54 = vunpack.c.l.bf16 %v1577_v12  ;;  %v1631_v28 = vunpack.c.h.bf16 %v1577_v12  ;;  %v5077_v39 = vmul.f32 0.5, %v5691_v45  ;;  %v5696_v6 = vunpack.c.l.bf16 %v5028_v60 }
 0x21c   : > { %v3642_v40 = vpop.eup %3641  ;;  %v1312_v53 = vunpack.c.l.bf16 %v1258_v49  ;;  %v1313_v24 = vunpack.c.h.bf16 %v1258_v49  ;;  %v5072_v17 = vunpack.c.l.bf16 %v1099_v30  ;;  %v5074_v3 = vunpack.c.h.bf16 %v1099_v30 }
 0x21d   : > { %v3644_v31 = vpop.eup %3643  ;;  %v1694_v35 = vadd.f32 %v1630_v54, %v5015_v20  ;;  %v1695_v1 = vadd.f32 %v1631_v28, %v5017_v37 }
 0x21e   : > { %v3646_v34 = vpop.eup %3645  ;;  %v1376_v8 = vmul.f32 %v1312_v53, %v5044_v56  ;;  %v1377_v2 = vmul.f32 %v1313_v24, %v5046_v11  ;;  %v2137_v16 = vpack.c.bf16 %v3644_v31, %v3642_v40  ;;  %5689 = vst [vmem:[#allocation38_spill] sm:$0xff] %v5072_v17  ;;  %v1218_v19 = vmul.f32 %v5072_v17, %v5072_v17 }
 0x21f   : > { %v3648_v7 = vpop.eup %3647  ;;  %v1737_v48 = vpack.c.bf16 %v1695_v1, %v1694_v35  ;;  %5690 = vst [vmem:[#allocation39_spill] sm:$0xff] %v5074_v3  ;;  %v1219_v52 = vmul.f32 %v5074_v3, %v5074_v3 }
 0x220   : > { %v1418_v47 = vpack.c.bf16 %v1377_v2, %v1376_v8  ;;  %v2139_v12 = vpack.c.bf16 %v3648_v7, %v3646_v34  ;;  %v2174_v49 = vunpack.c.l.bf16 %v2137_v16  ;;  %v2175_v54 = vunpack.c.h.bf16 %v2137_v16  ;;  %v919_v7 = vpop.f32.mrf.mxu0 }
 0x221   : > { %v1790_v28 = vunpack.c.l.bf16 %v1737_v48  ;;  %v1791_v0 = vunpack.c.h.bf16 %v1737_v48  ;;  %v968_v48 = vpop.f32.mrf.mxu1  ;;  %v1259_v50 = vpack.c.bf16 %v1219_v52, %v1218_v19 }
 0x222   : > { %v1472_v40 = vunpack.c.l.bf16 %v1418_v47  ;;  %v1473_v53 = vunpack.c.h.bf16 %v1418_v47  ;;  %v2178_v24 = vunpack.c.l.bf16 %v2139_v12  ;;  %v2179_v31 = vunpack.c.h.bf16 %v2139_v12 }
 0x223   : > { %v1854_v35 = vmul.f32 0.796875, %v1790_v28  ;;  %v1855_v1 = vmul.f32 0.796875, %v1791_v0  ;;  %v2238_v30 = vadd.f32 1.0, %v2174_v49  ;;  %v2239_v45 = vadd.f32 1.0, %v2175_v54  ;;  %v5695_v28 = vld [vmem:[#allocation21_spill] sm:$0xff] }
 0x224   : > { %v1536_v8 = vmul.f32 0.044677734, %v1472_v40  ;;  %v1537_v34 = vmul.f32 0.044677734, %v1473_v53  ;;  %v2242_v2 = vadd.f32 1.0, %v2178_v24  ;;  %v2243_v16 = vadd.f32 1.0, %v2179_v31 }
 0x225   : > { %v2297_v43 = vpack.c.bf16 %v2239_v45, %v2238_v30  ;;  %v5085_v37 = vpack.c.bf16 %v1855_v1, %v1854_v35  ;;  %v1929_v0 = vmul.f32 0.5, %v5695_v28  ;;  %v920_v40 = vadd.f32 %v919_v7, %v4566_v14 }
 0x226   : > { %v1578_v47 = vpack.c.bf16 %v1537_v34, %v1536_v8  ;;  %v2299_v12 = vpack.c.bf16 %v2243_v16, %v2242_v2  ;;  %v969_v53 = vadd.f32 %v968_v48, %v4568_v58  ;;  %v1314_v35 = vunpack.c.l.bf16 %v1259_v50  ;;  %v5697_v48 = vld [vmem:[#allocation29_spill] sm:$0xff] }
 0x227   : > { %5694 = vst [vmem:[#allocation16_spill] sm:$0xff] %v5085_v37  ;;  %v2398_v49 = vunpack.c.l.bf16 %v2297_v43  ;;  %v2399_v54 = vunpack.c.h.bf16 %v2297_v43  ;;  %v1315_v1 = vunpack.c.h.bf16 %v1259_v50 }
 0x228   : > { %v1632_v24 = vunpack.c.l.bf16 %v1578_v47  ;;  %v1633_v31 = vunpack.c.h.bf16 %v1578_v47  ;;  %v2402_v30 = vunpack.c.l.bf16 %v2299_v12  ;;  %v2403_v19 = vunpack.c.h.bf16 %v2299_v12 }
 0x229   : > { %v2462_v52 = vmul.f32 %v2398_v49, %v5696_v6  ;;  %v2463_v9 = vmul.f32 %v2399_v54, %v2335_v51  ;;  %v1378_v2 = vmul.f32 %v1314_v35, %v5072_v17  ;;  %v1379_v16 = vmul.f32 %v1315_v1, %v5074_v3 }
 0x22a   : > { %v1696_v45 = vadd.f32 %v1632_v24, %v5044_v56  ;;  %v1697_v8 = vadd.f32 %v1633_v31, %v5046_v11  ;;  %v2466_v34 = vmul.f32 %v2402_v30, %v2338_v55  ;;  %v2467_v43 = vmul.f32 %v2403_v19, %v2339_v46 }
 0x22b   : > { %v1100_v7 = vpack.c.bf16 %v969_v53, %v920_v40  ;;  %v2020_v47 = vunpack.c.l.bf16 %v5697_v48  ;;  %v2021_v51 = vunpack.c.h.bf16 %v5697_v48  ;;  %v1419_v49 = vpack.c.bf16 %v1379_v16, %v1378_v2 }
 0x22c   : > { %v1738_v12 = vpack.c.bf16 %v1697_v8, %v1696_v45  ;;  %v2522_v28 = vpack.c.bf16 %v2466_v34, %v2462_v52  ;;  %v2523_v60 = vpack.c.bf16 %v2467_v43, %v2463_v9  ;;  %v2024_v55 = vunpack.c.l.bf16 %v4836_v22  ;;  %v1066_v8 = vpop.f32.mrf.mxu3 }
 0x22d   : > { %v5098_v50 = vunpack.c.l.bf16 %v1100_v7  ;;  %v5100_v54 = vunpack.c.h.bf16 %v1100_v7  ;;  %v2025_v40 = vunpack.c.h.bf16 %v4836_v22  ;;  %3649 = vtanh.f32 %v2020_v47  ;;  %v1017_v22 = vpop.f32.mrf.mxu2 }
 0x22e   : > { %v1792_v46 = vunpack.c.l.bf16 %v1738_v12  ;;  %v1793_v24 = vunpack.c.h.bf16 %v1738_v12  ;;  %2919 = vmatmul.bf16.gmra.mxu2 %v2522_v28  ;;  %2968 = vmatmul.bf16.gmra.mxu3 %v2523_v60  ;;  %v1474_v53 = vunpack.c.l.bf16 %v1419_v49  ;;  %v1475_v31 = vunpack.c.h.bf16 %v1419_v49 }
 0x22f   : > { %v1220_v30 = vmul.f32 %v5098_v50, %v5098_v50  ;;  %v1221_v19 = vmul.f32 %v5100_v54, %v5100_v54  ;;  %v5109_v9 = vpack.c.bf16 %v1925_v21, %v5077_v39  ;;  %3651 = vtanh.f32 %v2021_v51 }
 0x230   : > { %v1856_v6 = vmul.f32 0.796875, %v1792_v46  ;;  %v1857_v52 = vmul.f32 0.796875, %v1793_v24  ;;  %v1538_v35 = vmul.f32 0.044677734, %v1474_v53  ;;  %v1539_v1 = vmul.f32 0.044677734, %v1475_v31 }
 0x231   : > { %v1260_v45 = vpack.c.bf16 %v1221_v19, %v1220_v30  ;;  %3653 = vtanh.f32 %v2024_v55  ;;  %v5113_v2 = vpack.c.bf16 %v1929_v0, %v1928_v63  ;;  %v2340_v12 = vunpack.c.l.bf16 %v5109_v9 }
 0x232   : > { %3655 = vtanh.f32 %v2025_v40  ;;  %v1579_v7 = vpack.c.bf16 %v1539_v1, %v1538_v35  ;;  %v5116_v47 = vpack.c.bf16 %v1857_v52, %v1856_v6  ;;  %v1018_v28 = vadd.f32 %v1017_v22, %v4572_v13  ;;  %v5700_v22 = vld [vmem:[#allocation18_spill] sm:$0xff] }
 0x233   : > { %v1316_v48 = vunpack.c.l.bf16 %v1260_v45  ;;  %v1317_v21 = vunpack.c.h.bf16 %v1260_v45  ;;  %v3650_v39 = vpop.eup %3649  ;;  %v1067_v60 = vadd.f32 %v1066_v8, %v4574_v18  ;;  %v2344_v46 = vunpack.c.l.bf16 %v5113_v2 }
 0x234   : > { %v1634_v51 = vunpack.c.l.bf16 %v1579_v7  ;;  %v1635_v49 = vunpack.c.h.bf16 %v1579_v7  ;;  %v2341_v24 = vunpack.c.h.bf16 %v5109_v9  ;;  %v2345_v40 = vunpack.c.h.bf16 %v5113_v2  ;;  %v5701_v7 = vld [vmem:[#allocation19_spill] sm:$0xff] }
 0x235   : > { %v1380_v63 = vmul.f32 %v1316_v48, %v5098_v50  ;;  %v1381_v0 = vmul.f32 %v1317_v21, %v5100_v54  ;;  %v3652_v55 = vpop.eup %3651  ;;  %v1101_v53 = vpack.c.bf16 %v1067_v60, %v1018_v28  ;;  %v1926_v8 = vmul.f32 0.5, %v5700_v22 }
 0x236   : > { %v1698_v30 = vadd.f32 %v1634_v51, %v5072_v17  ;;  %v1699_v19 = vadd.f32 %v1635_v49, %v5074_v3  ;;  %v2140_v52 = vpack.c.bf16 %v3652_v55, %v3650_v39  ;;  %v1927_v48 = vmul.f32 0.5, %v5701_v7  ;;  %v921_v17 = vpop.f32.mrf.mxu0 }
 0x237   : > { %v3654_v31 = vpop.eup %3653  ;;  %v1420_v6 = vpack.c.bf16 %v1381_v0, %v1380_v63  ;;  %v5128_v1 = vunpack.c.l.bf16 %v1101_v53  ;;  %v5130_v45 = vunpack.c.h.bf16 %v1101_v53 }
 0x238   : > { %v3656_v35 = vpop.eup %3655  ;;  %v1739_v9 = vpack.c.bf16 %v1699_v19, %v1698_v30  ;;  %v2180_v60 = vunpack.c.l.bf16 %v2140_v52  ;;  %v2181_v16 = vunpack.c.h.bf16 %v2140_v52 }
 0x239   : > { %5698 = vst [vmem:[#allocation17_spill] sm:$0xff] %v5128_v1  ;;  %v1476_v21 = vunpack.c.l.bf16 %v1420_v6  ;;  %v1477_v2 = vunpack.c.h.bf16 %v1420_v6  ;;  %v2142_v28 = vpack.c.bf16 %v3656_v35, %v3654_v31  ;;  %v1222_v51 = vmul.f32 %v5128_v1, %v5128_v1  ;;  %v5702_v31 = vld [vmem:[#allocation23_spill] sm:$0xff] }
 0x23a   : > { %5699 = vst [vmem:[#allocation20_spill] sm:$0xff] %v5130_v45  ;;  %v1223_v39 = vmul.f32 %v5130_v45, %v5130_v45  ;;  %v1794_v49 = vunpack.c.l.bf16 %v1739_v9  ;;  %v1795_v63 = vunpack.c.h.bf16 %v1739_v9  ;;  %v2244_v43 = vadd.f32 1.0, %v2180_v60  ;;  %v5703_v9 = vld [vmem:[#allocation24_spill] sm:$0xff] }
 0x23b   : > { %v1540_v0 = vmul.f32 0.044677734, %v1476_v21  ;;  %v1541_v55 = vmul.f32 0.044677734, %v1477_v2  ;;  %v2184_v53 = vunpack.c.l.bf16 %v2142_v28  ;;  %v2185_v22 = vunpack.c.h.bf16 %v2142_v28 }
 0x23c   : > { %v2245_v7 = vadd.f32 1.0, %v2181_v16  ;;  %v1858_v30 = vmul.f32 0.796875, %v1794_v49  ;;  %v1261_v6 = vpack.c.bf16 %v1223_v39, %v1222_v51  ;;  %v1930_v35 = vmul.f32 0.5, %v5702_v31  ;;  %v970_v16 = vpop.f32.mrf.mxu1 }
 0x23d   : > { %v1580_v19 = vpack.c.bf16 %v1541_v55, %v1540_v0  ;;  %v1859_v52 = vmul.f32 0.796875, %v1795_v63  ;;  %v2248_v34 = vadd.f32 1.0, %v2184_v53  ;;  %v2249_v3 = vadd.f32 1.0, %v2185_v22 }
 0x23e   : > { %v2300_v37 = vpack.c.bf16 %v2245_v7, %v2244_v43  ;;  %v1318_v11 = vunpack.c.l.bf16 %v1261_v6  ;;  %v1931_v21 = vmul.f32 0.5, %v5703_v9  ;;  %v1319_v60 = vunpack.c.h.bf16 %v1261_v6 }
 0x23f   : > { %v1636_v20 = vunpack.c.l.bf16 %v1580_v19  ;;  %v1637_v23 = vunpack.c.h.bf16 %v1580_v19  ;;  %v2302_v2 = vpack.c.bf16 %v2249_v3, %v2248_v34  ;;  %v922_v39 = vadd.f32 %v921_v17, %v4566_v14 }
 0x240   : > { %v2404_v56 = vunpack.c.l.bf16 %v2300_v37  ;;  %v2405_v28 = vunpack.c.h.bf16 %v2300_v37  ;;  %v5143_v63 = vpack.c.bf16 %v1927_v48, %v1926_v8  ;;  %v5145_v43 = vpack.c.bf16 %v1859_v52, %v1858_v30 }
 0x241   : > { %v1700_v49 = vadd.f32 %v1636_v20, %v5098_v50  ;;  %v1701_v51 = vadd.f32 %v1637_v23, %v5100_v54  ;;  %v2408_v0 = vunpack.c.l.bf16 %v2302_v2  ;;  %v2409_v53 = vunpack.c.h.bf16 %v2302_v2  ;;  %v5704_v23 = vld [vmem:[#allocation32_spill] sm:$0xff] }
 0x242   : > { %v2468_v55 = vmul.f32 %v2404_v56, %v2340_v12  ;;  %v1382_v3 = vmul.f32 %v1318_v11, %v5128_v1  ;;  %v1383_v37 = vmul.f32 %v1319_v60, %v5130_v45  ;;  %v971_v34 = vadd.f32 %v970_v16, %v4568_v58 }
 0x243   : > { %v1740_v22 = vpack.c.bf16 %v1701_v51, %v1700_v49  ;;  %v2472_v7 = vmul.f32 %v2408_v0, %v2344_v46  ;;  %v2469_v20 = vmul.f32 %v2405_v28, %v2341_v24  ;;  %v2473_v19 = vmul.f32 %v2409_v53, %v2345_v40  ;;  %v1068_v53 = vpop.f32.mrf.mxu3 }
 0x244   : > { %v2022_v6 = vunpack.c.l.bf16 %v5704_v23  ;;  %v1421_v48 = vpack.c.bf16 %v1383_v37, %v1382_v3  ;;  %v1102_v30 = vpack.c.bf16 %v971_v34, %v922_v39  ;;  %v2023_v56 = vunpack.c.h.bf16 %v5704_v23 }
 0x245   : > { %v1796_v17 = vunpack.c.l.bf16 %v1740_v22  ;;  %v1797_v8 = vunpack.c.h.bf16 %v1740_v22  ;;  %v2524_v31 = vpack.c.bf16 %v2472_v7, %v2468_v55  ;;  %v2525_v52 = vpack.c.bf16 %v2473_v19, %v2469_v20  ;;  %v1019_v55 = vpop.f32.mrf.mxu2  ;;  %v5710_v22 = vld [vmem:[#allocation26_spill] sm:$0xff] }
 0x246   : > { %v2026_v12 = vunpack.c.l.bf16 %v4868_v42  ;;  %v1478_v2 = vunpack.c.l.bf16 %v1421_v48  ;;  %v1479_v60 = vunpack.c.h.bf16 %v1421_v48  ;;  %v5153_v46 = vunpack.c.l.bf16 %v1102_v30 }
 0x247   : > { %v1860_v11 = vmul.f32 0.796875, %v1796_v17  ;;  %v1861_v9 = vmul.f32 0.796875, %v1797_v8  ;;  %2826 = vmatmul.bf16.gmra.mxu0 %v2524_v31  ;;  %2875 = vmatmul.bf16.gmra.mxu1 %v2525_v52  ;;  %v5155_v24 = vunpack.c.h.bf16 %v1102_v30  ;;  %v2027_v40 = vunpack.c.h.bf16 %v4868_v42 }
 0x248   : > { %3657 = vtanh.f32 %v2022_v6  ;;  %v1542_v28 = vmul.f32 0.044677734, %v1478_v2  ;;  %v1543_v16 = vmul.f32 0.044677734, %v1479_v60  ;;  %v5158_v49 = vpack.c.bf16 %v1931_v21, %v1930_v35 }
 0x249   : > { %5705 = vst [vmem:[#allocation21_spill] sm:$0xff] %v5155_v24  ;;  %3659 = vtanh.f32 %v2023_v56  ;;  %v5160_v51 = vpack.c.bf16 %v1861_v9, %v1860_v11  ;;  %v1224_v39 = vmul.f32 %v5153_v46, %v5153_v46  ;;  %v1225_v0 = vmul.f32 %v5155_v24, %v5155_v24 }
 0x24a   : > { %3661 = vtanh.f32 %v2026_v12  ;;  %v1581_v3 = vpack.c.bf16 %v1543_v16, %v1542_v28  ;;  %v1020_v19 = vadd.f32 %v1019_v55, %v4572_v13  ;;  %v1069_v23 = vadd.f32 %v1068_v53, %v4574_v18  ;;  %v5709_v53 = vld [vmem:[#allocation25_spill] sm:$0xff] }
 0x24b   : > { %5706 = vst [vmem:[#allocation29_spill] sm:$0xff] %v5160_v51  ;;  %3663 = vtanh.f32 %v2027_v40  ;;  %v1262_v37 = vpack.c.bf16 %v1225_v0, %v1224_v39  ;;  %v2346_v30 = vunpack.c.l.bf16 %v5158_v49  ;;  %v2343_v12 = vunpack.c.h.bf16 %v5143_v63 }
 0x24c   : > { %v1638_v7 = vunpack.c.l.bf16 %v1581_v3  ;;  %v1639_v20 = vunpack.c.h.bf16 %v1581_v3  ;;  %v1103_v11 = vpack.c.bf16 %v1069_v23, %v1020_v19  ;;  %v2347_v28 = vunpack.c.h.bf16 %v5158_v49 }
 0x24d   : > { %v1320_v8 = vunpack.c.l.bf16 %v1262_v37  ;;  %v1321_v48 = vunpack.c.h.bf16 %v1262_v37  ;;  %v5186_v3 = vmul.f32 0.5, %v5709_v53  ;;  %v1933_v34 = vmul.f32 0.5, %v5710_v22 }
 0x24e   : > { %v3658_v6 = vpop.eup %3657  ;;  %v1702_v52 = vadd.f32 %v1638_v7, %v5128_v1  ;;  %v1703_v56 = vadd.f32 %v1639_v20, %v5130_v45  ;;  %v5181_v0 = vunpack.c.l.bf16 %v1103_v11  ;;  %v5183_v55 = vunpack.c.h.bf16 %v1103_v11 }
 0x24f   : > { %v3660_v31 = vpop.eup %3659  ;;  %v1384_v2 = vmul.f32 %v1320_v8, %v5153_v46  ;;  %v1385_v60 = vmul.f32 %v1321_v48, %v5155_v24  ;;  %v1936_v45 = vmul.f32 0.5, %v4810_v25  ;;  %v5712_v22 = vunpack.c.l.bf16 %v5143_v63 }
 0x250   : > { %v3662_v9 = vpop.eup %3661  ;;  %v2141_v40 = vpack.c.bf16 %v3660_v31, %v3658_v6  ;;  %v1741_v39 = vpack.c.bf16 %v1703_v56, %v1702_v52  ;;  %5707 = vst [vmem:[#allocation18_spill] sm:$0xff] %v5181_v0  ;;  %v1226_v6 = vmul.f32 %v5181_v0, %v5181_v0  ;;  %v1227_v49 = vmul.f32 %v5183_v55, %v5183_v55 }
 0x251   : > { %v3664_v16 = vpop.eup %3663  ;;  %5708 = vst [vmem:[#allocation19_spill] sm:$0xff] %v5183_v55  ;;  %v1422_v37 = vpack.c.bf16 %v1385_v60, %v1384_v2 }
 0x252   : > { %v2143_v7 = vpack.c.bf16 %v3664_v16, %v3662_v9  ;;  %v2182_v20 = vunpack.c.l.bf16 %v2141_v40  ;;  %v2183_v19 = vunpack.c.h.bf16 %v2141_v40  ;;  %v1798_v23 = vunpack.c.l.bf16 %v1741_v39  ;;  %v924_v16 = vpop.f32.mrf.mxu0 }
 0x253   : > { %v1799_v8 = vunpack.c.h.bf16 %v1741_v39  ;;  %v1480_v48 = vunpack.c.l.bf16 %v1422_v37  ;;  %v1481_v31 = vunpack.c.h.bf16 %v1422_v37  ;;  %v973_v39 = vpop.f32.mrf.mxu1  ;;  %v1263_v42 = vpack.c.bf16 %v1227_v49, %v1226_v6 }
 0x254   : > { %v2186_v52 = vunpack.c.l.bf16 %v2143_v7  ;;  %v2187_v56 = vunpack.c.h.bf16 %v2143_v7  ;;  %v1862_v11 = vmul.f32 0.796875, %v1798_v23  ;;  %v2246_v53 = vadd.f32 1.0, %v2182_v20 }
 0x255   : > { %v1863_v17 = vmul.f32 0.796875, %v1799_v8  ;;  %v2247_v21 = vadd.f32 1.0, %v2183_v19  ;;  %v1544_v2 = vmul.f32 0.044677734, %v1480_v48  ;;  %v1545_v9 = vmul.f32 0.044677734, %v1481_v31 }
 0x256   : > { %v2250_v60 = vadd.f32 1.0, %v2186_v52  ;;  %v2251_v40 = vadd.f32 1.0, %v2187_v56  ;;  %v1937_v23 = vmul.f32 0.5, %v4812_v26  ;;  %v925_v8 = vadd.f32 %v924_v16, %v4566_v14 }
 0x257   : > { %v2301_v35 = vpack.c.bf16 %v2247_v21, %v2246_v53  ;;  %v5194_v1 = vpack.c.bf16 %v1863_v17, %v1862_v11  ;;  %v1582_v37 = vpack.c.bf16 %v1545_v9, %v1544_v2  ;;  %v974_v48 = vadd.f32 %v973_v39, %v4568_v58 }
 0x258   : > { %v2303_v7 = vpack.c.bf16 %v2251_v40, %v2250_v60  ;;  %v1322_v17 = vunpack.c.l.bf16 %v1263_v42  ;;  %v1323_v56 = vunpack.c.h.bf16 %v1263_v42  ;;  %v2028_v40 = vunpack.c.l.bf16 %v4870_v59 }
 0x259   : > { %5711 = vst [vmem:[#allocation23_spill] sm:$0xff] %v5194_v1  ;;  %v2406_v20 = vunpack.c.l.bf16 %v2301_v35  ;;  %v2407_v19 = vunpack.c.h.bf16 %v2301_v35  ;;  %v1640_v31 = vunpack.c.l.bf16 %v1582_v37  ;;  %v1641_v52 = vunpack.c.h.bf16 %v1582_v37 }
 0x25a   : > { %v2410_v21 = vunpack.c.l.bf16 %v2303_v7  ;;  %v2411_v6 = vunpack.c.h.bf16 %v2303_v7  ;;  %v1386_v2 = vmul.f32 %v1322_v17, %v5181_v0  ;;  %v1387_v9 = vmul.f32 %v1323_v56, %v5183_v55  ;;  %v1071_v17 = vpop.f32.mrf.mxu3  ;;  %v926_v1 = vpop.f32.mrf.mxu0 }
 0x25b   : > { %v2470_v49 = vmul.f32 %v2406_v20, %v5712_v22  ;;  %v2471_v25 = vmul.f32 %v2407_v19, %v2343_v12  ;;  %v1704_v11 = vadd.f32 %v1640_v31, %v5153_v46  ;;  %v1705_v26 = vadd.f32 %v1641_v52, %v5155_v24 }
 0x25c   : > { %v2474_v53 = vmul.f32 %v2410_v21, %v2346_v30  ;;  %v2475_v35 = vmul.f32 %v2411_v6, %v2347_v28  ;;  %v1104_v60 = vpack.c.bf16 %v974_v48, %v925_v8  ;;  %v2029_v12 = vunpack.c.h.bf16 %v4870_v59 }
 0x25d   : > { %v1742_v16 = vpack.c.bf16 %v1705_v26, %v1704_v11  ;;  %v1423_v37 = vpack.c.bf16 %v1387_v9, %v1386_v2  ;;  %v2032_v30 = vunpack.c.l.bf16 %v4930_v32  ;;  %v2033_v19 = vunpack.c.h.bf16 %v4930_v32  ;;  %v1022_v32 = vpop.f32.mrf.mxu2 }
 0x25e   : > { %v2526_v39 = vpack.c.bf16 %v2474_v53, %v2470_v49  ;;  %v2527_v63 = vpack.c.bf16 %v2475_v35, %v2471_v25  ;;  %v5207_v42 = vunpack.c.l.bf16 %v1104_v60  ;;  %v5209_v7 = vunpack.c.h.bf16 %v1104_v60 }
 0x25f   : > { %v1800_v28 = vunpack.c.l.bf16 %v1742_v16  ;;  %v1801_v20 = vunpack.c.h.bf16 %v1742_v16  ;;  %3665 = vtanh.f32 %v2028_v40  ;;  %v1482_v8 = vunpack.c.l.bf16 %v1423_v37 }
 0x260   : > { %2924 = vmatmul.bf16.gmra.mxu2 %v2526_v39  ;;  %2973 = vmatmul.bf16.gmra.mxu3 %v2527_v63  ;;  %v1483_v48 = vunpack.c.h.bf16 %v1423_v37  ;;  %v1228_v31 = vmul.f32 %v5207_v42, %v5207_v42  ;;  %v1229_v59 = vmul.f32 %v5209_v7, %v5209_v7  ;;  %v5218_v6 = vpack.c.bf16 %v1933_v34, %v5186_v3 }
 0x261   : > { %v1864_v52 = vmul.f32 0.796875, %v1800_v28  ;;  %v1865_v21 = vmul.f32 0.796875, %v1801_v20  ;;  %3667 = vtanh.f32 %v2029_v12  ;;  %v1546_v22 = vmul.f32 0.044677734, %v1482_v8 }
 0x262   : > { %v1547_v49 = vmul.f32 0.044677734, %v1483_v48  ;;  %v1264_v25 = vpack.c.bf16 %v1229_v59, %v1228_v31  ;;  %3669 = vtanh.f32 %v2032_v30  ;;  %v5222_v26 = vpack.c.bf16 %v1937_v23, %v1936_v45 }
 0x263   : > { %3671 = vtanh.f32 %v2033_v19  ;;  %v5225_v9 = vpack.c.bf16 %v1865_v21, %v1864_v52  ;;  %v2348_v60 = vunpack.c.l.bf16 %v5218_v6  ;;  %v1023_v40 = vadd.f32 %v1022_v32, %v4572_v13  ;;  %v5714_v32 = vld [vmem:[#allocation28_spill] sm:$0xff] }
 0x264   : > { %v1583_v35 = vpack.c.bf16 %v1547_v49, %v1546_v22  ;;  %v1324_v2 = vunpack.c.l.bf16 %v1264_v25  ;;  %v1325_v34 = vunpack.c.h.bf16 %v1264_v25  ;;  %v1072_v16 = vadd.f32 %v1071_v17, %v4574_v18  ;;  %v5713_v49 = vld [vmem:[#allocation27_spill] sm:$0xff] }
 0x265   : > { %v3666_v3 = vpop.eup %3665  ;;  %v2352_v37 = vunpack.c.l.bf16 %v5222_v26  ;;  %v2349_v30 = vunpack.c.h.bf16 %v5218_v6  ;;  %v2353_v28 = vunpack.c.h.bf16 %v5222_v26  ;;  %v1934_v25 = vmul.f32 0.5, %v5713_v49 }
 0x266   : > { %v1642_v39 = vunpack.c.l.bf16 %v1583_v35  ;;  %v1643_v63 = vunpack.c.h.bf16 %v1583_v35  ;;  %v1388_v45 = vmul.f32 %v1324_v2, %v5207_v42  ;;  %v1389_v23 = vmul.f32 %v1325_v34, %v5209_v7 }
 0x267   : > { %v3668_v12 = vpop.eup %3667  ;;  %v1105_v20 = vpack.c.bf16 %v1072_v16, %v1023_v40  ;;  %v1935_v17 = vmul.f32 0.5, %v5714_v32 }
 0x268   : > { %v3670_v19 = vpop.eup %3669  ;;  %v1706_v8 = vadd.f32 %v1642_v39, %v5181_v0  ;;  %v1707_v48 = vadd.f32 %v1643_v63, %v5183_v55  ;;  %v1424_v31 = vpack.c.bf16 %v1389_v23, %v1388_v45  ;;  %v2144_v59 = vpack.c.bf16 %v3668_v12, %v3666_v3 }
 0x269   : > { %v3672_v52 = vpop.eup %3671  ;;  %v5237_v21 = vunpack.c.l.bf16 %v1105_v20  ;;  %v5239_v22 = vunpack.c.h.bf16 %v1105_v20 }
 0x26a   : > { %v1743_v6 = vpack.c.bf16 %v1707_v48, %v1706_v8  ;;  %v1484_v35 = vunpack.c.l.bf16 %v1424_v31  ;;  %v1485_v26 = vunpack.c.h.bf16 %v1424_v31  ;;  %v2146_v2 = vpack.c.bf16 %v3672_v52, %v3670_v19  ;;  %v5715_v19 = vld [vmem:[#allocation30_spill] sm:$0xff] }
 0x26b   : > { %v2188_v34 = vunpack.c.l.bf16 %v2144_v59  ;;  %v2189_v40 = vunpack.c.h.bf16 %v2144_v59  ;;  %v1230_v16 = vmul.f32 %v5237_v21, %v5237_v21  ;;  %v1231_v3 = vmul.f32 %v5239_v22, %v5239_v22 }
 0x26c   : > { %v1802_v39 = vunpack.c.l.bf16 %v1743_v6  ;;  %v1803_v63 = vunpack.c.h.bf16 %v1743_v6  ;;  %v1548_v45 = vmul.f32 0.044677734, %v1484_v35  ;;  %v1549_v23 = vmul.f32 0.044677734, %v1485_v26  ;;  %v5716_v6 = vld [vmem:[#allocation31_spill] sm:$0xff] }
 0x26d   : > { %v2192_v12 = vunpack.c.l.bf16 %v2146_v2  ;;  %v2193_v20 = vunpack.c.h.bf16 %v2146_v2  ;;  %v2252_v49 = vadd.f32 1.0, %v2188_v34  ;;  %v2253_v32 = vadd.f32 1.0, %v2189_v40  ;;  %v975_v40 = vpop.f32.mrf.mxu1 }
 0x26e   : > { %v1866_v8 = vmul.f32 0.796875, %v1802_v39  ;;  %v1584_v48 = vpack.c.bf16 %v1549_v23, %v1548_v45  ;;  %v1265_v31 = vpack.c.bf16 %v1231_v3, %v1230_v16  ;;  %v1938_v52 = vmul.f32 0.5, %v5715_v19 }
 0x26f   : > { %v1867_v59 = vmul.f32 0.796875, %v1803_v63  ;;  %v2256_v53 = vadd.f32 1.0, %v2192_v12  ;;  %v2257_v11 = vadd.f32 1.0, %v2193_v20  ;;  %v2304_v56 = vpack.c.bf16 %v2253_v32, %v2252_v49 }
 0x270   : > { %v1644_v55 = vunpack.c.l.bf16 %v1584_v48  ;;  %v1645_v0 = vunpack.c.h.bf16 %v1584_v48  ;;  %v1326_v51 = vunpack.c.l.bf16 %v1265_v31  ;;  %v1939_v35 = vmul.f32 0.5, %v5716_v6 }
 0x271   : > { %v2306_v26 = vpack.c.bf16 %v2257_v11, %v2256_v53  ;;  %v2412_v24 = vunpack.c.l.bf16 %v2304_v56  ;;  %v2413_v2 = vunpack.c.h.bf16 %v2304_v56  ;;  %v1327_v34 = vunpack.c.h.bf16 %v1265_v31 }
 0x272   : > { %v1708_v39 = vadd.f32 %v1644_v55, %v5207_v42  ;;  %v1709_v16 = vadd.f32 %v1645_v0, %v5209_v7  ;;  %v927_v3 = vadd.f32 %v926_v1, %v4566_v14  ;;  %v5252_v63 = vpack.c.bf16 %v1935_v17, %v1934_v25 }
 0x273   : > { %v5254_v45 = vpack.c.bf16 %v1867_v59, %v1866_v8  ;;  %v2416_v23 = vunpack.c.l.bf16 %v2306_v26  ;;  %v2476_v12 = vmul.f32 %v2412_v24, %v2348_v60  ;;  %v2417_v20 = vunpack.c.h.bf16 %v2306_v26 }
 0x274   : > { %v1744_v49 = vpack.c.bf16 %v1709_v16, %v1708_v39  ;;  %v1390_v11 = vmul.f32 %v1326_v51, %v5237_v21  ;;  %v1391_v56 = vmul.f32 %v1327_v34, %v5239_v22  ;;  %v976_v53 = vadd.f32 %v975_v40, %v4568_v58  ;;  %v1024_v39 = vpop.f32.mrf.mxu2  ;;  %v1073_v16 = vpop.f32.mrf.mxu3 }
 0x275   : > { %v2480_v32 = vmul.f32 %v2416_v23, %v2352_v37  ;;  %v2477_v55 = vmul.f32 %v2413_v2, %v2349_v30  ;;  %v2481_v48 = vmul.f32 %v2417_v20, %v2353_v28  ;;  %v2030_v0 = vunpack.c.l.bf16 %v4916_v10 }
 0x276   : > { %v1804_v14 = vunpack.c.l.bf16 %v1744_v49  ;;  %v1805_v1 = vunpack.c.h.bf16 %v1744_v49  ;;  %v1425_v25 = vpack.c.bf16 %v1391_v56, %v1390_v11  ;;  %v1106_v17 = vpack.c.bf16 %v976_v53, %v927_v3 }
 0x277   : > { %v2528_v8 = vpack.c.bf16 %v2480_v32, %v2476_v12  ;;  %v2529_v31 = vpack.c.bf16 %v2481_v48, %v2477_v55  ;;  %v2031_v24 = vunpack.c.h.bf16 %v4916_v10  ;;  %v2034_v60 = vunpack.c.l.bf16 %v4932_v33 }
 0x278   : > { %v1868_v51 = vmul.f32 0.796875, %v1804_v14  ;;  %v1869_v19 = vmul.f32 0.796875, %v1805_v1  ;;  %v1486_v59 = vunpack.c.l.bf16 %v1425_v25  ;;  %v1487_v6 = vunpack.c.h.bf16 %v1425_v25 }
 0x279   : > { %2831 = vmatmul.bf16.gmra.mxu0 %v2528_v8  ;;  %2880 = vmatmul.bf16.gmra.mxu1 %v2529_v31  ;;  %v5262_v58 = vunpack.c.l.bf16 %v1106_v17  ;;  %v5264_v37 = vunpack.c.h.bf16 %v1106_v17  ;;  %v2035_v30 = vunpack.c.h.bf16 %v4932_v33  ;;  %3673 = vtanh.f32 %v2030_v0 }
 0x27a   : > { %v2056_v28 = vunpack.c.l.bf16 %v5225_v9  ;;  %v1550_v26 = vmul.f32 0.044677734, %v1486_v59  ;;  %v1551_v2 = vmul.f32 0.044677734, %v1487_v6  ;;  %3675 = vtanh.f32 %v2031_v24 }
 0x27b   : > { %v5268_v10 = vpack.c.bf16 %v1869_v19, %v1868_v51  ;;  %v1232_v34 = vmul.f32 %v5262_v58, %v5262_v58  ;;  %v1233_v40 = vmul.f32 %v5264_v37, %v5264_v37  ;;  %3677 = vtanh.f32 %v2034_v60 }
 0x27c   : > { %v2057_v3 = vunpack.c.h.bf16 %v5225_v9  ;;  %v1585_v33 = vpack.c.bf16 %v1551_v2, %v1550_v26  ;;  %v5275_v23 = vpack.c.bf16 %v1939_v35, %v1938_v52  ;;  %3679 = vtanh.f32 %v2035_v30  ;;  %v5717_v26 = vld [vmem:[#allocation33_spill] sm:$0xff] }
 0x27d   : > { %v2058_v12 = vunpack.c.l.bf16 %v5254_v45  ;;  %v1266_v49 = vpack.c.bf16 %v1233_v40, %v1232_v34  ;;  %v2350_v11 = vunpack.c.l.bf16 %v5252_v63  ;;  %v1025_v32 = vadd.f32 %v1024_v39, %v4572_v13 }
 0x27e   : > { %v1646_v56 = vunpack.c.l.bf16 %v1585_v33  ;;  %v1647_v53 = vunpack.c.h.bf16 %v1585_v33  ;;  %v1074_v55 = vadd.f32 %v1073_v16, %v4574_v18  ;;  %v2354_v8 = vunpack.c.l.bf16 %v5275_v23 }
 0x27f   : > { %v3674_v48 = vpop.eup %3673  ;;  %v1328_v35 = vunpack.c.l.bf16 %v1266_v49  ;;  %v1329_v14 = vunpack.c.h.bf16 %v1266_v49  ;;  %v2351_v51 = vunpack.c.h.bf16 %v5252_v63  ;;  %v1940_v2 = vmul.f32 0.5, %v5717_v26  ;;  %v5718_v63 = vld [vmem:[#allocation34_spill] sm:$0xff] }
 0x280   : > { %v3676_v1 = vpop.eup %3675  ;;  %v1710_v25 = vadd.f32 %v1646_v56, %v5237_v21  ;;  %v1711_v17 = vadd.f32 %v1647_v53, %v5239_v22  ;;  %v1107_v31 = vpack.c.bf16 %v1074_v55, %v1025_v32  ;;  %v1941_v53 = vmul.f32 0.5, %v5718_v63 }
 0x281   : > { %v3678_v24 = vpop.eup %3677  ;;  %v1392_v13 = vmul.f32 %v1328_v35, %v5262_v58  ;;  %v1393_v18 = vmul.f32 %v1329_v14, %v5264_v37  ;;  %v2145_v60 = vpack.c.bf16 %v3676_v1, %v3674_v48  ;;  %v1944_v26 = vmul.f32 0.5, %v4906_v27 }
 0x282   : > { %v3680_v19 = vpop.eup %3679  ;;  %v1745_v59 = vpack.c.bf16 %v1711_v17, %v1710_v25  ;;  %v5290_v6 = vunpack.c.l.bf16 %v1107_v31  ;;  %v5292_v30 = vunpack.c.h.bf16 %v1107_v31  ;;  %v2355_v17 = vunpack.c.h.bf16 %v5275_v23 }
 0x283   : > { %v1426_v34 = vpack.c.bf16 %v1393_v18, %v1392_v13  ;;  %v2147_v40 = vpack.c.bf16 %v3680_v19, %v3678_v24  ;;  %v2190_v39 = vunpack.c.l.bf16 %v2145_v60  ;;  %v2191_v16 = vunpack.c.h.bf16 %v2145_v60 }
 0x284   : > { %v1806_v33 = vunpack.c.l.bf16 %v1745_v59  ;;  %v1234_v49 = vmul.f32 %v5290_v6, %v5290_v6  ;;  %v1235_v56 = vmul.f32 %v5292_v30, %v5292_v30  ;;  %v1807_v14 = vunpack.c.h.bf16 %v1745_v59 }
 0x285   : > { %v1488_v32 = vunpack.c.l.bf16 %v1426_v34  ;;  %v1489_v55 = vunpack.c.h.bf16 %v1426_v34  ;;  %v2194_v48 = vunpack.c.l.bf16 %v2147_v40  ;;  %v2195_v35 = vunpack.c.h.bf16 %v2147_v40 }
 0x286   : > { %v2254_v1 = vadd.f32 1.0, %v2190_v39  ;;  %v2255_v25 = vadd.f32 1.0, %v2191_v16  ;;  %v1267_v19 = vpack.c.bf16 %v1235_v56, %v1234_v49  ;;  %v1945_v52 = vmul.f32 0.5, %v4908_v5 }
 0x287   : > { %v1552_v31 = vmul.f32 0.044677734, %v1488_v32  ;;  %v1553_v24 = vmul.f32 0.044677734, %v1489_v55  ;;  %v2258_v13 = vadd.f32 1.0, %v2194_v48  ;;  %v2259_v18 = vadd.f32 1.0, %v2195_v35 }
 0x288   : > { %v2305_v60 = vpack.c.bf16 %v2255_v25, %v2254_v1  ;;  %v1870_v63 = vmul.f32 0.796875, %v1806_v33  ;;  %v5303_v20 = vpack.c.bf16 %v1941_v53, %v1940_v2  ;;  %v1871_v59 = vmul.f32 0.796875, %v1807_v14 }
 0x289   : > { %v1586_v0 = vpack.c.bf16 %v1553_v24, %v1552_v31  ;;  %v2307_v34 = vpack.c.bf16 %v2259_v18, %v2258_v13  ;;  %v5719_v23 = vunpack.c.l.bf16 %v4904_v57  ;;  %v1330_v27 = vunpack.c.l.bf16 %v1267_v19 }
 0x28a   : > { %v2414_v40 = vunpack.c.l.bf16 %v2305_v60  ;;  %v2415_v39 = vunpack.c.h.bf16 %v2305_v60  ;;  %v1331_v35 = vunpack.c.h.bf16 %v1267_v19  ;;  %v5309_v14 = vpack.c.bf16 %v1871_v59, %v1870_v63 }
 0x28b   : > { %3681 = vtanh.f32 %v5719_v23  ;;  %v1648_v16 = vunpack.c.l.bf16 %v1586_v0  ;;  %v1649_v32 = vunpack.c.h.bf16 %v1586_v0  ;;  %v2418_v55 = vunpack.c.l.bf16 %v2307_v34 }
 0x28c   : > { %v2419_v48 = vunpack.c.h.bf16 %v2307_v34  ;;  %v2478_v49 = vmul.f32 %v2414_v40, %v2350_v11  ;;  %v2479_v56 = vmul.f32 %v2415_v39, %v2351_v51  ;;  %v1394_v1 = vmul.f32 %v1330_v27, %v5290_v6 }
 0x28d   : > { %v1712_v5 = vadd.f32 %v1648_v16, %v5262_v58  ;;  %v1713_v33 = vadd.f32 %v1649_v32, %v5264_v37  ;;  %v2482_v2 = vmul.f32 %v2418_v55, %v2354_v8  ;;  %v1395_v25 = vmul.f32 %v1331_v35, %v5292_v30 }
 0x28e   : > { %v2483_v53 = vmul.f32 %v2419_v48, %v2355_v17  ;;  %v5720_v0 = vunpack.c.h.bf16 %v4904_v57  ;;  %v5721_v24 = vunpack.c.l.bf16 %v5001_v44  ;;  %v5317_v60 = vpack.c.bf16 %v1945_v52, %v1944_v26 }
 0x28f   : > { %v1746_v31 = vpack.c.bf16 %v1713_v33, %v1712_v5  ;;  %v2530_v11 = vpack.c.bf16 %v2482_v2, %v2478_v49  ;;  %v1427_v18 = vpack.c.bf16 %v1395_v25, %v1394_v1  ;;  %v5722_v8 = vunpack.c.h.bf16 %v5001_v44 }
 0x290   : > { %3683 = vtanh.f32 %v5720_v0  ;;  %v2531_v51 = vpack.c.bf16 %v2483_v53, %v2479_v56  ;;  %v2356_v17 = vunpack.c.l.bf16 %v5303_v20  ;;  %v1942_v57 = vmul.f32 0.5, %v4890_v41 }
 0x291   : > { %3685 = vtanh.f32 %v5721_v24  ;;  %v3682_v13 = vpop.eup %3681  ;;  %v1808_v19 = vunpack.c.l.bf16 %v1746_v31  ;;  %v1809_v63 = vunpack.c.h.bf16 %v1746_v31  ;;  %2929 = vmatmul.bf16.gmra.mxu2 %v2530_v11  ;;  %v1943_v34 = vmul.f32 0.5, %v4895_v36 }
 0x292   : > { %3687 = vtanh.f32 %v5722_v8  ;;  %2978 = vmatmul.bf16.gmra.mxu3 %v2531_v51  ;;  %v1490_v59 = vunpack.c.l.bf16 %v1427_v18  ;;  %v1491_v40 = vunpack.c.h.bf16 %v1427_v18  ;;  %v1946_v39 = vmul.f32 0.5, %v4954_v15 }
 0x293   : > { %v1947_v52 = vmul.f32 0.5, %v4956_v29  ;;  %v2062_v26 = vunpack.c.l.bf16 %v5309_v14  ;;  %v1872_v44 = vmul.f32 0.796875, %v1808_v19  ;;  %v1873_v23 = vmul.f32 0.796875, %v1809_v63 }
 0x294   : > { %v5723_v16 = vunpack.c.l.bf16 %v4973_v61  ;;  %v1554_v55 = vmul.f32 0.044677734, %v1490_v59  ;;  %v1555_v48 = vmul.f32 0.044677734, %v1491_v40  ;;  %v5329_v49 = vpack.c.bf16 %v1943_v34, %v1942_v57 }
 0x295   : > { %v5724_v41 = vunpack.c.h.bf16 %v4973_v61  ;;  %v2063_v15 = vunpack.c.h.bf16 %v5309_v14  ;;  %v5334_v29 = vpack.c.bf16 %v1947_v52, %v1946_v39  ;;  %v5725_v27 = vunpack.c.l.bf16 %v5030_v4 }
 0x296   : > { %3689 = vtanh.f32 %v5723_v16  ;;  %v3684_v32 = vpop.eup %3683  ;;  %v1587_v5 = vpack.c.bf16 %v1555_v48, %v1554_v55  ;;  %v2360_v33 = vunpack.c.l.bf16 %v5317_v60  ;;  %v2357_v2 = vunpack.c.h.bf16 %v5303_v20 }
 0x297   : > { %3691 = vtanh.f32 %v5724_v41  ;;  %v3686_v36 = vpop.eup %3685  ;;  %v2148_v56 = vpack.c.bf16 %v3684_v32, %v3682_v13  ;;  %v5726_v53 = vunpack.c.h.bf16 %v5030_v4  ;;  %v5342_v61 = vpack.c.bf16 %v1873_v23, %v1872_v44  ;;  %v5727_v41 = vld [vmem:[#allocation15_spill] sm:$0xff] }
 0x298   : > { %3693 = vtanh.f32 %v5725_v27  ;;  %v3688_v35 = vpop.eup %3687  ;;  %v2361_v0 = vunpack.c.h.bf16 %v5317_v60  ;;  %v1650_v31 = vunpack.c.l.bf16 %v1587_v5  ;;  %v1651_v11 = vunpack.c.h.bf16 %v1587_v5 }
 0x299   : > { %3695 = vtanh.f32 %v5726_v53  ;;  %v2150_v1 = vpack.c.bf16 %v3688_v35, %v3686_v36  ;;  %v2196_v25 = vunpack.c.l.bf16 %v2148_v56  ;;  %v2197_v51 = vunpack.c.h.bf16 %v2148_v56 }
 0x29a   : > { %v2358_v24 = vunpack.c.l.bf16 %v5329_v49  ;;  %v2362_v63 = vunpack.c.l.bf16 %v5334_v29  ;;  %v1714_v4 = vadd.f32 %v1650_v31, %v5290_v6  ;;  %v1715_v34 = vadd.f32 %v1651_v11, %v5292_v30 }
 0x29b   : > { %v2200_v18 = vunpack.c.l.bf16 %v2150_v1  ;;  %v2201_v8 = vunpack.c.h.bf16 %v2150_v1  ;;  %v2260_v19 = vadd.f32 1.0, %v2196_v25  ;;  %v2261_v59 = vadd.f32 1.0, %v2197_v51 }
 0x29c   : > { %v3690_v13 = vpop.eup %3689  ;;  %v2359_v40 = vunpack.c.h.bf16 %v5329_v49  ;;  %v1948_v23 = vmul.f32 0.5, %v4981_v62  ;;  %v1747_v32 = vpack.c.bf16 %v1715_v34, %v1714_v4  ;;  %v1949_v48 = vmul.f32 0.5, %v4983_v38 }
 0x29d   : > { %v3692_v57 = vpop.eup %3691  ;;  %v2264_v39 = vadd.f32 1.0, %v2200_v18  ;;  %v2265_v52 = vadd.f32 1.0, %v2201_v8  ;;  %v2308_v55 = vpack.c.bf16 %v2261_v59, %v2260_v19  ;;  %v1952_v36 = vmul.f32 0.5, %v5727_v41 }
 0x29e   : > { %v3694_v60 = vpop.eup %3693  ;;  %v2149_v44 = vpack.c.bf16 %v3692_v57, %v3690_v13  ;;  %v1810_v53 = vunpack.c.l.bf16 %v1747_v32  ;;  %v1811_v1 = vunpack.c.h.bf16 %v1747_v32  ;;  %v2064_v20 = vunpack.c.l.bf16 %v5342_v61 }
 0x29f   : > { %v3696_v16 = vpop.eup %3695  ;;  %v2310_v56 = vpack.c.bf16 %v2265_v52, %v2264_v39  ;;  %v2420_v25 = vunpack.c.l.bf16 %v2308_v55  ;;  %v2421_v31 = vunpack.c.h.bf16 %v2308_v55 }
 0x2a0   : > { %v2151_v27 = vpack.c.bf16 %v3696_v16, %v3694_v60  ;;  %v2198_v35 = vunpack.c.l.bf16 %v2149_v44  ;;  %v2199_v5 = vunpack.c.h.bf16 %v2149_v44  ;;  %v1874_v62 = vmul.f32 0.796875, %v1810_v53  ;;  %v5728_v44 = vld [vmem:[#allocation22_spill] sm:$0xff] }
 0x2a1   : > { %v2424_v11 = vunpack.c.l.bf16 %v2310_v56  ;;  %v2425_v51 = vunpack.c.h.bf16 %v2310_v56  ;;  %v1875_v8 = vmul.f32 0.796875, %v1811_v1  ;;  %v2484_v19 = vmul.f32 %v2420_v25, %v2356_v17  ;;  %v5729_v56 = vld [vmem:[#allocation37_spill] sm:$0xff] }
 0x2a2   : > { %v2202_v13 = vunpack.c.l.bf16 %v2151_v27  ;;  %v2203_v18 = vunpack.c.h.bf16 %v2151_v27  ;;  %v2485_v38 = vmul.f32 %v2421_v31, %v2357_v2  ;;  %v2262_v34 = vadd.f32 1.0, %v2198_v35 }
 0x2a3   : > { %v2488_v57 = vmul.f32 %v2424_v11, %v2360_v33  ;;  %v2489_v4 = vmul.f32 %v2425_v51, %v2361_v0  ;;  %v2263_v59 = vadd.f32 1.0, %v2199_v5  ;;  %v5355_v60 = vpack.c.bf16 %v1875_v8, %v1874_v62  ;;  %v5734_v8 = vld [vmem:[#allocation35_spill] sm:$0xff] }
 0x2a4   : > { %v2266_v39 = vadd.f32 1.0, %v2202_v13  ;;  %v2267_v52 = vadd.f32 1.0, %v2203_v18  ;;  %v1953_v16 = vmul.f32 0.5, %v5728_v44  ;;  %v5730_v27 = vunpack.c.l.bf16 %v5729_v56 }
 0x2a5   : > { %v2532_v32 = vpack.c.bf16 %v2488_v57, %v2484_v19  ;;  %v2533_v55 = vpack.c.bf16 %v2489_v4, %v2485_v38  ;;  %v2309_v41 = vpack.c.bf16 %v2263_v59, %v2262_v34  ;;  %v2065_v17 = vunpack.c.h.bf16 %v5342_v61  ;;  %v5735_v38 = vld [vmem:[#allocation36_spill] sm:$0xff]  ;;  %v5736_v34 = vld [vmem:[#allocation38_spill] sm:$0xff] }
 0x2a6   : > { %3697 = vtanh.f32 %v5730_v27  ;;  %v2311_v33 = vpack.c.bf16 %v2267_v52, %v2266_v39  ;;  %v5731_v2 = vunpack.c.h.bf16 %v5729_v56  ;;  %v5364_v5 = vpack.c.bf16 %v1949_v48, %v1948_v23  ;;  %v5737_v39 = vld [vmem:[#allocation16_spill] sm:$0xff] }
 0x2a7   : > { %2836 = vmatmul.bf16.gmra.mxu0 %v2532_v32  ;;  %2885 = vmatmul.bf16.gmra.mxu1 %v2533_v55  ;;  %v2422_v0 = vunpack.c.l.bf16 %v2309_v41  ;;  %v2423_v35 = vunpack.c.h.bf16 %v2309_v41  ;;  %v5732_v53 = vunpack.c.l.bf16 %v5116_v47  ;;  %v2363_v25 = vunpack.c.h.bf16 %v5334_v29 }
 0x2a8   : > { %3699 = vtanh.f32 %v5731_v2  ;;  %v2426_v1 = vunpack.c.l.bf16 %v2311_v33  ;;  %v2427_v31 = vunpack.c.h.bf16 %v2311_v33  ;;  %v5733_v11 = vunpack.c.h.bf16 %v5116_v47 }
 0x2a9   : > { %3701 = vtanh.f32 %v5732_v53  ;;  %v2066_v51 = vunpack.c.l.bf16 %v5355_v60  ;;  %v2486_v13 = vmul.f32 %v2422_v0, %v2358_v24  ;;  %v2487_v18 = vmul.f32 %v2423_v35, %v2359_v40 }
 0x2aa   : > { %3703 = vtanh.f32 %v5733_v11  ;;  %v5374_v62 = vpack.c.bf16 %v1953_v16, %v1952_v36  ;;  %v2490_v23 = vmul.f32 %v2426_v1, %v2362_v63  ;;  %v2491_v48 = vmul.f32 %v2427_v31, %v2363_v25  ;;  %v5739_v36 = vld [vmem:[#allocation39_spill] sm:$0xff] }
 0x2ab   : > { %v1950_v19 = vmul.f32 0.5, %v5734_v8  ;;  %v1951_v57 = vmul.f32 0.5, %v5735_v38  ;;  %v2067_v29 = vunpack.c.h.bf16 %v5355_v60  ;;  %v2364_v47 = vunpack.c.l.bf16 %v5364_v5 }
 0x2ac   : > { %v3698_v4 = vpop.eup %3697  ;;  %v1954_v59 = vmul.f32 0.5, %v5736_v34  ;;  %v5738_v52 = vunpack.c.l.bf16 %v5737_v39  ;;  %v2534_v24 = vpack.c.bf16 %v2490_v23, %v2486_v13  ;;  %v2535_v40 = vpack.c.bf16 %v2491_v48, %v2487_v18  ;;  %v5743_v13 = vld [vmem:[#allocation21_spill] sm:$0xff] }
 0x2ad   : > { %v1955_v63 = vmul.f32 0.5, %v5739_v36  ;;  %v5740_v44 = vunpack.c.h.bf16 %v5737_v39  ;;  %v2368_v55 = vunpack.c.l.bf16 %v5374_v62  ;;  %v2365_v41 = vunpack.c.h.bf16 %v5364_v5  ;;  %v5744_v23 = vld [vmem:[#allocation29_spill] sm:$0xff] }
 0x2ae   : > { %3705 = vtanh.f32 %v5738_v52  ;;  %v3700_v49 = vpop.eup %3699  ;;  %v5741_v56 = vunpack.c.l.bf16 %v5145_v43  ;;  %2934 = vmatmul.bf16.gmra.mxu2 %v2534_v24  ;;  %2983 = vmatmul.bf16.gmra.mxu3 %v2535_v40  ;;  %v5390_v33 = vpack.c.bf16 %v1951_v57, %v1950_v19  ;;  %v5742_v2 = vunpack.c.h.bf16 %v5145_v43 }
 0x2af   : > { %3707 = vtanh.f32 %v5740_v44  ;;  %v3702_v16 = vpop.eup %3701  ;;  %v2152_v32 = vpack.c.bf16 %v3700_v49, %v3698_v4  ;;  %v1956_v0 = vmul.f32 0.5, %v5098_v50  ;;  %v1957_v35 = vmul.f32 0.5, %v5100_v54 }
 0x2b0   : > { %3709 = vtanh.f32 %v5741_v56  ;;  %v3704_v27 = vpop.eup %3703  ;;  %v2369_v5 = vunpack.c.h.bf16 %v5374_v62  ;;  %v5397_v31 = vpack.c.bf16 %v1955_v63, %v1954_v59  ;;  %v1960_v11 = vmul.f32 0.5, %v5153_v46 }
 0x2b1   : > { %3711 = vtanh.f32 %v5742_v2  ;;  %v2154_v53 = vpack.c.bf16 %v3704_v27, %v3702_v16  ;;  %v2204_v1 = vunpack.c.l.bf16 %v2152_v32  ;;  %v2205_v25 = vunpack.c.h.bf16 %v2152_v32 }
 0x2b2   : > { %v1961_v18 = vmul.f32 0.5, %v5743_v13  ;;  %v5745_v48 = vunpack.c.l.bf16 %v5744_v23  ;;  %v2366_v57 = vunpack.c.l.bf16 %v5390_v33  ;;  %v2367_v4 = vunpack.c.h.bf16 %v5390_v33 }
 0x2b3   : > { %v2208_v8 = vunpack.c.l.bf16 %v2154_v53  ;;  %v2209_v19 = vunpack.c.h.bf16 %v2154_v53  ;;  %v2268_v50 = vadd.f32 1.0, %v2204_v1  ;;  %v2269_v38 = vadd.f32 1.0, %v2205_v25 }
 0x2b4   : > { %3713 = vtanh.f32 %v5745_v48  ;;  %v3706_v43 = vpop.eup %3705  ;;  %v5405_v62 = vpack.c.bf16 %v1957_v35, %v1956_v0  ;;  %v5746_v34 = vunpack.c.h.bf16 %v5744_v23  ;;  %v2370_v40 = vunpack.c.l.bf16 %v5397_v31 }
 0x2b5   : > { %v3708_v54 = vpop.eup %3707  ;;  %v2272_v59 = vadd.f32 1.0, %v2208_v8  ;;  %v2273_v39 = vadd.f32 1.0, %v2209_v19  ;;  %v2312_v52 = vpack.c.bf16 %v2269_v38, %v2268_v50  ;;  %v2371_v36 = vunpack.c.h.bf16 %v5397_v31  ;;  %v5747_v31 = vld [vmem:[#allocation17_spill] sm:$0xff] }
 0x2b6   : > { %3715 = vtanh.f32 %v5746_v34  ;;  %v3710_v46 = vpop.eup %3709  ;;  %v2153_v49 = vpack.c.bf16 %v3708_v54, %v3706_v43  ;;  %v5411_v63 = vpack.c.bf16 %v1961_v18, %v1960_v11  ;;  %v2372_v35 = vunpack.c.l.bf16 %v5405_v62  ;;  %v5748_v34 = vld [vmem:[#allocation20_spill] sm:$0xff] }
 0x2b7   : > { %v3712_v24 = vpop.eup %3711  ;;  %3717 = vtanh.f32 %v2056_v28  ;;  %v2314_v44 = vpack.c.bf16 %v2273_v39, %v2272_v59  ;;  %v2428_v16 = vunpack.c.l.bf16 %v2312_v52  ;;  %v2429_v32 = vunpack.c.h.bf16 %v2312_v52 }
 0x2b8   : > { %v2155_v56 = vpack.c.bf16 %v3712_v24, %v3710_v46  ;;  %v2206_v2 = vunpack.c.l.bf16 %v2153_v49  ;;  %v2207_v0 = vunpack.c.h.bf16 %v2153_v49  ;;  %3719 = vtanh.f32 %v2057_v3 }
 0x2b9   : > { %v2432_v53 = vunpack.c.l.bf16 %v2314_v44  ;;  %v2492_v1 = vmul.f32 %v2428_v16, %v2364_v47  ;;  %v2433_v25 = vunpack.c.h.bf16 %v2314_v44  ;;  %v1958_v11 = vmul.f32 0.5, %v5747_v31 }
 0x2ba   : > { %v3714_v27 = vpop.eup %3713  ;;  %v2210_v18 = vunpack.c.l.bf16 %v2155_v56  ;;  %v2211_v28 = vunpack.c.h.bf16 %v2155_v56  ;;  %v2270_v23 = vadd.f32 1.0, %v2206_v2  ;;  %v2271_v48 = vadd.f32 1.0, %v2207_v0  ;;  %v5749_v56 = vld [vmem:[#allocation18_spill] sm:$0xff] }
 0x2bb   : > { %v2496_v43 = vmul.f32 %v2432_v53, %v2368_v55  ;;  %v2493_v8 = vmul.f32 %v2429_v32, %v2365_v41  ;;  %v2497_v19 = vmul.f32 %v2433_v25, %v2369_v5  ;;  %v1959_v46 = vmul.f32 0.5, %v5748_v34  ;;  %v5750_v32 = vld [vmem:[#allocation19_spill] sm:$0xff] }
 0x2bc   : > { %v3716_v13 = vpop.eup %3715  ;;  %v2274_v54 = vadd.f32 1.0, %v2210_v18  ;;  %v2275_v9 = vadd.f32 1.0, %v2211_v28  ;;  %v2313_v3 = vpack.c.bf16 %v2271_v48, %v2270_v23  ;;  %v1962_v2 = vmul.f32 0.5, %v5749_v56  ;;  %v5751_v28 = vld [vmem:[#allocation23_spill] sm:$0xff] }
 0x2bd   : > { %v2156_v50 = vpack.c.bf16 %v3716_v13, %v3714_v27  ;;  %v3718_v38 = vpop.eup %3717  ;;  %v2536_v59 = vpack.c.bf16 %v2496_v43, %v2492_v1  ;;  %v2537_v47 = vpack.c.bf16 %v2497_v19, %v2493_v8  ;;  %v1963_v27 = vmul.f32 0.5, %v5750_v32  ;;  %v2817_v32 = vpop.f32.mrf.mxu0 }
 0x2be   : > { %v3720_v49 = vpop.eup %3719  ;;  %v2315_v24 = vpack.c.bf16 %v2275_v9, %v2274_v54  ;;  %v2430_v44 = vunpack.c.l.bf16 %v2313_v3  ;;  %v2431_v16 = vunpack.c.h.bf16 %v2313_v3  ;;  %v5422_v1 = vpack.c.bf16 %v1959_v46, %v1958_v11 }
 0x2bf   : > { %v2212_v39 = vunpack.c.l.bf16 %v2156_v50  ;;  %v2213_v52 = vunpack.c.h.bf16 %v2156_v50  ;;  %2841 = vmatmul.bf16.gmra.mxu0 %v2536_v59  ;;  %2890 = vmatmul.bf16.gmra.mxu1 %v2537_v47  ;;  %v2158_v55 = vpack.c.bf16 %v3720_v49, %v3718_v38  ;;  %v5752_v23 = vunpack.c.l.bf16 %v5751_v28 }
 0x2c0   : > { %v2434_v0 = vunpack.c.l.bf16 %v2315_v24  ;;  %v2494_v53 = vmul.f32 %v2430_v44, %v2366_v57  ;;  %v2435_v25 = vunpack.c.h.bf16 %v2315_v24  ;;  %v2495_v43 = vmul.f32 %v2431_v16, %v2367_v4 }
 0x2c1   : > { %v2276_v41 = vadd.f32 1.0, %v2212_v39  ;;  %v2277_v5 = vadd.f32 1.0, %v2213_v52  ;;  %v2216_v31 = vunpack.c.l.bf16 %v2158_v55  ;;  %v2217_v13 = vunpack.c.h.bf16 %v2158_v55 }
 0x2c2   : > { %3721 = vtanh.f32 %v5752_v23  ;;  %v2498_v48 = vmul.f32 %v2434_v0, %v2370_v40  ;;  %v2499_v8 = vmul.f32 %v2435_v25, %v2371_v36  ;;  %v5753_v19 = vunpack.c.h.bf16 %v5751_v28 }
 0x2c3   : > { %v2316_v18 = vpack.c.bf16 %v2277_v5, %v2276_v41  ;;  %v2280_v50 = vadd.f32 1.0, %v2216_v31  ;;  %v2281_v38 = vadd.f32 1.0, %v2217_v13  ;;  %v5430_v54 = vpack.c.bf16 %v1963_v27, %v1962_v2  ;;  %v5456_v13 = vpop.f32.mrf.mxu2 }
 0x2c4   : > { %3723 = vtanh.f32 %v5753_v19  ;;  %v2538_v11 = vpack.c.bf16 %v2498_v48, %v2494_v53  ;;  %v2539_v9 = vpack.c.bf16 %v2499_v8, %v2495_v43  ;;  %v2376_v40 = vunpack.c.l.bf16 %v5411_v63 }
 0x2c5   : > { %v2436_v57 = vunpack.c.l.bf16 %v2316_v18  ;;  %v2437_v3 = vunpack.c.h.bf16 %v2316_v18  ;;  %3725 = vtanh.f32 %v2058_v12  ;;  %v2318_v34 = vpack.c.bf16 %v2281_v38, %v2280_v50  ;;  %v5458_v18 = vpop.f32.mrf.mxu3 }
 0x2c6   : > { %v2373_v33 = vunpack.c.h.bf16 %v5405_v62  ;;  %v5754_v4 = vunpack.c.h.bf16 %v5254_v45  ;;  %2939 = vmatmul.bf16.gmra.mxu2 %v2538_v11  ;;  %2988 = vmatmul.bf16.gmra.mxu3 %v2539_v9  ;;  %v2377_v36 = vunpack.c.h.bf16 %v5411_v63  ;;  %v2374_v46 = vunpack.c.l.bf16 %v5422_v1 }
 0x2c7   : > { %v1964_v59 = vmul.f32 0.5, %v5207_v42  ;;  %v1965_v47 = vmul.f32 0.5, %v5209_v7  ;;  %v2440_v12 = vunpack.c.l.bf16 %v2318_v34  ;;  %v2500_v52 = vmul.f32 %v2436_v57, %v2372_v35 }
 0x2c8   : > { %3727 = vtanh.f32 %v5754_v4  ;;  %v3722_v39 = vpop.eup %3721  ;;  %v2441_v49 = vunpack.c.h.bf16 %v2318_v34  ;;  %v2378_v24 = vunpack.c.l.bf16 %v5430_v54  ;;  %v2501_v44 = vmul.f32 %v2437_v3, %v2373_v33  ;;  %v2819_v4 = vpop.f32.mrf.mxu0 }
 0x2c9   : > { %v1968_v16 = vmul.f32 0.5, %v5262_v58  ;;  %v1969_v63 = vmul.f32 0.5, %v5264_v37  ;;  %v5755_v56 = vunpack.c.l.bf16 %v5268_v10  ;;  %v2504_v42 = vmul.f32 %v2440_v12, %v2376_v40  ;;  %v2866_v37 = vpop.f32.mrf.mxu1 }
 0x2ca   : > { %v3724_v45 = vpop.eup %3723  ;;  %v2505_v2 = vmul.f32 %v2441_v49, %v2377_v36  ;;  %v5449_v55 = vpack.c.bf16 %v1965_v47, %v1964_v59  ;;  %v2375_v62 = vunpack.c.h.bf16 %v5422_v1  ;;  %v2379_v35 = vunpack.c.h.bf16 %v5430_v54 }
 0x2cb   : > { %3729 = vtanh.f32 %v5755_v56  ;;  %v2157_v7 = vpack.c.bf16 %v3724_v45, %v3722_v39  ;;  %v3726_v41 = vpop.eup %3725  ;;  %v5756_v5 = vunpack.c.h.bf16 %v5268_v10  ;;  %v1966_v58 = vmul.f32 0.5, %v5237_v21  ;;  %v5468_v21 = vld [vmem:[%s5599_s4] ss:$0 sm:$0xff]  ;;  %v2917_v60 = vpop.f32.mrf.mxu2 }
 0x2cc   : > { %v2540_v0 = vpack.c.bf16 %v2504_v42, %v2500_v52  ;;  %v2541_v53 = vpack.c.bf16 %v2505_v2, %v2501_v44  ;;  %v5460_v23 = vpack.c.bf16 %v1969_v63, %v1968_v16  ;;  %v1967_v10 = vmul.f32 0.5, %v5239_v22 }
 0x2cd   : > { %3731 = vtanh.f32 %v5756_v5  ;;  %v2214_v25 = vunpack.c.l.bf16 %v2157_v7  ;;  %v2215_v31 = vunpack.c.h.bf16 %v2157_v7  ;;  %v2380_v8 = vunpack.c.l.bf16 %v5449_v55 }
 0x2ce   : > { %v3728_v27 = vpop.eup %3727  ;;  %3733 = vtanh.f32 %v2064_v20  ;;  %v2381_v57 = vunpack.c.h.bf16 %v5449_v55  ;;  %v1970_v20 = vmul.f32 0.5, %v5290_v6  ;;  %v1971_v11 = vmul.f32 0.5, %v5292_v30 }
 0x2cf   : > { %v2159_v28 = vpack.c.bf16 %v3728_v27, %v3726_v41  ;;  %v2278_v48 = vadd.f32 1.0, %v2214_v25  ;;  %v2279_v43 = vadd.f32 1.0, %v2215_v31  ;;  %3735 = vtanh.f32 %v2065_v17  ;;  %2846 = vmatmul.bf16.gmra.mxu0 %v2540_v0  ;;  %2895 = vmatmul.bf16.gmra.mxu1 %v2541_v53 }
 0x2d0   : > { %3737 = vtanh.f32 %v2062_v26  ;;  %v2818_v3 = vadd.f32 %v5468_v21, %v2817_v32  ;;  %v2384_v30 = vunpack.c.l.bf16 %v5460_v23  ;;  %v2385_v14 = vunpack.c.h.bf16 %v5460_v23 }
 0x2d1   : > { %v3730_v19 = vpop.eup %3729  ;;  %v2218_v50 = vunpack.c.l.bf16 %v2159_v28  ;;  %v2219_v38 = vunpack.c.h.bf16 %v2159_v28  ;;  %v2317_v22 = vpack.c.bf16 %v2279_v43, %v2278_v48  ;;  %3739 = vtanh.f32 %v2063_v15  ;;  %v2868_v36 = vpop.f32.mrf.mxu1 }
 0x2d2   : > { %3741 = vtanh.f32 %v2066_v51  ;;  %v5487_v15 = vpack.c.bf16 %v1967_v10, %v1966_v58  ;;  %v5491_v12 = vpack.c.bf16 %v1971_v11, %v1970_v20  ;;  %v2867_v2 = vadd.f32 %v2866_v37, %v2818_v3 }
 0x2d3   : > { %v3732_v61 = vpop.eup %3731  ;;  %v2282_v17 = vadd.f32 1.0, %v2218_v50  ;;  %v2283_v9 = vadd.f32 1.0, %v2219_v38  ;;  %v2438_v34 = vunpack.c.l.bf16 %v2317_v22  ;;  %v2439_v26 = vunpack.c.h.bf16 %v2317_v22  ;;  %v2822_v50 = vpop.f32.mrf.mxu0 }
 0x2d4   : > { %v2160_v40 = vpack.c.bf16 %v3732_v61, %v3730_v19  ;;  %3743 = vtanh.f32 %v2067_v29  ;;  %v3734_v6 = vpop.eup %3733  ;;  %v2966_v29 = vpop.f32.mrf.mxu3  ;;  %v2820_v7 = vadd.f32 %v5468_v21, %v2819_v4  ;;  %v2916_v53 = vadd.f32 %v5456_v13, %v2867_v2 }
 0x2d5   : > { %v2319_v33 = vpack.c.bf16 %v2283_v9, %v2282_v17  ;;  %v3736_v59 = vpop.eup %3735  ;;  %v2502_v51 = vmul.f32 %v2438_v34, %v2374_v46  ;;  %v2503_v44 = vmul.f32 %v2439_v26, %v2375_v62  ;;  %v2920_v17 = vpop.f32.mrf.mxu2 }
 0x2d6   : > { %v2220_v47 = vunpack.c.l.bf16 %v2160_v40  ;;  %v2221_v39 = vunpack.c.h.bf16 %v2160_v40  ;;  %v3738_v52 = vpop.eup %3737  ;;  %v2162_v16 = vpack.c.bf16 %v3736_v59, %v3734_v6  ;;  %v2869_v62 = vadd.f32 %v2868_v36, %v2820_v7 }
 0x2d7   : > { %v2442_v49 = vunpack.c.l.bf16 %v2319_v33  ;;  %v2443_v45 = vunpack.c.h.bf16 %v2319_v33  ;;  %v3740_v63 = vpop.eup %3739  ;;  %v3747_v33 = vld [vmem:[%s4117_s8] sm:$0xff]  ;;  %v2823_v36 = vadd.f32 %v5468_v21, %v2822_v50 }
 0x2d8   : > { %v2284_v56 = vadd.f32 1.0, %v2220_v47  ;;  %v2285_v42 = vadd.f32 1.0, %v2221_v39  ;;  %v3742_v41 = vpop.eup %3741  ;;  %v2224_v5 = vunpack.c.l.bf16 %v2162_v16  ;;  %v2225_v58 = vunpack.c.h.bf16 %v2162_v16 }
 0x2d9   : > { %v2506_v1 = vmul.f32 %v2442_v49, %v2378_v24  ;;  %v2507_v46 = vmul.f32 %v2443_v45, %v2379_v35  ;;  %v2161_v0 = vpack.c.bf16 %v3740_v63, %v3738_v52  ;;  %v2965_v35 = vadd.f32 %v5458_v18, %v2916_v53  ;;  %v2871_v38 = vpop.f32.mrf.mxu1 }
 0x2da   : > { %v3744_v32 = vpop.eup %3743  ;;  %v2320_v27 = vpack.c.bf16 %v2285_v42, %v2284_v56  ;;  %v2288_v37 = vadd.f32 1.0, %v2224_v5  ;;  %v2289_v28 = vadd.f32 1.0, %v2225_v58  ;;  %v2918_v22 = vadd.f32 %v2917_v60, %v2869_v62 }
 0x2db   : > { %v2542_v25 = vpack.c.bf16 %v2506_v1, %v2502_v51  ;;  %v2543_v31 = vpack.c.bf16 %v2507_v46, %v2503_v44  ;;  %v2163_v43 = vpack.c.bf16 %v3744_v32, %v3742_v41  ;;  %v2222_v19 = vunpack.c.l.bf16 %v2161_v0  ;;  %v3748_v44 = vld [vmem:[%s4117_s8 + $0x8] sm:$0xff]  ;;  %v2824_v56 = vpop.f32.mrf.mxu0 }
 0x2dc   : > { %v2444_v10 = vunpack.c.l.bf16 %v2320_v27  ;;  %v2445_v48 = vunpack.c.h.bf16 %v2320_v27  ;;  %v2322_v54 = vpack.c.bf16 %v2289_v28, %v2288_v37  ;;  %v2223_v24 = vunpack.c.h.bf16 %v2161_v0  ;;  %v2969_v9 = vpop.f32.mrf.mxu3  ;;  %v3749_v0 = vld [vmem:[%s4117_s8 + $0x10] sm:$0xff] }
 0x2dd   : > { %2944 = vmatmul.bf16.gmra.mxu2 %v2542_v25  ;;  %2993 = vmatmul.bf16.gmra.mxu3 %v2543_v31  ;;  %v2226_v11 = vunpack.c.l.bf16 %v2163_v43  ;;  %v2227_v61 = vunpack.c.h.bf16 %v2163_v43  ;;  %v2286_v26 = vadd.f32 1.0, %v2222_v19  ;;  %v3004_v4 = vadd.f32 %v3747_v33, %v2965_v35  ;;  %v2922_v46 = vpop.f32.mrf.mxu2 }
 0x2de   : > { %v2508_v13 = vmul.f32 %v2444_v10, %v2380_v8  ;;  %v2509_v20 = vmul.f32 %v2445_v48, %v2381_v57  ;;  %v2448_v3 = vunpack.c.l.bf16 %v2322_v54  ;;  %v2449_v34 = vunpack.c.h.bf16 %v2322_v54  ;;  %v3750_v48 = vld [vmem:[%s4117_s8 + $0x18] sm:$0xff] }
 0x2df   : > { %v2287_v40 = vadd.f32 1.0, %v2223_v24  ;;  %v2290_v18 = vadd.f32 1.0, %v2226_v11  ;;  %v2291_v6 = vadd.f32 1.0, %v2227_v61  ;;  %v2967_v59 = vadd.f32 %v2966_v29, %v2918_v22  ;;  %3020 = vst [vmem:[%s5514_s16] sm:$0xff] %v3004_v4 }
 0x2e0   : > { %v2512_v8 = vmul.f32 %v2448_v3, %v2384_v30  ;;  %v2513_v55 = vmul.f32 %v2449_v34, %v2385_v14  ;;  %v2386_v47 = vunpack.c.l.bf16 %v5491_v12  ;;  %v2387_v39 = vunpack.c.h.bf16 %v5491_v12 }
 0x2e1   : > { %v2321_v57 = vpack.c.bf16 %v2287_v40, %v2286_v26  ;;  %v2323_v51 = vpack.c.bf16 %v2291_v6, %v2290_v18  ;;  %v2872_v60 = vadd.f32 %v2871_v38, %v2823_v36  ;;  %v3005_v29 = vadd.f32 %v3748_v44, %v2967_v59  ;;  %v2873_v42 = vpop.f32.mrf.mxu1  ;;  %v3752_v26 = vld [vmem:[%s4117_s8 + $0x28] sm:$0xff] }
 0x2e2   : > { %v2544_v52 = vpack.c.bf16 %v2512_v8, %v2508_v13  ;;  %v2545_v49 = vpack.c.bf16 %v2513_v55, %v2509_v20  ;;  %v2382_v12 = vunpack.c.l.bf16 %v5487_v15  ;;  %v2383_v63 = vunpack.c.h.bf16 %v5487_v15  ;;  %v3751_v13 = vld [vmem:[%s4117_s8 + $0x20] sm:$0xff] }
 0x2e3   : > { %v2446_v30 = vunpack.c.l.bf16 %v2321_v57  ;;  %v2447_v23 = vunpack.c.h.bf16 %v2321_v57  ;;  %v2450_v45 = vunpack.c.l.bf16 %v2323_v51  ;;  %v2451_v14 = vunpack.c.h.bf16 %v2323_v51  ;;  %3021 = vst [vmem:[%s5514_s16 + $0x8] sm:$0xff] %v3005_v29  ;;  %v2827_v37 = vpop.f32.mrf.mxu0 }
 0x2e4   : > { %v2921_v16 = vadd.f32 %v2920_v17, %v2872_v60  ;;  %2851 = vmatmul.bf16.gmra.mxu0 %v2544_v52  ;;  %2900 = vmatmul.bf16.gmra.mxu1 %v2545_v49  ;;  %v2825_v41 = vadd.f32 %v5468_v21, %v2824_v56  ;;  %v2971_v32 = vpop.f32.mrf.mxu3  ;;  %v2828_v10 = vadd.f32 %v5468_v21, %v2827_v37 }
 0x2e5   : > { %v2514_v2 = vmul.f32 %v2450_v45, %v2386_v47  ;;  %v2515_v7 = vmul.f32 %v2451_v14, %v2387_v39  ;;  %v2510_v5 = vmul.f32 %v2446_v30, %v2382_v12  ;;  %v2511_v58 = vmul.f32 %v2447_v23, %v2383_v63  ;;  %v2925_v19 = vpop.f32.mrf.mxu2  ;;  %v3753_v47 = vld [vmem:[%s4117_s8 + $0x30] sm:$0xff]  ;;  %v3754_v14 = vld [vmem:[%s4117_s8 + $0x38] sm:$0xff] }
 0x2e6   : > { %v2970_v1 = vadd.f32 %v2969_v9, %v2921_v16  ;;  %v2874_v27 = vadd.f32 %v2873_v42, %v2825_v41 }
 0x2e7   : > { %v2546_v53 = vpack.c.bf16 %v2514_v2, %v2510_v5  ;;  %v2547_v15 = vpack.c.bf16 %v2515_v7, %v2511_v58  ;;  %v3755_v5 = vld [vmem:[%s4117_s8 + $0x40] sm:$0xff] }
 0x2e8   : > { %v3006_v62 = vadd.f32 %v3749_v0, %v2970_v1  ;;  %v2923_v25 = vadd.f32 %v2922_v46, %v2874_v27 }
 0x2e9   : > { %v2876_v28 = vpop.f32.mrf.mxu1 }
 0x2ea   : > { %3022 = vst [vmem:[%s5514_s16 + $0x10] sm:$0xff] %v3006_v62  ;;  %v2972_v31 = vadd.f32 %v2971_v32, %v2923_v25  ;;  %v2877_v54 = vadd.f32 %v2876_v28, %v2828_v10  ;;  %v3756_v25 = vld [vmem:[%s4117_s8 + $0x48] sm:$0xff] }
 0x2eb   : > { %v2829_v38 = vpop.f32.mrf.mxu0 }
 0x2ec   : > { %v3007_v43 = vadd.f32 %v3750_v48, %v2972_v31  ;;  %v2974_v24 = vpop.f32.mrf.mxu3  ;;  %v2926_v35 = vadd.f32 %v2925_v19, %v2877_v54  ;;  %v2830_v22 = vadd.f32 %v5468_v21, %v2829_v38  ;;  %v3757_v38 = vld [vmem:[%s4117_s8 + $0x50] sm:$0xff] }
 0x2ed   : > { %2949 = vmatmul.bf16.gmra.mxu2 %v2546_v53  ;;  %2998 = vmatmul.bf16.gmra.mxu3 %v2547_v15  ;;  %v2927_v61 = vpop.f32.mrf.mxu2 }
 0x2ee   : > { %3023 = vst [vmem:[%s5514_s16 + $0x18] sm:$0xff] %v3007_v43  ;;  %v2975_v50 = vadd.f32 %v2974_v24, %v2926_v35 }
 0x2f0   : > { %v3008_v20 = vadd.f32 %v3751_v13, %v2975_v50 }
 0x2f1   : > { %v2878_v11 = vpop.f32.mrf.mxu1 }
 0x2f2   : > { %v2879_v17 = vadd.f32 %v2878_v11, %v2830_v22  ;;  %3024 = vst [vmem:[%s5514_s16 + $0x20] sm:$0xff] %v3008_v20 }
 0x2f4   : > { %v2928_v9 = vadd.f32 %v2927_v61, %v2879_v17  ;;  %v2976_v3 = vpop.f32.mrf.mxu3 }
 0x2f6   : > { %v2977_v34 = vadd.f32 %v2976_v3, %v2928_v9  ;;  %v2832_v18 = vpop.f32.mrf.mxu0 }
 0x2f7   : > { %v2833_v6 = vadd.f32 %v5468_v21, %v2832_v18 }
 0x2f8   : > { %v3009_v40 = vadd.f32 %v3752_v26, %v2977_v34  ;;  %v3758_v34 = vld [vmem:[%s4117_s8 + $0x58] sm:$0xff] }
 0x2f9   : > { %v2881_v33 = vpop.f32.mrf.mxu1 }
 0x2fa   : > { %3025 = vst [vmem:[%s5514_s16 + $0x28] sm:$0xff] %v3009_v40  ;;  %v2882_v4 = vadd.f32 %v2881_v33, %v2833_v6 }
 0x2fe   : > { %v2834_v36 = vpop.f32.mrf.mxu0 }
 0x2ff   : > { %v2835_v59 = vadd.f32 %v5468_v21, %v2834_v36 }
 0x301   : > { %v2883_v60 = vpop.f32.mrf.mxu1 }
 0x302   : > { %v2884_v52 = vadd.f32 %v2883_v60, %v2835_v59  ;;  %v3759_v59 = vld [vmem:[%s4117_s8 + $0x60] sm:$0xff] }
 0x314   : > { %v2930_v8 = vpop.f32.mrf.mxu2 }
 0x315   : > { %v2979_v55 = vpop.f32.mrf.mxu3  ;;  %v2931_v57 = vadd.f32 %v2930_v8, %v2882_v4 }
 0x317   : > { %v2980_v51 = vadd.f32 %v2979_v55, %v2931_v57 }
 0x319   : > { %v3010_v39 = vadd.f32 %v3753_v47, %v2980_v51 }
 0x31b   : > { %3026 = vst [vmem:[%s5514_s16 + $0x30] sm:$0xff] %v3010_v39 }
 0x31c   : > { %v2932_v49 = vpop.f32.mrf.mxu2 }
 0x31d   : > { %v2933_v30 = vadd.f32 %v2932_v49, %v2884_v52  ;;  %v2981_v23 = vpop.f32.mrf.mxu3 }
 0x31f   : > { %v2982_v45 = vadd.f32 %v2981_v23, %v2933_v30 }
 0x321   : > { %v3011_v44 = vadd.f32 %v3754_v14, %v2982_v45  ;;  %v3760_v14 = vld [vmem:[%s4117_s8 + $0x68] sm:$0xff] }
 0x323   : > { %3027 = vst [vmem:[%s5514_s16 + $0x38] sm:$0xff] %v3011_v44 }
 0x324   : > { %v2837_v29 = vpop.f32.mrf.mxu0  ;;  %v2886_v16 = vpop.f32.mrf.mxu1 }
 0x325   : > { %v2838_v12 = vadd.f32 %v5468_v21, %v2837_v29 }
 0x327   : > { %v2887_v63 = vadd.f32 %v2886_v16, %v2838_v12 }
 0x32c   : > { %v2839_v56 = vpop.f32.mrf.mxu0  ;;  %v2888_v46 = vpop.f32.mrf.mxu1 }
 0x32d   : > { %v2840_v41 = vadd.f32 %v5468_v21, %v2839_v56 }
 0x32f   : > { %v2889_v32 = vadd.f32 %v2888_v46, %v2840_v41 }
 0x331   : > { %v2935_v42 = vpop.f32.mrf.mxu2  ;;  %v2984_v2 = vpop.f32.mrf.mxu3 }
 0x332   : > { %v2936_v7 = vadd.f32 %v2935_v42, %v2887_v63 }
 0x334   : > { %v2985_v1 = vadd.f32 %v2984_v2, %v2936_v7  ;;  %v3761_v7 = vld [vmem:[%s4117_s8 + $0x70] sm:$0xff] }
 0x336   : > { %v3012_v58 = vadd.f32 %v3755_v5, %v2985_v1 }
 0x338   : > { %3028 = vst [vmem:[%s5514_s16 + $0x40] sm:$0xff] %v3012_v58 }
 0x339   : > { %v2937_v27 = vpop.f32.mrf.mxu2  ;;  %v2986_v53 = vpop.f32.mrf.mxu3 }
 0x33a   : > { %v2938_v62 = vadd.f32 %v2937_v27, %v2889_v32  ;;  %v3762_v27 = vld [vmem:[%s4117_s8 + $0x78] sm:$0xff] }
 0x33c   : > { %v2842_v0 = vpop.f32.mrf.mxu0  ;;  %v2987_v15 = vadd.f32 %v2986_v53, %v2938_v62  ;;  %v2891_v37 = vpop.f32.mrf.mxu1 }
 0x33d   : > { %v2843_v28 = vadd.f32 %v5468_v21, %v2842_v0 }
 0x33e   : > { %v3013_v31 = vadd.f32 %v3756_v25, %v2987_v15 }
 0x33f   : > { %v2892_v48 = vadd.f32 %v2891_v37, %v2843_v28 }
 0x340   : > { %3029 = vst [vmem:[%s5514_s16 + $0x48] sm:$0xff] %v3013_v31 }
 0x344   : > { %v2844_v10 = vpop.f32.mrf.mxu0  ;;  %v2893_v24 = vpop.f32.mrf.mxu1 }
 0x345   : > { %v2845_v35 = vadd.f32 %v5468_v21, %v2844_v10 }
 0x347   : > { %v2894_v20 = vadd.f32 %v2893_v24, %v2845_v35 }
 0x349   : > { %v2940_v43 = vpop.f32.mrf.mxu2  ;;  %v2989_v19 = vpop.f32.mrf.mxu3 }
 0x34a   : > { %v2941_v54 = vadd.f32 %v2940_v43, %v2892_v48 }
 0x34c   : > { %v2990_v50 = vadd.f32 %v2989_v19, %v2941_v54  ;;  %v2847_v13 = vpop.f32.mrf.mxu0  ;;  %v2896_v3 = vpop.f32.mrf.mxu1 }
 0x34d   : > { %v2848_v40 = vadd.f32 %v5468_v21, %v2847_v13 }
 0x34e   : > { %v3014_v22 = vadd.f32 %v3757_v38, %v2990_v50 }
 0x34f   : > { %v2897_v6 = vadd.f32 %v2896_v3, %v2848_v40 }
 0x350   : > { %3030 = vst [vmem:[%s5514_s16 + $0x50] sm:$0xff] %v3014_v22 }
 0x351   : > { %v2942_v11 = vpop.f32.mrf.mxu2  ;;  %v2991_v17 = vpop.f32.mrf.mxu3 }
 0x352   : > { %v2943_v61 = vadd.f32 %v2942_v11, %v2894_v20 }
 0x354   : > { %v2992_v9 = vadd.f32 %v2991_v17, %v2943_v61  ;;  %v2849_v18 = vpop.f32.mrf.mxu0  ;;  %v2898_v8 = vpop.f32.mrf.mxu1 }
 0x355   : > { %v2850_v55 = vadd.f32 %v5468_v21, %v2849_v18 }
 0x356   : > { %v3015_v26 = vadd.f32 %v3758_v34, %v2992_v9 }
 0x357   : > { %v2899_v39 = vadd.f32 %v2898_v8, %v2850_v55 }
 0x358   : > { %3031 = vst [vmem:[%s5514_s16 + $0x58] sm:$0xff] %v3015_v26 }
 0x360   : > { %v2945_v33 = vpop.f32.mrf.mxu2  ;;  %v2994_v4 = vpop.f32.mrf.mxu3 }
 0x361   : > { %v2946_v36 = vadd.f32 %v2945_v33, %v2897_v6  ;;  %v2852_v47 = vpop.f32.mrf.mxu0  ;;  %v2901_v45 = vpop.f32.mrf.mxu1 }
 0x362   : > { %v2853_v30 = vadd.f32 %v5468_v21, %v2852_v47 }
 0x363   : > { %v2995_v57 = vadd.f32 %v2994_v4, %v2946_v36 }
 0x364   : > { %v2902_v29 = vadd.f32 %v2901_v45, %v2853_v30 }
 0x365   : > { %v3016_v51 = vadd.f32 %v3759_v59, %v2995_v57 }
 0x367   : > { %3032 = vst [vmem:[%s5514_s16 + $0x60] sm:$0xff] %v3016_v51 }
 0x368   : > { %v2947_v60 = vpop.f32.mrf.mxu2  ;;  %v2996_v52 = vpop.f32.mrf.mxu3 }
 0x369   : > { %v2948_v49 = vadd.f32 %v2947_v60, %v2899_v39  ;;  %v2854_v16 = vpop.f32.mrf.mxu0  ;;  %v2903_v1 = vpop.f32.mrf.mxu1 }
 0x36a   : > { %v2855_v42 = vadd.f32 %v5468_v21, %v2854_v16 }
 0x36b   : > { %v2997_v23 = vadd.f32 %v2996_v52, %v2948_v49 }
 0x36c   : > { %v2904_v46 = vadd.f32 %v2903_v1, %v2855_v42 }
 0x36d   : > { %v3017_v44 = vadd.f32 %v3760_v14, %v2997_v23 }
 0x36f   : > { %3033 = vst [vmem:[%s5514_s16 + $0x68] sm:$0xff] %v3017_v44 }
 0x370   : > { %v2950_v12 = vpop.f32.mrf.mxu2  ;;  %v2999_v63 = vpop.f32.mrf.mxu3 }
 0x371   : > { %v2951_v56 = vadd.f32 %v2950_v12, %v2902_v29 }
 0x373   : > { %v3000_v2 = vadd.f32 %v2999_v63, %v2951_v56 }
 0x375   : > { %v3018_v41 = vadd.f32 %v3761_v7, %v3000_v2 }
 0x377   : > { %3034 = vst [vmem:[%s5514_s16 + $0x70] sm:$0xff] %v3018_v41 }
 0x378   : > { %v2952_v5 = vpop.f32.mrf.mxu2  ;;  %v3001_v21 = vpop.f32.mrf.mxu3 }
 0x379   : > { %v2953_v58 = vadd.f32 %v2952_v5, %v2904_v46 }
 0x37b   : > { %v3002_v32 = vadd.f32 %v3001_v21, %v2953_v58 }
 0x37d   : > { %v3019_v0 = vadd.f32 %v3762_v27, %v3002_v32 }
 0x37f   : > { %3035 = vst [vmem:[%s5514_s16 + $0x78] sm:$0xff] %v3019_v0 }
 0x380   : > { %3910 = shalt.err (!%p3907_p10)
}
 0x381   : > { %s3969_s17 = smov 128   ;;  %s3970_s8 = smov 8  }
 0x382   : > { %3510 = dma.vmem_to_hbm [thread:$0]  (%p4083_p5), %s3050_s12, 2048, %s3052_s13, %s3037_s22, %s3969_s17, %s3969_s17, %s3970_s8  }
 0x383 PF: > { %p3537_p11 = scmp.ge.s32.totalorder %s3957_s21, 2  ;;  %s3066_s16 = sand.u32 1, %s3945_s18  }
 0x384   : > { %s3067_s23 = scalar_lea.sflag [#allocation4], %s3066_s16 }
 0x385   : > { %p3527_p12 = pnand %p3537_p11, %p4036_p6 }
 0x387   : > { %p3528_p13 = pneg %p3527_p12 }
 0x389   : > { %3940 = dma.done.wait (%p3528_p13), %s3067_s23, 2048  }
 0x38a   : > { %3942 = vsyncadd (%p3528_p13), %s3067_s23, 4294965248  ;;  %p20_p0 = scmp.ge.s32.totalorder %s4069_s30, 6   ;;  %s5757_s18 = smov %s3949_s19 }
 0x38b   : > { %s5758_s19 = smov %s3953_s20  ;;  %s5759_s20 = smov %s4079_s9 }
 0x38c   : > { %s5760_s21 = smov %s4069_s30  ;;  %22 = sbr.rel (!%p20_p0) target bundleno = 7 (0x7), region = 97 }
 0x391   :  { %3073 = vsyncpa [#allocation3], 1 }
 0x392   :  { %3075 = vsyncpa [#allocation3 + $0x1], 1 }
 0x393   :  { %3076 = vsyncpa [#allocation6], 1 }
 0x394   :  { %3077 = vsyncpa [#allocation9], 1 }
 0x395   :  { %3078 = vsyncpa [#allocation4], 1 }
 0x396   :  { %3080 = vsyncpa [#allocation4 + $0x1], 1 }

</bundles_post_ra>
